<compile_context>
chip_gen: v5e
topology: v5e:2x2
jax: 0.10.0
libtpu: 0.0.40
codegen_flags: <defaults>
</compile_context>

<pallas_src>
import functools

import jax
import jax.numpy as jnp
import numpy as np
from jax.experimental import pallas as pl
from jax.experimental.pallas import tpu as pltpu


# -----------------------------------------------------------------------------
# Tiling configuration (sized for v7x's 64 MiB VMEM; v5e/v6e could go larger).
# -----------------------------------------------------------------------------
VMEM_LIMIT_BYTES = 32 * 1024 * 1024
TM_CAP = 512     # spatial (P) tile cap
TN_CAP = 256     # output-channel tile cap (256-wide MXU on v6e/v7x)
TK_CAP = 512     # reduction (K) tile cap


def _round_up(x, m):
    return ((x + m - 1) // m) * m


def _pick_tile(padded, base, cap):
    """Largest multiple of `base` that divides `padded` and is <= cap."""
    best = base
    c = base
    top = min(padded, cap)
    while c <= top:
        if padded % c == 0:
            best = c
        c += base
    return best


# -----------------------------------------------------------------------------
# Fused tiled conv kernel: pre-act -> bf16 matmul -> (+bias) -> (tanh)
# plus per-channel sum / sum-of-squares accumulation for InstanceNorm.
# -----------------------------------------------------------------------------
def _make_conv_kernel(*, pre_act, post_act, use_norm):
    add_bias = not use_norm   # bias is exactly cancelled by InstanceNorm

    def kernel(*refs):
        if use_norm:
            x_ref, w_ref, y_ref, ssum_ref, ssq_ref, acc_ref = refs
            b_ref = None
        else:
            x_ref, w_ref, b_ref, y_ref, acc_ref = refs

        i = pl.program_id(3)          # P-tile index
        k = pl.program_id(4)          # K-tile index (reduction, innermost)
        nk = pl.num_programs(4)

        @pl.when(k == 0)
        def _zero_acc():
            acc_ref[...] = jnp.zeros_like(acc_ref)

        x = x_ref[...]                # (tm, tk) bf16 im2col patch tile
        # Pointwise pre-activation commutes with patch extraction / zero
        # padding because lrelu(0) == relu(0) == 0.  Done in f32 (v5e VPU has
        # no bf16 path), then cast back for the MXU.
        if pre_act == "lrelu":
            xf = x.astype(jnp.float32)
            x = jnp.where(xf > 0.0, xf, 0.2 * xf).astype(jnp.bfloat16)
        elif pre_act == "relu":
            x = jnp.maximum(x.astype(jnp.float32), 0.0).astype(jnp.bfloat16)

        acc_ref[...] += jnp.dot(x, w_ref[...],
                                preferred_element_type=jnp.float32)

        @pl.when(k == nk - 1)
        def _finish():
            y = acc_ref[...]
            if add_bias:
                y = y + b_ref[...]
            if post_act == "tanh":
                y = jnp.tanh(y)
            y_ref[...] = y
            if use_norm:
                # Stats blocks stay resident across the (P, K) grid axes;
                # zero on the first P tile, accumulate on every last-K step.
                @pl.when(i == 0)
                def _zero_stats():
                    ssum_ref[...] = jnp.zeros_like(ssum_ref)
                    ssq_ref[...] = jnp.zeros_like(ssq_ref)
                ssum_ref[...] = ssum_ref[...] + jnp.sum(y, axis=0, keepdims=True)
                ssq_ref[...] = ssq_ref[...] + jnp.sum(y * y, axis=0, keepdims=True)

    return kernel


def fused_conv_matmul(patches, wmat, bias, *, pre_act=None, use_norm=False,
                      post_act=None):
    """Tiled im2col conv matmul.

    patches: (B, N, P, K) float; wmat: (B, K, C); bias: (B, C).
    Returns (y, ssum, ssq): y is (B, N, Ppad, Cpad) f32 (Cpad = round_up(C,128)
    for lane-dense stores); ssum/ssq are (B, N, 1, Cpad) per-channel partial
    sums over the P axis (only when use_norm, else None).
    """
    B, N, P, K = patches.shape
    C = wmat.shape[-1]
    Pp = _round_up(max(P, 8), 8)
    Kp = _round_up(K, 128)
    Cp = _round_up(C, 128)

    # Zero padding keeps the matmul exact (padded K columns hit zero weight
    # rows; padded P rows stay exactly zero because bias is skipped under
    # norm, so they add nothing to the InstanceNorm statistics).
    patches = jnp.pad(patches, ((0, 0), (0, 0), (0, Pp - P), (0, Kp - K)))
    patches = patches.astype(jnp.bfloat16)
    wmat = jnp.pad(wmat, ((0, 0), (0, Kp - K), (0, Cp - C))).astype(jnp.bfloat16)

    tm = _pick_tile(Pp, 8, TM_CAP)
    tn = _pick_tile(Cp, 128, TN_CAP)
    tk = _pick_tile(Kp, 128, TK_CAP)
    grid = (B, N, Cp // tn, Pp // tm, Kp // tk)

    kernel = _make_conv_kernel(pre_act=pre_act, post_act=post_act,
                               use_norm=use_norm)

    in_specs = [
        pl.BlockSpec((None, None, tm, tk), lambda b, n, j, i, k: (b, n, i, k)),
        pl.BlockSpec((None, tk, tn), lambda b, n, j, i, k: (b, k, j)),
    ]
    inputs = [patches, wmat]
    if not use_norm:
        bpad = jnp.pad(bias.astype(jnp.float32), ((0, 0), (0, Cp - C)))
        inputs.append(bpad.reshape(B, 1, Cp))
        in_specs.append(
            pl.BlockSpec((None, 1, tn), lambda b, n, j, i, k: (b, 0, j)))

    out_shape = [jax.ShapeDtypeStruct((B, N, Pp, Cp), jnp.float32)]
    out_specs = [
        pl.BlockSpec((None, None, tm, tn), lambda b, n, j, i, k: (b, n, i, j))]
    if use_norm:
        out_shape += [jax.ShapeDtypeStruct((B, N, 1, Cp), jnp.float32)] * 2
        out_specs += [
            pl.BlockSpec((None, None, 1, tn), lambda b, n, j, i, k: (b, n, 0, j)),
            pl.BlockSpec((None, None, 1, tn), lambda b, n, j, i, k: (b, n, 0, j)),
        ]

    dims = ("parallel", "parallel", "parallel",
            "arbitrary" if use_norm else "parallel", "arbitrary")

    outs = pl.pallas_call(
        kernel,
        out_shape=tuple(out_shape),
        grid=grid,
        in_specs=in_specs,
        out_specs=tuple(out_specs),
        scratch_shapes=[pltpu.VMEM((tm, tn), jnp.float32)],
        compiler_params=pltpu.CompilerParams(
            dimension_semantics=dims, vmem_limit_bytes=VMEM_LIMIT_BYTES),
    )(*inputs)

    if use_norm:
        return outs[0], outs[1], outs[2]
    return outs[0], None, None


# -----------------------------------------------------------------------------
# InstanceNorm apply pass (second pass of the two-pass norm).
# -----------------------------------------------------------------------------
def _norm_apply_kernel(y_ref, scale_ref, shift_ref, o_ref):
    o_ref[...] = y_ref[...] * scale_ref[...] + shift_ref[...]


def instance_norm_apply(y, scale, shift):
    """y: (B, N, Pp, Cp) f32; scale/shift: (B, N, 1, Cp)."""
    B, N, Pp, Cp = y.shape
    tm = _pick_tile(Pp, 8, TM_CAP)
    tn = _pick_tile(Cp, 128, TN_CAP)
    grid = (B, N, Pp // tm, Cp // tn)
    return pl.pallas_call(
        _norm_apply_kernel,
        out_shape=jax.ShapeDtypeStruct((B, N, Pp, Cp), jnp.float32),
        grid=grid,
        in_specs=[
            pl.BlockSpec((None, None, tm, tn), lambda b, n, i, j: (b, n, i, j)),
            pl.BlockSpec((None, None, 1, tn), lambda b, n, i, j: (b, n, 0, j)),
            pl.BlockSpec((None, None, 1, tn), lambda b, n, i, j: (b, n, 0, j)),
        ],
        out_specs=pl.BlockSpec((None, None, tm, tn),
                               lambda b, n, i, j: (b, n, i, j)),
        compiler_params=pltpu.CompilerParams(
            dimension_semantics=("parallel",) * 4,
            vmem_limit_bytes=VMEM_LIMIT_BYTES),
    )(y, scale, shift)


def _norm_scale_shift(ssum, ssq, count, eps=1e-5):
    """InstanceNorm2d(affine=False): fold mean/var into a per-channel FMA."""
    mean = ssum / count
    var = jnp.maximum(ssq / count - mean * mean, 0.0)
    rstd = jax.lax.rsqrt(var + eps)
    return rstd, -mean * rstd


# -----------------------------------------------------------------------------
# JAX glue: im2col, sub-pixel transposed conv, weight reshaping.
# -----------------------------------------------------------------------------
def _extract_patches(x, kh, kw, stride, pad):
    """x: (G, N, H, W, C) -> (G, N, Ho*Wo, kh*kw*C), Ho, Wo."""
    x = jnp.pad(x, ((0, 0), (0, 0), (pad, pad), (pad, pad), (0, 0)))
    G, N, Hp, Wp, C = x.shape
    Ho = (Hp - kh) // stride + 1
    Wo = (Wp - kw) // stride + 1
    cols = []
    for iy in range(kh):
        for ix in range(kw):
            cols.append(x[:, :, iy:iy + Ho * stride:stride,
                          ix:ix + Wo * stride:stride, :])
    patches = jnp.stack(cols, axis=4)                  # (G,N,Ho,Wo,kh*kw,C)
    return patches.reshape(G, N, Ho * Wo, kh * kw * C), Ho, Wo


def conv2d_layer(x, p, *, pre_act=None, use_norm=False):
    """Conv2d(k=4, s=2, p=1) [+ pre-act + InstanceNorm].  x: (G,N,H,W,Cin)."""
    w, b = p["w"], p["b"]                  # w: (G,Cout,Cin,4,4), b: (G,Cout)
    G, N, H, W, Cin = x.shape
    Cout = w.shape[1]
    patches, Ho, Wo = _extract_patches(x, 4, 4, stride=2, pad=1)
    wmat = jnp.transpose(w, (0, 3, 4, 2, 1)).reshape(G, 16 * Cin, Cout)
    y, ssum, ssq = fused_conv_matmul(patches, wmat, b,
                                     pre_act=pre_act, use_norm=use_norm)
    if use_norm:
        scale, shift = _norm_scale_shift(ssum, ssq, float(Ho * Wo))
        y = instance_norm_apply(y, scale, shift)
    return y[:, :, :Ho * Wo, :Cout].reshape(G, N, Ho, Wo, Cout)


def conv_transpose2d_layer(x, p, *, pre_act="relu", use_norm=False,
                           post_act=None):
    """ConvTranspose2d(k=4, s=2, p=1) via sub-pixel decomposition.

    The 4x4 kernel is split into four 2x2 sub-kernels (one per output parity);
    four stride-1 convs run on the un-dilated input inside ONE pallas_call
    (parity folded into the leading grid axis) and outputs are interleaved.
    """
    w, b = p["w"], p["b"]                  # w: (G,Cin,Cout,4,4), b: (G,Cout)
    G, N, H, W, Cin = x.shape
    Cout = w.shape[2]

    sub_patches, sub_w = [], []
    for sy in (0, 1):
        ky = (3, 1) if sy == 0 else (2, 0)   # kernel row per 2x2 window row
        for sx in (0, 1):
            kx = (3, 1) if sx == 0 else (2, 0)
            xp = jnp.pad(x, ((0, 0), (0, 0), (1 - sy, sy), (1 - sx, sx), (0, 0)))
            cols = [xp[:, :, wy:wy + H, wx:wx + W, :]
                    for wy in (0, 1) for wx in (0, 1)]
            sub_patches.append(
                jnp.stack(cols, axis=4).reshape(G, N, H * W, 4 * Cin))
            wq = [w[:, :, :, ky[wy], kx[wx]] for wy in (0, 1) for wx in (0, 1)]
            sub_w.append(jnp.stack(wq, axis=1).reshape(G, 4 * Cin, Cout))

    patches = jnp.stack(sub_patches, axis=1).reshape(G * 4, N, H * W, 4 * Cin)
    wmat = jnp.stack(sub_w, axis=1).reshape(G * 4, 4 * Cin, Cout)
    bias = jnp.repeat(b[:, None, :], 4, axis=1).reshape(G * 4, Cout)

    y, ssum, ssq = fused_conv_matmul(patches, wmat, bias, pre_act=pre_act,
                                     use_norm=use_norm, post_act=post_act)
    if use_norm:
        # InstanceNorm statistics span all four parities (= full 2Hx2W map).
        Cp = ssum.shape[-1]
        ssum = ssum.reshape(G, 4, N, 1, Cp).sum(axis=1)
        ssq = ssq.reshape(G, 4, N, 1, Cp).sum(axis=1)
        scale, shift = _norm_scale_shift(ssum, ssq, float(4 * H * W))
        scale = jnp.repeat(scale[:, None], 4, axis=1).reshape(G * 4, N, 1, Cp)
        shift = jnp.repeat(shift[:, None], 4, axis=1).reshape(G * 4, N, 1, Cp)
        y = instance_norm_apply(y, scale, shift)

    y = y[:, :, :H * W, :Cout].reshape(G, 2, 2, N, H, W, Cout)
    y = jnp.transpose(y, (0, 3, 4, 1, 5, 2, 6)).reshape(G, N, 2 * H, 2 * W, Cout)
    return y


# -----------------------------------------------------------------------------
# UNet generator (pix2pix UnetSkipConnectionBlock structure, instance norm).
# Both generators' parameters are stacked along a leading axis of size 2.
# -----------------------------------------------------------------------------
def _init_conv(key, cin, cout, k=4):
    w = 0.02 * jax.random.normal(key, (2, cout, cin, k, k), jnp.float32)
    return {"w": w, "b": jnp.zeros((2, cout), jnp.float32)}


def _init_convT(key, cin, cout, k=4):
    w = 0.02 * jax.random.normal(key, (2, cin, cout, k, k), jnp.float32)
    return {"w": w, "b": jnp.zeros((2, cout), jnp.float32)}


def build_unet_params(key, input_nc, output_nc, ngf, num_downs):
    def build(level, key):
        if level == num_downs - 1:          # innermost
            outer = ngf * 2 ** (num_downs - 2)
            inner = ngf * 2 ** (num_downs - 1)
            k1, k2 = jax.random.split(key)
            return {"kind": "innermost",
                    "down": _init_conv(k1, outer, inner),
                    "up": _init_convT(k2, inner, outer)}
        if level == 0:                      # outermost
            k1, k2, k3 = jax.random.split(key, 3)
            return {"kind": "outermost",
                    "down": _init_conv(k1, input_nc, ngf),
                    "up": _init_convT(k2, ngf * 2, output_nc),
                    "sub": build(1, k3)}
        outer = ngf * 2 ** (level - 1)
        inner = ngf * 2 ** level
        k1, k2, k3 = jax.random.split(key, 3)
        return {"kind": "mid",
                "down": _init_conv(k1, outer, inner),
                "up": _init_convT(k2, inner * 2, outer),
                "sub": build(level + 1, k3)}
    return build(0, key)


def unet_forward(block, x):
    kind = block["kind"]
    if kind == "outermost":
        d = conv2d_layer(x, block["down"])                       # conv only
        s = unet_forward(block["sub"], d)
        return conv_transpose2d_layer(s, block["up"], pre_act="relu",
                                      use_norm=False, post_act="tanh")
    if kind == "innermost":
        d = conv2d_layer(x, block["down"], pre_act="lrelu", use_norm=False)
        u = conv_transpose2d_layer(d, block["up"], pre_act="relu",
                                   use_norm=True)
        return jnp.concatenate([x, u], axis=-1)                  # skip
    d = conv2d_layer(x, block["down"], pre_act="lrelu", use_norm=True)
    s = unet_forward(block["sub"], d)
    u = conv_transpose2d_layer(s, block["up"], pre_act="relu", use_norm=True)
    return jnp.concatenate([x, u], axis=-1)


# -----------------------------------------------------------------------------
# CycleGAN.forward
# -----------------------------------------------------------------------------
def cyclegan_forward(params, real_A_nchw, real_B_nchw):
    """fake_A = G_A(real_B); fake_B = G_B(real_A); recreate_* = G_*(fake_*)."""
    to_nhwc = lambda t: jnp.transpose(t, (0, 2, 3, 1))
    to_nchw = lambda t: jnp.transpose(t, (0, 3, 1, 2))
    real_A, real_B = to_nhwc(real_A_nchw), to_nhwc(real_B_nchw)
    # Stack the two independent generator applications of each stage on the
    # leading (parallel) grid axis: one pallas_call per layer covers both
    # generators (v7x: one per TensorCore; v5e/v6e: deeper pipeline).
    stage1 = unet_forward(params, jnp.stack([real_B, real_A], axis=0))
    fake_A, fake_B = stage1[0], stage1[1]
    stage2 = unet_forward(params, jnp.stack([fake_B, fake_A], axis=0))
    recreate_A, recreate_B = stage2[0], stage2[1]
    return tuple(map(to_nchw, (fake_A, fake_B, recreate_A, recreate_B)))


if __name__ == "__main__":
    key = jax.random.PRNGKey(0)
    k_g, k_a, k_b = jax.random.split(key, 3)

    INPUT_NC, OUTPUT_NC, NGF, NUM_DOWNS = 3, 3, 8, 4   # scaled-down unet_128
    params = build_unet_params(k_g, INPUT_NC, OUTPUT_NC, NGF, NUM_DOWNS)

    # NCHW inputs, like the PyTorch module's input_image['A'] / ['B'].
    real_A = jax.random.normal(k_a, (2, 3, 16, 16), jnp.float32)
    real_B = jax.random.normal(k_b, (2, 3, 16, 16), jnp.float32)

    fwd = jax.jit(functools.partial(cyclegan_forward, params))
    fake_A, fake_B, recreate_A, recreate_B = fwd(real_A, real_B)
    jax.block_until_ready((fake_A, fake_B, recreate_A, recreate_B))

    assert fake_A.shape == real_A.shape
    assert fake_B.shape == real_B.shape
    assert recreate_A.shape == real_A.shape
    assert recreate_B.shape == real_B.shape
    for t in (fake_A, fake_B, recreate_A, recreate_B):
        assert np.all(np.isfinite(np.asarray(t)))
    print("KERNEL_OK")
</pallas_src>

<mosaic_0001>
module attributes {stable_mosaic.version = 11 : i64} {
  func.func @kernel(%arg0: i32, %arg1: i32, %arg2: i32, %arg3: i32, %arg4: i32, %arg5: memref<1x1x64x128xbf16, #tpu.memory_space<vmem>>, %arg6: memref<1x128x128xbf16, #tpu.memory_space<vmem>>, %arg7: memref<1x1x128xf32, #tpu.memory_space<vmem>>, %arg8: memref<1x1x64x128xf32, #tpu.memory_space<vmem>>, %arg9: memref<64x128xf32, #tpu.memory_space<vmem>>) attributes {dimension_semantics = [#tpu.dimension_semantics<parallel>, #tpu.dimension_semantics<parallel>, #tpu.dimension_semantics<parallel>, #tpu.dimension_semantics<parallel>, #tpu.dimension_semantics<arbitrary>], iteration_bounds = array<i64: 2, 2, 1, 1, 1>, scalar_prefetch = 0 : i64, scratch_operands = 1 : i64, tpu.core_type = #tpu.core_type<tc>, window_params = [{transform_indices = @transform_0, window_bounds = array<i64: 1, 1, 64, 128>}, {transform_indices = @transform_1, window_bounds = array<i64: 1, 128, 128>}, {transform_indices = @transform_2, window_bounds = array<i64: 1, 1, 128>}, {transform_indices = @transform_3, window_bounds = array<i64: 1, 1, 64, 128>}]} {
    %c0_i32 = arith.constant 0 : i32
    %0 = arith.cmpi eq, %arg4, %c0_i32 : i32
    %1 = arith.extui %0 : i1 to i32
    %c0_i32_0 = arith.constant 0 : i32
    %2 = arith.cmpi ne, %1, %c0_i32_0 : i32
    scf.if %2 {
      %cst_13 = arith.constant 0.000000e+00 : f32
      %14 = vector.broadcast %cst_13 : f32 to vector<64x128xf32>
      %c0_14 = arith.constant 0 : index
      %c0_15 = arith.constant 0 : index
      %15 = vector.load %arg9[%c0_14, %c0_15] : memref<64x128xf32, #tpu.memory_space<vmem>>, vector<64x128xf32>
      tpu.vector_store %arg9[%c0_14, %c0_15], %14 {strides = array<i32>} : memref<64x128xf32, #tpu.memory_space<vmem>>, vector<64x128xf32>,
    } else {
    }
    %c0 = arith.constant 0 : index
    %c0_1 = arith.constant 0 : index
    %c0_2 = arith.constant 0 : index
    %c0_3 = arith.constant 0 : index
    %3 = vector.load %arg5[%c0, %c0_1, %c0_2, %c0_3] : memref<1x1x64x128xbf16, #tpu.memory_space<vmem>>, vector<1x1x64x128xbf16>
    %4 = vector.shape_cast %3 : vector<1x1x64x128xbf16> to vector<64x128xbf16>
    %c0_4 = arith.constant 0 : index
    %c0_5 = arith.constant 0 : index
    %5 = vector.load %arg9[%c0_4, %c0_5] : memref<64x128xf32, #tpu.memory_space<vmem>>, vector<64x128xf32>
    %c0_6 = arith.constant 0 : index
    %c0_7 = arith.constant 0 : index
    %c0_8 = arith.constant 0 : index
    %6 = vector.load %arg6[%c0_6, %c0_7, %c0_8] : memref<1x128x128xbf16, #tpu.memory_space<vmem>>, vector<1x128x128xbf16>
    %7 = vector.shape_cast %6 : vector<1x128x128xbf16> to vector<128x128xbf16>
    %cst = arith.constant dense<0.000000e+00> : vector<64x128xf32>
    %8 = tpu.matmul %4, %7, %cst {dimension_numbers = #tpu.dot_dimension_numbers<[1], [0], [0], [1], [0, 0, 1, 1], [], []>} : vector<64x128xbf16>, vector<128x128xbf16>, vector<64x128xf32> -> vector<64x128xf32>
    %9 = arith.addf %5, %8 : vector<64x128xf32>
    %c0_9 = arith.constant 0 : index
    %c0_10 = arith.constant 0 : index
    %10 = vector.load %arg9[%c0_9, %c0_10] : memref<64x128xf32, #tpu.memory_space<vmem>>, vector<64x128xf32>
    tpu.vector_store %arg9[%c0_9, %c0_10], %9 {strides = array<i32>} : memref<64x128xf32, #tpu.memory_space<vmem>>, vector<64x128xf32>,
    %c0_i32_11 = arith.constant 0 : i32
    %11 = arith.cmpi eq, %arg4, %c0_i32_11 : i32
    %12 = arith.extui %11 : i1 to i32
    %c0_i32_12 = arith.constant 0 : i32
    %13 = arith.cmpi ne, %12, %c0_i32_12 : i32
    scf.if %13 {
      %c0_13 = arith.constant 0 : index
      %c0_14 = arith.constant 0 : index
      %14 = vector.load %arg9[%c0_13, %c0_14] : memref<64x128xf32, #tpu.memory_space<vmem>>, vector<64x128xf32>
      %c0_15 = arith.constant 0 : index
      %c0_16 = arith.constant 0 : index
      %c0_17 = arith.constant 0 : index
      %15 = vector.load %arg7[%c0_15, %c0_16, %c0_17] : memref<1x1x128xf32, #tpu.memory_space<vmem>>, vector<1x1x128xf32>
      %16 = vector.shape_cast %15 : vector<1x1x128xf32> to vector<1x128xf32>
      %17 = vector.broadcast %16 : vector<1x128xf32> to vector<64x128xf32>
      %18 = arith.addf %14, %17 : vector<64x128xf32>
      %c0_18 = arith.constant 0 : index
      %c0_19 = arith.constant 0 : index
      %c0_20 = arith.constant 0 : index
      %c0_21 = arith.constant 0 : index
      %19 = vector.load %arg8[%c0_18, %c0_19, %c0_20, %c0_21] : memref<1x1x64x128xf32, #tpu.memory_space<vmem>>, vector<1x1x64x128xf32>
      %20 = vector.shape_cast %19 : vector<1x1x64x128xf32> to vector<64x128xf32>
      %21 = vector.shape_cast %18 : vector<64x128xf32> to vector<1x1x64x128xf32>
      tpu.vector_store %arg8[%c0_18, %c0_19, %c0_20, %c0_21], %21 {strides = array<i32>} : memref<1x1x64x128xf32, #tpu.memory_space<vmem>>, vector<1x1x64x128xf32>,
    } else {
    }
    return
  }
  func.func @transform_0(%arg0: i32, %arg1: i32, %arg2: i32, %arg3: i32, %arg4: i32) -> (i32, i32, i32, i32) {
    %c0_i32 = arith.constant 0 : i32
    return %arg0, %arg1, %arg3, %arg4 : i32, i32, i32, i32
  }
  func.func @transform_1(%arg0: i32, %arg1: i32, %arg2: i32, %arg3: i32, %arg4: i32) -> (i32, i32, i32) {
    %c0_i32 = arith.constant 0 : i32
    return %arg0, %arg4, %arg2 : i32, i32, i32
  }
  func.func @transform_2(%arg0: i32, %arg1: i32, %arg2: i32, %arg3: i32, %arg4: i32) -> (i32, i32, i32) {
    %c0_i32 = arith.constant 0 : i32
    %c0_i32_0 = arith.constant 0 : i32
    return %arg0, %c0_i32, %arg2 : i32, i32, i32
  }
  func.func @transform_3(%arg0: i32, %arg1: i32, %arg2: i32, %arg3: i32, %arg4: i32) -> (i32, i32, i32, i32) {
    %c0_i32 = arith.constant 0 : i32
    return %arg0, %arg1, %arg3, %arg2 : i32, i32, i32, i32
  }
}

module attributes {stable_mosaic.version = 11 : i64} {
  func.func @kernel(%arg0: i32, %arg1: i32, %arg2: i32, %arg3: i32, %arg4: i32, %arg5: memref<1x1x16x128xbf16, #tpu.memory_space<vmem>>, %arg6: memref<1x128x128xbf16, #tpu.memory_space<vmem>>, %arg7: memref<1x1x16x128xf32, #tpu.memory_space<vmem>>, %arg8: memref<1x1x1x128xf32, #tpu.memory_space<vmem>>, %arg9: memref<1x1x1x128xf32, #tpu.memory_space<vmem>>, %arg10: memref<16x128xf32, #tpu.memory_space<vmem>>) attributes {dimension_semantics = [#tpu.dimension_semantics<parallel>, #tpu.dimension_semantics<parallel>, #tpu.dimension_semantics<parallel>, #tpu.dimension_semantics<arbitrary>, #tpu.dimension_semantics<arbitrary>], iteration_bounds = array<i64: 2, 2, 1, 1, 1>, scalar_prefetch = 0 : i64, scratch_operands = 1 : i64, tpu.core_type = #tpu.core_type<tc>, window_params = [{transform_indices = @transform_0, window_bounds = array<i64: 1, 1, 16, 128>}, {transform_indices = @transform_1, window_bounds = array<i64: 1, 128, 128>}, {transform_indices = @transform_2, window_bounds = array<i64: 1, 1, 16, 128>}, {transform_indices = @transform_3, window_bounds = array<i64: 1, 1, 1, 128>}, {transform_indices = @transform_4, window_bounds = array<i64: 1, 1, 1, 128>}]} {
    %c0_i32 = arith.constant 0 : i32
    %0 = arith.cmpi eq, %arg4, %c0_i32 : i32
    %1 = arith.extui %0 : i1 to i32
    %c0_i32_0 = arith.constant 0 : i32
    %2 = arith.cmpi ne, %1, %c0_i32_0 : i32
    scf.if %2 {
      %cst_15 = arith.constant 0.000000e+00 : f32
      %21 = vector.broadcast %cst_15 : f32 to vector<16x128xf32>
      %c0_16 = arith.constant 0 : index
      %c0_17 = arith.constant 0 : index
      %22 = vector.load %arg10[%c0_16, %c0_17] : memref<16x128xf32, #tpu.memory_space<vmem>>, vector<16x128xf32>
      tpu.vector_store %arg10[%c0_16, %c0_17], %21 {strides = array<i32>} : memref<16x128xf32, #tpu.memory_space<vmem>>, vector<16x128xf32>,
    } else {
    }
    %c0 = arith.constant 0 : index
    %c0_1 = arith.constant 0 : index
    %c0_2 = arith.constant 0 : index
    %c0_3 = arith.constant 0 : index
    %3 = vector.load %arg5[%c0, %c0_1, %c0_2, %c0_3] : memref<1x1x16x128xbf16, #tpu.memory_space<vmem>>, vector<1x1x16x128xbf16>
    %4 = vector.shape_cast %3 : vector<1x1x16x128xbf16> to vector<16x128xbf16>
    %5 = arith.extf %4 : vector<16x128xbf16> to vector<16x128xf32>
    %cst = arith.constant 0.000000e+00 : f32
    %6 = vector.broadcast %cst : f32 to vector<16x128xf32>
    %7 = arith.cmpf ogt, %5, %6 : vector<16x128xf32>
    %cst_4 = arith.constant 2.000000e-01 : f32
    %8 = vector.broadcast %cst_4 : f32 to vector<16x128xf32>
    %9 = arith.mulf %8, %5 : vector<16x128xf32>
    %10 = arith.select %7, %5, %9 : vector<16x128xi1>, vector<16x128xf32>
    %11 = arith.truncf %10 : vector<16x128xf32> to vector<16x128xbf16>
    %c0_5 = arith.constant 0 : index
    %c0_6 = arith.constant 0 : index
    %12 = vector.load %arg10[%c0_5, %c0_6] : memref<16x128xf32, #tpu.memory_space<vmem>>, vector<16x128xf32>
    %c0_7 = arith.constant 0 : index
    %c0_8 = arith.constant 0 : index
    %c0_9 = arith.constant 0 : index
    %13 = vector.load %arg6[%c0_7, %c0_8, %c0_9] : memref<1x128x128xbf16, #tpu.memory_space<vmem>>, vector<1x128x128xbf16>
    %14 = vector.shape_cast %13 : vector<1x128x128xbf16> to vector<128x128xbf16>
    %cst_10 = arith.constant dense<0.000000e+00> : vector<16x128xf32>
    %15 = tpu.matmul %11, %14, %cst_10 {dimension_numbers = #tpu.dot_dimension_numbers<[1], [0], [0], [1], [0, 0, 1, 1], [], []>} : vector<16x128xbf16>, vector<128x128xbf16>, vector<16x128xf32> -> vector<16x128xf32>
    %16 = arith.addf %12, %15 : vector<16x128xf32>
    %c0_11 = arith.constant 0 : index
    %c0_12 = arith.constant 0 : index
    %17 = vector.load %arg10[%c0_11, %c0_12] : memref<16x128xf32, #tpu.memory_space<vmem>>, vector<16x128xf32>
    tpu.vector_store %arg10[%c0_11, %c0_12], %16 {strides = array<i32>} : memref<16x128xf32, #tpu.memory_space<vmem>>, vector<16x128xf32>,
    %c0_i32_13 = arith.constant 0 : i32
    %18 = arith.cmpi eq, %arg4, %c0_i32_13 : i32
    %19 = arith.extui %18 : i1 to i32
    %c0_i32_14 = arith.constant 0 : i32
    %20 = arith.cmpi ne, %19, %c0_i32_14 : i32
    scf.if %20 {
      %c0_15 = arith.constant 0 : index
      %c0_16 = arith.constant 0 : index
      %21 = vector.load %arg10[%c0_15, %c0_16] : memref<16x128xf32, #tpu.memory_space<vmem>>, vector<16x128xf32>
      %c0_17 = arith.constant 0 : index
      %c0_18 = arith.constant 0 : index
      %c0_19 = arith.constant 0 : index
      %c0_20 = arith.constant 0 : index
      %22 = vector.load %arg7[%c0_17, %c0_18, %c0_19, %c0_20] : memref<1x1x16x128xf32, #tpu.memory_space<vmem>>, vector<1x1x16x128xf32>
      %23 = vector.shape_cast %22 : vector<1x1x16x128xf32> to vector<16x128xf32>
      %24 = vector.shape_cast %21 : vector<16x128xf32> to vector<1x1x16x128xf32>
      tpu.vector_store %arg7[%c0_17, %c0_18, %c0_19, %c0_20], %24 {strides = array<i32>} : memref<1x1x16x128xf32, #tpu.memory_space<vmem>>, vector<1x1x16x128xf32>,
      %c0_i32_21 = arith.constant 0 : i32
      %25 = arith.cmpi eq, %arg3, %c0_i32_21 : i32
      %26 = arith.extui %25 : i1 to i32
      %c0_i32_22 = arith.constant 0 : i32
      %27 = arith.cmpi ne, %26, %c0_i32_22 : i32
      scf.if %27 {
        %cst_41 = arith.constant 0.000000e+00 : f32
        %45 = vector.broadcast %cst_41 : f32 to vector<1x128xf32>
        %c0_42 = arith.constant 0 : index
        %c0_43 = arith.constant 0 : index
        %c0_44 = arith.constant 0 : index
        %c0_45 = arith.constant 0 : index
        %46 = vector.load %arg8[%c0_42, %c0_43, %c0_44, %c0_45] : memref<1x1x1x128xf32, #tpu.memory_space<vmem>>, vector<1x1x1x128xf32>
        %47 = vector.shape_cast %46 : vector<1x1x1x128xf32> to vector<1x128xf32>
        %48 = vector.shape_cast %45 : vector<1x128xf32> to vector<1x1x1x128xf32>
        tpu.vector_store %arg8[%c0_42, %c0_43, %c0_44, %c0_45], %48 {strides = array<i32>} : memref<1x1x1x128xf32, #tpu.memory_space<vmem>>, vector<1x1x1x128xf32>,
        %cst_46 = arith.constant 0.000000e+00 : f32
        %49 = vector.broadcast %cst_46 : f32 to vector<1x128xf32>
        %c0_47 = arith.constant 0 : index
        %c0_48 = arith.constant 0 : index
        %c0_49 = arith.constant 0 : index
        %c0_50 = arith.constant 0 : index
        %50 = vector.load %arg9[%c0_47, %c0_48, %c0_49, %c0_50] : memref<1x1x1x128xf32, #tpu.memory_space<vmem>>, vector<1x1x1x128xf32>
        %51 = vector.shape_cast %50 : vector<1x1x1x128xf32> to vector<1x128xf32>
        %52 = vector.shape_cast %49 : vector<1x128xf32> to vector<1x1x1x128xf32>
        tpu.vector_store %arg9[%c0_47, %c0_48, %c0_49, %c0_50], %52 {strides = array<i32>} : memref<1x1x1x128xf32, #tpu.memory_space<vmem>>, vector<1x1x1x128xf32>,
      } else {
      }
      %c0_23 = arith.constant 0 : index
      %c0_24 = arith.constant 0 : index
      %c0_25 = arith.constant 0 : index
      %c0_26 = arith.constant 0 : index
      %28 = vector.load %arg8[%c0_23, %c0_24, %c0_25, %c0_26] : memref<1x1x1x128xf32, #tpu.memory_space<vmem>>, vector<1x1x1x128xf32>
      %29 = vector.shape_cast %28 : vector<1x1x1x128xf32> to vector<1x128xf32>
      %cst_27 = arith.constant dense<0.000000e+00> : vector<128xf32>
      %30 = vector.multi_reduction <add>, %21, %cst_27 [0] : vector<16x128xf32> to vector<128xf32>
      %31 = vector.shape_cast %30 : vector<128xf32> to vector<1x128xf32>
      %32 = arith.addf %29, %31 : vector<1x128xf32>
      %c0_28 = arith.constant 0 : index
      %c0_29 = arith.constant 0 : index
      %c0_30 = arith.constant 0 : index
      %c0_31 = arith.constant 0 : index
      %33 = vector.load %arg8[%c0_28, %c0_29, %c0_30, %c0_31] : memref<1x1x1x128xf32, #tpu.memory_space<vmem>>, vector<1x1x1x128xf32>
      %34 = vector.shape_cast %33 : vector<1x1x1x128xf32> to vector<1x128xf32>
      %35 = vector.shape_cast %32 : vector<1x128xf32> to vector<1x1x1x128xf32>
      tpu.vector_store %arg8[%c0_28, %c0_29, %c0_30, %c0_31], %35 {strides = array<i32>} : memref<1x1x1x128xf32, #tpu.memory_space<vmem>>, vector<1x1x1x128xf32>,
      %c0_32 = arith.constant 0 : index
      %c0_33 = arith.constant 0 : index
      %c0_34 = arith.constant 0 : index
      %c0_35 = arith.constant 0 : index
      %36 = vector.load %arg9[%c0_32, %c0_33, %c0_34, %c0_35] : memref<1x1x1x128xf32, #tpu.memory_space<vmem>>, vector<1x1x1x128xf32>
      %37 = vector.shape_cast %36 : vector<1x1x1x128xf32> to vector<1x128xf32>
      %38 = arith.mulf %21, %21 : vector<16x128xf32>
      %cst_36 = arith.constant dense<0.000000e+00> : vector<128xf32>
      %39 = vector.multi_reduction <add>, %38, %cst_36 [0] : vector<16x128xf32> to vector<128xf32>
      %40 = vector.shape_cast %39 : vector<128xf32> to vector<1x128xf32>
      %41 = arith.addf %37, %40 : vector<1x128xf32>
      %c0_37 = arith.constant 0 : index
      %c0_38 = arith.constant 0 : index
      %c0_39 = arith.constant 0 : index
      %c0_40 = arith.constant 0 : index
      %42 = vector.load %arg9[%c0_37, %c0_38, %c0_39, %c0_40] : memref<1x1x1x128xf32, #tpu.memory_space<vmem>>, vector<1x1x1x128xf32>
      %43 = vector.shape_cast %42 : vector<1x1x1x128xf32> to vector<1x128xf32>
      %44 = vector.shape_cast %41 : vector<1x128xf32> to vector<1x1x1x128xf32>
      tpu.vector_store %arg9[%c0_37, %c0_38, %c0_39, %c0_40], %44 {strides = array<i32>} : memref<1x1x1x128xf32, #tpu.memory_space<vmem>>, vector<1x1x1x128xf32>,
    } else {
    }
    return
  }
  func.func @transform_0(%arg0: i32, %arg1: i32, %arg2: i32, %arg3: i32, %arg4: i32) -> (i32, i32, i32, i32) {
    %c0_i32 = arith.constant 0 : i32
    return %arg0, %arg1, %arg3, %arg4 : i32, i32, i32, i32
  }
  func.func @transform_1(%arg0: i32, %arg1: i32, %arg2: i32, %arg3: i32, %arg4: i32) -> (i32, i32, i32) {
    %c0_i32 = arith.constant 0 : i32
    return %arg0, %arg4, %arg2 : i32, i32, i32
  }
  func.func @transform_2(%arg0: i32, %arg1: i32, %arg2: i32, %arg3: i32, %arg4: i32) -> (i32, i32, i32, i32) {
    %c0_i32 = arith.constant 0 : i32
    return %arg0, %arg1, %arg3, %arg2 : i32, i32, i32, i32
  }
  func.func @transform_3(%arg0: i32, %arg1: i32, %arg2: i32, %arg3: i32, %arg4: i32) -> (i32, i32, i32, i32) {
    %c0_i32 = arith.constant 0 : i32
    %c0_i32_0 = arith.constant 0 : i32
    return %arg0, %arg1, %c0_i32, %arg2 : i32, i32, i32, i32
  }
  func.func @transform_4(%arg0: i32, %arg1: i32, %arg2: i32, %arg3: i32, %arg4: i32) -> (i32, i32, i32, i32) {
    %c0_i32 = arith.constant 0 : i32
    %c0_i32_0 = arith.constant 0 : i32
    return %arg0, %arg1, %c0_i32, %arg2 : i32, i32, i32, i32
  }
}

module attributes {stable_mosaic.version = 11 : i64} {
  func.func @_norm_apply_kernel(%arg0: i32, %arg1: i32, %arg2: i32, %arg3: i32, %arg4: memref<1x1x16x128xf32, #tpu.memory_space<vmem>>, %arg5: memref<1x1x1x128xf32, #tpu.memory_space<vmem>>, %arg6: memref<1x1x1x128xf32, #tpu.memory_space<vmem>>, %arg7: memref<1x1x16x128xf32, #tpu.memory_space<vmem>>) attributes {dimension_semantics = [#tpu.dimension_semantics<parallel>, #tpu.dimension_semantics<parallel>, #tpu.dimension_semantics<parallel>, #tpu.dimension_semantics<parallel>], iteration_bounds = array<i64: 2, 2, 1, 1>, scalar_prefetch = 0 : i64, scratch_operands = 0 : i64, tpu.core_type = #tpu.core_type<tc>, window_params = [{transform_indices = @transform_0, window_bounds = array<i64: 1, 1, 16, 128>}, {transform_indices = @transform_1, window_bounds = array<i64: 1, 1, 1, 128>}, {transform_indices = @transform_2, window_bounds = array<i64: 1, 1, 1, 128>}, {transform_indices = @transform_3, window_bounds = array<i64: 1, 1, 16, 128>}]} {
    %c0 = arith.constant 0 : index
    %c0_0 = arith.constant 0 : index
    %c0_1 = arith.constant 0 : index
    %c0_2 = arith.constant 0 : index
    %0 = vector.load %arg4[%c0, %c0_0, %c0_1, %c0_2] : memref<1x1x16x128xf32, #tpu.memory_space<vmem>>, vector<1x1x16x128xf32>
    %1 = vector.shape_cast %0 : vector<1x1x16x128xf32> to vector<16x128xf32>
    %c0_3 = arith.constant 0 : index
    %c0_4 = arith.constant 0 : index
    %c0_5 = arith.constant 0 : index
    %c0_6 = arith.constant 0 : index
    %2 = vector.load %arg5[%c0_3, %c0_4, %c0_5, %c0_6] : memref<1x1x1x128xf32, #tpu.memory_space<vmem>>, vector<1x1x1x128xf32>
    %3 = vector.shape_cast %2 : vector<1x1x1x128xf32> to vector<1x128xf32>
    %4 = vector.broadcast %3 : vector<1x128xf32> to vector<16x128xf32>
    %5 = arith.mulf %1, %4 : vector<16x128xf32>
    %c0_7 = arith.constant 0 : index
    %c0_8 = arith.constant 0 : index
    %c0_9 = arith.constant 0 : index
    %c0_10 = arith.constant 0 : index
    %6 = vector.load %arg6[%c0_7, %c0_8, %c0_9, %c0_10] : memref<1x1x1x128xf32, #tpu.memory_space<vmem>>, vector<1x1x1x128xf32>
    %7 = vector.shape_cast %6 : vector<1x1x1x128xf32> to vector<1x128xf32>
    %8 = vector.broadcast %7 : vector<1x128xf32> to vector<16x128xf32>
    %9 = arith.addf %5, %8 : vector<16x128xf32>
    %c0_11 = arith.constant 0 : index
    %c0_12 = arith.constant 0 : index
    %c0_13 = arith.constant 0 : index
    %c0_14 = arith.constant 0 : index
    %10 = vector.load %arg7[%c0_11, %c0_12, %c0_13, %c0_14] : memref<1x1x16x128xf32, #tpu.memory_space<vmem>>, vector<1x1x16x128xf32>
    %11 = vector.shape_cast %10 : vector<1x1x16x128xf32> to vector<16x128xf32>
    %12 = vector.shape_cast %9 : vector<16x128xf32> to vector<1x1x16x128xf32>
    tpu.vector_store %arg7[%c0_11, %c0_12, %c0_13, %c0_14], %12 {strides = array<i32>} : memref<1x1x16x128xf32, #tpu.memory_space<vmem>>, vector<1x1x16x128xf32>,
    return
  }
  func.func @transform_0(%arg0: i32, %arg1: i32, %arg2: i32, %arg3: i32) -> (i32, i32, i32, i32) {
    %c0_i32 = arith.constant 0 : i32
    return %arg0, %arg1, %arg2, %arg3 : i32, i32, i32, i32
  }
  func.func @transform_1(%arg0: i32, %arg1: i32, %arg2: i32, %arg3: i32) -> (i32, i32, i32, i32) {
    %c0_i32 = arith.constant 0 : i32
    %c0_i32_0 = arith.constant 0 : i32
    return %arg0, %arg1, %c0_i32, %arg3 : i32, i32, i32, i32
  }
  func.func @transform_2(%arg0: i32, %arg1: i32, %arg2: i32, %arg3: i32) -> (i32, i32, i32, i32) {
    %c0_i32 = arith.constant 0 : i32
    %c0_i32_0 = arith.constant 0 : i32
    return %arg0, %arg1, %c0_i32, %arg3 : i32, i32, i32, i32
  }
  func.func @transform_3(%arg0: i32, %arg1: i32, %arg2: i32, %arg3: i32) -> (i32, i32, i32, i32) {
    %c0_i32 = arith.constant 0 : i32
    return %arg0, %arg1, %arg2, %arg3 : i32, i32, i32, i32
  }
}

module attributes {stable_mosaic.version = 11 : i64} {
  func.func @_norm_apply_kernel(%arg0: i32, %arg1: i32, %arg2: i32, %arg3: i32, %arg4: memref<1x1x8x128xf32, #tpu.memory_space<vmem>>, %arg5: memref<1x1x1x128xf32, #tpu.memory_space<vmem>>, %arg6: memref<1x1x1x128xf32, #tpu.memory_space<vmem>>, %arg7: memref<1x1x8x128xf32, #tpu.memory_space<vmem>>) attributes {dimension_semantics = [#tpu.dimension_semantics<parallel>, #tpu.dimension_semantics<parallel>, #tpu.dimension_semantics<parallel>, #tpu.dimension_semantics<parallel>], iteration_bounds = array<i64: 2, 2, 1, 1>, scalar_prefetch = 0 : i64, scratch_operands = 0 : i64, tpu.core_type = #tpu.core_type<tc>, window_params = [{transform_indices = @transform_0, window_bounds = array<i64: 1, 1, 8, 128>}, {transform_indices = @transform_1, window_bounds = array<i64: 1, 1, 1, 128>}, {transform_indices = @transform_2, window_bounds = array<i64: 1, 1, 1, 128>}, {transform_indices = @transform_3, window_bounds = array<i64: 1, 1, 8, 128>}]} {
    %c0 = arith.constant 0 : index
    %c0_0 = arith.constant 0 : index
    %c0_1 = arith.constant 0 : index
    %c0_2 = arith.constant 0 : index
    %0 = vector.load %arg4[%c0, %c0_0, %c0_1, %c0_2] : memref<1x1x8x128xf32, #tpu.memory_space<vmem>>, vector<1x1x8x128xf32>
    %1 = vector.shape_cast %0 : vector<1x1x8x128xf32> to vector<8x128xf32>
    %c0_3 = arith.constant 0 : index
    %c0_4 = arith.constant 0 : index
    %c0_5 = arith.constant 0 : index
    %c0_6 = arith.constant 0 : index
    %2 = vector.load %arg5[%c0_3, %c0_4, %c0_5, %c0_6] : memref<1x1x1x128xf32, #tpu.memory_space<vmem>>, vector<1x1x1x128xf32>
    %3 = vector.shape_cast %2 : vector<1x1x1x128xf32> to vector<1x128xf32>
    %4 = vector.broadcast %3 : vector<1x128xf32> to vector<8x128xf32>
    %5 = arith.mulf %1, %4 : vector<8x128xf32>
    %c0_7 = arith.constant 0 : index
    %c0_8 = arith.constant 0 : index
    %c0_9 = arith.constant 0 : index
    %c0_10 = arith.constant 0 : index
    %6 = vector.load %arg6[%c0_7, %c0_8, %c0_9, %c0_10] : memref<1x1x1x128xf32, #tpu.memory_space<vmem>>, vector<1x1x1x128xf32>
    %7 = vector.shape_cast %6 : vector<1x1x1x128xf32> to vector<1x128xf32>
    %8 = vector.broadcast %7 : vector<1x128xf32> to vector<8x128xf32>
    %9 = arith.addf %5, %8 : vector<8x128xf32>
    %c0_11 = arith.constant 0 : index
    %c0_12 = arith.constant 0 : index
    %c0_13 = arith.constant 0 : index
    %c0_14 = arith.constant 0 : index
    %10 = vector.load %arg7[%c0_11, %c0_12, %c0_13, %c0_14] : memref<1x1x8x128xf32, #tpu.memory_space<vmem>>, vector<1x1x8x128xf32>
    %11 = vector.shape_cast %10 : vector<1x1x8x128xf32> to vector<8x128xf32>
    %12 = vector.shape_cast %9 : vector<8x128xf32> to vector<1x1x8x128xf32>
    tpu.vector_store %arg7[%c0_11, %c0_12, %c0_13, %c0_14], %12 {strides = array<i32>} : memref<1x1x8x128xf32, #tpu.memory_space<vmem>>, vector<1x1x8x128xf32>,
    return
  }
  func.func @transform_0(%arg0: i32, %arg1: i32, %arg2: i32, %arg3: i32) -> (i32, i32, i32, i32) {
    %c0_i32 = arith.constant 0 : i32
    return %arg0, %arg1, %arg2, %arg3 : i32, i32, i32, i32
  }
  func.func @transform_1(%arg0: i32, %arg1: i32, %arg2: i32, %arg3: i32) -> (i32, i32, i32, i32) {
    %c0_i32 = arith.constant 0 : i32
    %c0_i32_0 = arith.constant 0 : i32
    return %arg0, %arg1, %c0_i32, %arg3 : i32, i32, i32, i32
  }
  func.func @transform_2(%arg0: i32, %arg1: i32, %arg2: i32, %arg3: i32) -> (i32, i32, i32, i32) {
    %c0_i32 = arith.constant 0 : i32
    %c0_i32_0 = arith.constant 0 : i32
    return %arg0, %arg1, %c0_i32, %arg3 : i32, i32, i32, i32
  }
  func.func @transform_3(%arg0: i32, %arg1: i32, %arg2: i32, %arg3: i32) -> (i32, i32, i32, i32) {
    %c0_i32 = arith.constant 0 : i32
    return %arg0, %arg1, %arg2, %arg3 : i32, i32, i32, i32
  }
}

module attributes {stable_mosaic.version = 11 : i64} {
  func.func @kernel(%arg0: i32, %arg1: i32, %arg2: i32, %arg3: i32, %arg4: i32, %arg5: memref<1x1x8x256xbf16, #tpu.memory_space<vmem>>, %arg6: memref<1x256x128xbf16, #tpu.memory_space<vmem>>, %arg7: memref<1x1x8x128xf32, #tpu.memory_space<vmem>>, %arg8: memref<1x1x1x128xf32, #tpu.memory_space<vmem>>, %arg9: memref<1x1x1x128xf32, #tpu.memory_space<vmem>>, %arg10: memref<8x128xf32, #tpu.memory_space<vmem>>) attributes {dimension_semantics = [#tpu.dimension_semantics<parallel>, #tpu.dimension_semantics<parallel>, #tpu.dimension_semantics<parallel>, #tpu.dimension_semantics<arbitrary>, #tpu.dimension_semantics<arbitrary>], iteration_bounds = array<i64: 2, 2, 1, 1, 1>, scalar_prefetch = 0 : i64, scratch_operands = 1 : i64, tpu.core_type = #tpu.core_type<tc>, window_params = [{transform_indices = @transform_0, window_bounds = array<i64: 1, 1, 8, 256>}, {transform_indices = @transform_1, window_bounds = array<i64: 1, 256, 128>}, {transform_indices = @transform_2, window_bounds = array<i64: 1, 1, 8, 128>}, {transform_indices = @transform_3, window_bounds = array<i64: 1, 1, 1, 128>}, {transform_indices = @transform_4, window_bounds = array<i64: 1, 1, 1, 128>}]} {
    %c0_i32 = arith.constant 0 : i32
    %0 = arith.cmpi eq, %arg4, %c0_i32 : i32
    %1 = arith.extui %0 : i1 to i32
    %c0_i32_0 = arith.constant 0 : i32
    %2 = arith.cmpi ne, %1, %c0_i32_0 : i32
    scf.if %2 {
      %cst_15 = arith.constant 0.000000e+00 : f32
      %21 = vector.broadcast %cst_15 : f32 to vector<8x128xf32>
      %c0_16 = arith.constant 0 : index
      %c0_17 = arith.constant 0 : index
      %22 = vector.load %arg10[%c0_16, %c0_17] : memref<8x128xf32, #tpu.memory_space<vmem>>, vector<8x128xf32>
      tpu.vector_store %arg10[%c0_16, %c0_17], %21 {strides = array<i32>} : memref<8x128xf32, #tpu.memory_space<vmem>>, vector<8x128xf32>,
    } else {
    }
    %c0 = arith.constant 0 : index
    %c0_1 = arith.constant 0 : index
    %c0_2 = arith.constant 0 : index
    %c0_3 = arith.constant 0 : index
    %3 = vector.load %arg5[%c0, %c0_1, %c0_2, %c0_3] : memref<1x1x8x256xbf16, #tpu.memory_space<vmem>>, vector<1x1x8x256xbf16>
    %4 = vector.shape_cast %3 : vector<1x1x8x256xbf16> to vector<8x256xbf16>
    %5 = arith.extf %4 : vector<8x256xbf16> to vector<8x256xf32>
    %cst = arith.constant 0.000000e+00 : f32
    %6 = vector.broadcast %cst : f32 to vector<8x256xf32>
    %7 = arith.cmpf ogt, %5, %6 : vector<8x256xf32>
    %cst_4 = arith.constant 2.000000e-01 : f32
    %8 = vector.broadcast %cst_4 : f32 to vector<8x256xf32>
    %9 = arith.mulf %8, %5 : vector<8x256xf32>
    %10 = arith.select %7, %5, %9 : vector<8x256xi1>, vector<8x256xf32>
    %11 = arith.truncf %10 : vector<8x256xf32> to vector<8x256xbf16>
    %c0_5 = arith.constant 0 : index
    %c0_6 = arith.constant 0 : index
    %12 = vector.load %arg10[%c0_5, %c0_6] : memref<8x128xf32, #tpu.memory_space<vmem>>, vector<8x128xf32>
    %c0_7 = arith.constant 0 : index
    %c0_8 = arith.constant 0 : index
    %c0_9 = arith.constant 0 : index
    %13 = vector.load %arg6[%c0_7, %c0_8, %c0_9] : memref<1x256x128xbf16, #tpu.memory_space<vmem>>, vector<1x256x128xbf16>
    %14 = vector.shape_cast %13 : vector<1x256x128xbf16> to vector<256x128xbf16>
    %cst_10 = arith.constant dense<0.000000e+00> : vector<8x128xf32>
    %15 = tpu.matmul %11, %14, %cst_10 {dimension_numbers = #tpu.dot_dimension_numbers<[1], [0], [0], [1], [0, 0, 1, 1], [], []>} : vector<8x256xbf16>, vector<256x128xbf16>, vector<8x128xf32> -> vector<8x128xf32>
    %16 = arith.addf %12, %15 : vector<8x128xf32>
    %c0_11 = arith.constant 0 : index
    %c0_12 = arith.constant 0 : index
    %17 = vector.load %arg10[%c0_11, %c0_12] : memref<8x128xf32, #tpu.memory_space<vmem>>, vector<8x128xf32>
    tpu.vector_store %arg10[%c0_11, %c0_12], %16 {strides = array<i32>} : memref<8x128xf32, #tpu.memory_space<vmem>>, vector<8x128xf32>,
    %c0_i32_13 = arith.constant 0 : i32
    %18 = arith.cmpi eq, %arg4, %c0_i32_13 : i32
    %19 = arith.extui %18 : i1 to i32
    %c0_i32_14 = arith.constant 0 : i32
    %20 = arith.cmpi ne, %19, %c0_i32_14 : i32
    scf.if %20 {
      %c0_15 = arith.constant 0 : index
      %c0_16 = arith.constant 0 : index
      %21 = vector.load %arg10[%c0_15, %c0_16] : memref<8x128xf32, #tpu.memory_space<vmem>>, vector<8x128xf32>
      %c0_17 = arith.constant 0 : index
      %c0_18 = arith.constant 0 : index
      %c0_19 = arith.constant 0 : index
      %c0_20 = arith.constant 0 : index
      %22 = vector.load %arg7[%c0_17, %c0_18, %c0_19, %c0_20] : memref<1x1x8x128xf32, #tpu.memory_space<vmem>>, vector<1x1x8x128xf32>
      %23 = vector.shape_cast %22 : vector<1x1x8x128xf32> to vector<8x128xf32>
      %24 = vector.shape_cast %21 : vector<8x128xf32> to vector<1x1x8x128xf32>
      tpu.vector_store %arg7[%c0_17, %c0_18, %c0_19, %c0_20], %24 {strides = array<i32>} : memref<1x1x8x128xf32, #tpu.memory_space<vmem>>, vector<1x1x8x128xf32>,
      %c0_i32_21 = arith.constant 0 : i32
      %25 = arith.cmpi eq, %arg3, %c0_i32_21 : i32
      %26 = arith.extui %25 : i1 to i32
      %c0_i32_22 = arith.constant 0 : i32
      %27 = arith.cmpi ne, %26, %c0_i32_22 : i32
      scf.if %27 {
        %cst_41 = arith.constant 0.000000e+00 : f32
        %45 = vector.broadcast %cst_41 : f32 to vector<1x128xf32>
        %c0_42 = arith.constant 0 : index
        %c0_43 = arith.constant 0 : index
        %c0_44 = arith.constant 0 : index
        %c0_45 = arith.constant 0 : index
        %46 = vector.load %arg8[%c0_42, %c0_43, %c0_44, %c0_45] : memref<1x1x1x128xf32, #tpu.memory_space<vmem>>, vector<1x1x1x128xf32>
        %47 = vector.shape_cast %46 : vector<1x1x1x128xf32> to vector<1x128xf32>
        %48 = vector.shape_cast %45 : vector<1x128xf32> to vector<1x1x1x128xf32>
        tpu.vector_store %arg8[%c0_42, %c0_43, %c0_44, %c0_45], %48 {strides = array<i32>} : memref<1x1x1x128xf32, #tpu.memory_space<vmem>>, vector<1x1x1x128xf32>,
        %cst_46 = arith.constant 0.000000e+00 : f32
        %49 = vector.broadcast %cst_46 : f32 to vector<1x128xf32>
        %c0_47 = arith.constant 0 : index
        %c0_48 = arith.constant 0 : index
        %c0_49 = arith.constant 0 : index
        %c0_50 = arith.constant 0 : index
        %50 = vector.load %arg9[%c0_47, %c0_48, %c0_49, %c0_50] : memref<1x1x1x128xf32, #tpu.memory_space<vmem>>, vector<1x1x1x128xf32>
        %51 = vector.shape_cast %50 : vector<1x1x1x128xf32> to vector<1x128xf32>
        %52 = vector.shape_cast %49 : vector<1x128xf32> to vector<1x1x1x128xf32>
        tpu.vector_store %arg9[%c0_47, %c0_48, %c0_49, %c0_50], %52 {strides = array<i32>} : memref<1x1x1x128xf32, #tpu.memory_space<vmem>>, vector<1x1x1x128xf32>,
      } else {
      }
      %c0_23 = arith.constant 0 : index
      %c0_24 = arith.constant 0 : index
      %c0_25 = arith.constant 0 : index
      %c0_26 = arith.constant 0 : index
      %28 = vector.load %arg8[%c0_23, %c0_24, %c0_25, %c0_26] : memref<1x1x1x128xf32, #tpu.memory_space<vmem>>, vector<1x1x1x128xf32>
      %29 = vector.shape_cast %28 : vector<1x1x1x128xf32> to vector<1x128xf32>
      %cst_27 = arith.constant dense<0.000000e+00> : vector<128xf32>
      %30 = vector.multi_reduction <add>, %21, %cst_27 [0] : vector<8x128xf32> to vector<128xf32>
      %31 = vector.shape_cast %30 : vector<128xf32> to vector<1x128xf32>
      %32 = arith.addf %29, %31 : vector<1x128xf32>
      %c0_28 = arith.constant 0 : index
      %c0_29 = arith.constant 0 : index
      %c0_30 = arith.constant 0 : index
      %c0_31 = arith.constant 0 : index
      %33 = vector.load %arg8[%c0_28, %c0_29, %c0_30, %c0_31] : memref<1x1x1x128xf32, #tpu.memory_space<vmem>>, vector<1x1x1x128xf32>
      %34 = vector.shape_cast %33 : vector<1x1x1x128xf32> to vector<1x128xf32>
      %35 = vector.shape_cast %32 : vector<1x128xf32> to vector<1x1x1x128xf32>
      tpu.vector_store %arg8[%c0_28, %c0_29, %c0_30, %c0_31], %35 {strides = array<i32>} : memref<1x1x1x128xf32, #tpu.memory_space<vmem>>, vector<1x1x1x128xf32>,
      %c0_32 = arith.constant 0 : index
      %c0_33 = arith.constant 0 : index
      %c0_34 = arith.constant 0 : index
      %c0_35 = arith.constant 0 : index
      %36 = vector.load %arg9[%c0_32, %c0_33, %c0_34, %c0_35] : memref<1x1x1x128xf32, #tpu.memory_space<vmem>>, vector<1x1x1x128xf32>
      %37 = vector.shape_cast %36 : vector<1x1x1x128xf32> to vector<1x128xf32>
      %38 = arith.mulf %21, %21 : vector<8x128xf32>
      %cst_36 = arith.constant dense<0.000000e+00> : vector<128xf32>
      %39 = vector.multi_reduction <add>, %38, %cst_36 [0] : vector<8x128xf32> to vector<128xf32>
      %40 = vector.shape_cast %39 : vector<128xf32> to vector<1x128xf32>
      %41 = arith.addf %37, %40 : vector<1x128xf32>
      %c0_37 = arith.constant 0 : index
      %c0_38 = arith.constant 0 : index
      %c0_39 = arith.constant 0 : index
      %c0_40 = arith.constant 0 : index
      %42 = vector.load %arg9[%c0_37, %c0_38, %c0_39, %c0_40] : memref<1x1x1x128xf32, #tpu.memory_space<vmem>>, vector<1x1x1x128xf32>
      %43 = vector.shape_cast %42 : vector<1x1x1x128xf32> to vector<1x128xf32>
      %44 = vector.shape_cast %41 : vector<1x128xf32> to vector<1x1x1x128xf32>
      tpu.vector_store %arg9[%c0_37, %c0_38, %c0_39, %c0_40], %44 {strides = array<i32>} : memref<1x1x1x128xf32, #tpu.memory_space<vmem>>, vector<1x1x1x128xf32>,
    } else {
    }
    return
  }
  func.func @transform_0(%arg0: i32, %arg1: i32, %arg2: i32, %arg3: i32, %arg4: i32) -> (i32, i32, i32, i32) {
    %c0_i32 = arith.constant 0 : i32
    return %arg0, %arg1, %arg3, %arg4 : i32, i32, i32, i32
  }
  func.func @transform_1(%arg0: i32, %arg1: i32, %arg2: i32, %arg3: i32, %arg4: i32) -> (i32, i32, i32) {
    %c0_i32 = arith.constant 0 : i32
    return %arg0, %arg4, %arg2 : i32, i32, i32
  }
  func.func @transform_2(%arg0: i32, %arg1: i32, %arg2: i32, %arg3: i32, %arg4: i32) -> (i32, i32, i32, i32) {
    %c0_i32 = arith.constant 0 : i32
    return %arg0, %arg1, %arg3, %arg2 : i32, i32, i32, i32
  }
  func.func @transform_3(%arg0: i32, %arg1: i32, %arg2: i32, %arg3: i32, %arg4: i32) -> (i32, i32, i32, i32) {
    %c0_i32 = arith.constant 0 : i32
    %c0_i32_0 = arith.constant 0 : i32
    return %arg0, %arg1, %c0_i32, %arg2 : i32, i32, i32, i32
  }
  func.func @transform_4(%arg0: i32, %arg1: i32, %arg2: i32, %arg3: i32, %arg4: i32) -> (i32, i32, i32, i32) {
    %c0_i32 = arith.constant 0 : i32
    %c0_i32_0 = arith.constant 0 : i32
    return %arg0, %arg1, %c0_i32, %arg2 : i32, i32, i32, i32
  }
}

module attributes {stable_mosaic.version = 11 : i64} {
  func.func @kernel(%arg0: i32, %arg1: i32, %arg2: i32, %arg3: i32, %arg4: i32, %arg5: memref<1x1x8x512xbf16, #tpu.memory_space<vmem>>, %arg6: memref<1x512x128xbf16, #tpu.memory_space<vmem>>, %arg7: memref<1x1x128xf32, #tpu.memory_space<vmem>>, %arg8: memref<1x1x8x128xf32, #tpu.memory_space<vmem>>, %arg9: memref<8x128xf32, #tpu.memory_space<vmem>>) attributes {dimension_semantics = [#tpu.dimension_semantics<parallel>, #tpu.dimension_semantics<parallel>, #tpu.dimension_semantics<parallel>, #tpu.dimension_semantics<parallel>, #tpu.dimension_semantics<arbitrary>], iteration_bounds = array<i64: 2, 2, 1, 1, 1>, scalar_prefetch = 0 : i64, scratch_operands = 1 : i64, tpu.core_type = #tpu.core_type<tc>, window_params = [{transform_indices = @transform_0, window_bounds = array<i64: 1, 1, 8, 512>}, {transform_indices = @transform_1, window_bounds = array<i64: 1, 512, 128>}, {transform_indices = @transform_2, window_bounds = array<i64: 1, 1, 128>}, {transform_indices = @transform_3, window_bounds = array<i64: 1, 1, 8, 128>}]} {
    %c0_i32 = arith.constant 0 : i32
    %0 = arith.cmpi eq, %arg4, %c0_i32 : i32
    %1 = arith.extui %0 : i1 to i32
    %c0_i32_0 = arith.constant 0 : i32
    %2 = arith.cmpi ne, %1, %c0_i32_0 : i32
    scf.if %2 {
      %cst_15 = arith.constant 0.000000e+00 : f32
      %21 = vector.broadcast %cst_15 : f32 to vector<8x128xf32>
      %c0_16 = arith.constant 0 : index
      %c0_17 = arith.constant 0 : index
      %22 = vector.load %arg9[%c0_16, %c0_17] : memref<8x128xf32, #tpu.memory_space<vmem>>, vector<8x128xf32>
      tpu.vector_store %arg9[%c0_16, %c0_17], %21 {strides = array<i32>} : memref<8x128xf32, #tpu.memory_space<vmem>>, vector<8x128xf32>,
    } else {
    }
    %c0 = arith.constant 0 : index
    %c0_1 = arith.constant 0 : index
    %c0_2 = arith.constant 0 : index
    %c0_3 = arith.constant 0 : index
    %3 = vector.load %arg5[%c0, %c0_1, %c0_2, %c0_3] : memref<1x1x8x512xbf16, #tpu.memory_space<vmem>>, vector<1x1x8x512xbf16>
    %4 = vector.shape_cast %3 : vector<1x1x8x512xbf16> to vector<8x512xbf16>
    %5 = arith.extf %4 : vector<8x512xbf16> to vector<8x512xf32>
    %cst = arith.constant 0.000000e+00 : f32
    %6 = vector.broadcast %cst : f32 to vector<8x512xf32>
    %7 = arith.cmpf ogt, %5, %6 : vector<8x512xf32>
    %cst_4 = arith.constant 2.000000e-01 : f32
    %8 = vector.broadcast %cst_4 : f32 to vector<8x512xf32>
    %9 = arith.mulf %8, %5 : vector<8x512xf32>
    %10 = arith.select %7, %5, %9 : vector<8x512xi1>, vector<8x512xf32>
    %11 = arith.truncf %10 : vector<8x512xf32> to vector<8x512xbf16>
    %c0_5 = arith.constant 0 : index
    %c0_6 = arith.constant 0 : index
    %12 = vector.load %arg9[%c0_5, %c0_6] : memref<8x128xf32, #tpu.memory_space<vmem>>, vector<8x128xf32>
    %c0_7 = arith.constant 0 : index
    %c0_8 = arith.constant 0 : index
    %c0_9 = arith.constant 0 : index
    %13 = vector.load %arg6[%c0_7, %c0_8, %c0_9] : memref<1x512x128xbf16, #tpu.memory_space<vmem>>, vector<1x512x128xbf16>
    %14 = vector.shape_cast %13 : vector<1x512x128xbf16> to vector<512x128xbf16>
    %cst_10 = arith.constant dense<0.000000e+00> : vector<8x128xf32>
    %15 = tpu.matmul %11, %14, %cst_10 {dimension_numbers = #tpu.dot_dimension_numbers<[1], [0], [0], [1], [0, 0, 1, 1], [], []>} : vector<8x512xbf16>, vector<512x128xbf16>, vector<8x128xf32> -> vector<8x128xf32>
    %16 = arith.addf %12, %15 : vector<8x128xf32>
    %c0_11 = arith.constant 0 : index
    %c0_12 = arith.constant 0 : index
    %17 = vector.load %arg9[%c0_11, %c0_12] : memref<8x128xf32, #tpu.memory_space<vmem>>, vector<8x128xf32>
    tpu.vector_store %arg9[%c0_11, %c0_12], %16 {strides = array<i32>} : memref<8x128xf32, #tpu.memory_space<vmem>>, vector<8x128xf32>,
    %c0_i32_13 = arith.constant 0 : i32
    %18 = arith.cmpi eq, %arg4, %c0_i32_13 : i32
    %19 = arith.extui %18 : i1 to i32
    %c0_i32_14 = arith.constant 0 : i32
    %20 = arith.cmpi ne, %19, %c0_i32_14 : i32
    scf.if %20 {
      %c0_15 = arith.constant 0 : index
      %c0_16 = arith.constant 0 : index
      %21 = vector.load %arg9[%c0_15, %c0_16] : memref<8x128xf32, #tpu.memory_space<vmem>>, vector<8x128xf32>
      %c0_17 = arith.constant 0 : index
      %c0_18 = arith.constant 0 : index
      %c0_19 = arith.constant 0 : index
      %22 = vector.load %arg7[%c0_17, %c0_18, %c0_19] : memref<1x1x128xf32, #tpu.memory_space<vmem>>, vector<1x1x128xf32>
      %23 = vector.shape_cast %22 : vector<1x1x128xf32> to vector<1x128xf32>
      %24 = vector.broadcast %23 : vector<1x128xf32> to vector<8x128xf32>
      %25 = arith.addf %21, %24 : vector<8x128xf32>
      %c0_20 = arith.constant 0 : index
      %c0_21 = arith.constant 0 : index
      %c0_22 = arith.constant 0 : index
      %c0_23 = arith.constant 0 : index
      %26 = vector.load %arg8[%c0_20, %c0_21, %c0_22, %c0_23] : memref<1x1x8x128xf32, #tpu.memory_space<vmem>>, vector<1x1x8x128xf32>
      %27 = vector.shape_cast %26 : vector<1x1x8x128xf32> to vector<8x128xf32>
      %28 = vector.shape_cast %25 : vector<8x128xf32> to vector<1x1x8x128xf32>
      tpu.vector_store %arg8[%c0_20, %c0_21, %c0_22, %c0_23], %28 {strides = array<i32>} : memref<1x1x8x128xf32, #tpu.memory_space<vmem>>, vector<1x1x8x128xf32>,
    } else {
    }
    return
  }
  func.func @transform_0(%arg0: i32, %arg1: i32, %arg2: i32, %arg3: i32, %arg4: i32) -> (i32, i32, i32, i32) {
    %c0_i32 = arith.constant 0 : i32
    return %arg0, %arg1, %arg3, %arg4 : i32, i32, i32, i32
  }
  func.func @transform_1(%arg0: i32, %arg1: i32, %arg2: i32, %arg3: i32, %arg4: i32) -> (i32, i32, i32) {
    %c0_i32 = arith.constant 0 : i32
    return %arg0, %arg4, %arg2 : i32, i32, i32
  }
  func.func @transform_2(%arg0: i32, %arg1: i32, %arg2: i32, %arg3: i32, %arg4: i32) -> (i32, i32, i32) {
    %c0_i32 = arith.constant 0 : i32
    %c0_i32_0 = arith.constant 0 : i32
    return %arg0, %c0_i32, %arg2 : i32, i32, i32
  }
  func.func @transform_3(%arg0: i32, %arg1: i32, %arg2: i32, %arg3: i32, %arg4: i32) -> (i32, i32, i32, i32) {
    %c0_i32 = arith.constant 0 : i32
    return %arg0, %arg1, %arg3, %arg2 : i32, i32, i32, i32
  }
}

module attributes {stable_mosaic.version = 11 : i64} {
  func.func @kernel(%arg0: i32, %arg1: i32, %arg2: i32, %arg3: i32, %arg4: i32, %arg5: memref<1x1x8x256xbf16, #tpu.memory_space<vmem>>, %arg6: memref<1x256x128xbf16, #tpu.memory_space<vmem>>, %arg7: memref<1x1x8x128xf32, #tpu.memory_space<vmem>>, %arg8: memref<1x1x1x128xf32, #tpu.memory_space<vmem>>, %arg9: memref<1x1x1x128xf32, #tpu.memory_space<vmem>>, %arg10: memref<8x128xf32, #tpu.memory_space<vmem>>) attributes {dimension_semantics = [#tpu.dimension_semantics<parallel>, #tpu.dimension_semantics<parallel>, #tpu.dimension_semantics<parallel>, #tpu.dimension_semantics<arbitrary>, #tpu.dimension_semantics<arbitrary>], iteration_bounds = array<i64: 8, 2, 1, 1, 1>, scalar_prefetch = 0 : i64, scratch_operands = 1 : i64, tpu.core_type = #tpu.core_type<tc>, window_params = [{transform_indices = @transform_0, window_bounds = array<i64: 1, 1, 8, 256>}, {transform_indices = @transform_1, window_bounds = array<i64: 1, 256, 128>}, {transform_indices = @transform_2, window_bounds = array<i64: 1, 1, 8, 128>}, {transform_indices = @transform_3, window_bounds = array<i64: 1, 1, 1, 128>}, {transform_indices = @transform_4, window_bounds = array<i64: 1, 1, 1, 128>}]} {
    %c0_i32 = arith.constant 0 : i32
    %0 = arith.cmpi eq, %arg4, %c0_i32 : i32
    %1 = arith.extui %0 : i1 to i32
    %c0_i32_0 = arith.constant 0 : i32
    %2 = arith.cmpi ne, %1, %c0_i32_0 : i32
    scf.if %2 {
      %cst_14 = arith.constant 0.000000e+00 : f32
      %18 = vector.broadcast %cst_14 : f32 to vector<8x128xf32>
      %c0_15 = arith.constant 0 : index
      %c0_16 = arith.constant 0 : index
      %19 = vector.load %arg10[%c0_15, %c0_16] : memref<8x128xf32, #tpu.memory_space<vmem>>, vector<8x128xf32>
      tpu.vector_store %arg10[%c0_15, %c0_16], %18 {strides = array<i32>} : memref<8x128xf32, #tpu.memory_space<vmem>>, vector<8x128xf32>,
    } else {
    }
    %c0 = arith.constant 0 : index
    %c0_1 = arith.constant 0 : index
    %c0_2 = arith.constant 0 : index
    %c0_3 = arith.constant 0 : index
    %3 = vector.load %arg5[%c0, %c0_1, %c0_2, %c0_3] : memref<1x1x8x256xbf16, #tpu.memory_space<vmem>>, vector<1x1x8x256xbf16>
    %4 = vector.shape_cast %3 : vector<1x1x8x256xbf16> to vector<8x256xbf16>
    %5 = arith.extf %4 : vector<8x256xbf16> to vector<8x256xf32>
    %cst = arith.constant 0.000000e+00 : f32
    %6 = vector.broadcast %cst : f32 to vector<8x256xf32>
    %7 = arith.maximumf %5, %6 : vector<8x256xf32>
    %8 = arith.truncf %7 : vector<8x256xf32> to vector<8x256xbf16>
    %c0_4 = arith.constant 0 : index
    %c0_5 = arith.constant 0 : index
    %9 = vector.load %arg10[%c0_4, %c0_5] : memref<8x128xf32, #tpu.memory_space<vmem>>, vector<8x128xf32>
    %c0_6 = arith.constant 0 : index
    %c0_7 = arith.constant 0 : index
    %c0_8 = arith.constant 0 : index
    %10 = vector.load %arg6[%c0_6, %c0_7, %c0_8] : memref<1x256x128xbf16, #tpu.memory_space<vmem>>, vector<1x256x128xbf16>
    %11 = vector.shape_cast %10 : vector<1x256x128xbf16> to vector<256x128xbf16>
    %cst_9 = arith.constant dense<0.000000e+00> : vector<8x128xf32>
    %12 = tpu.matmul %8, %11, %cst_9 {dimension_numbers = #tpu.dot_dimension_numbers<[1], [0], [0], [1], [0, 0, 1, 1], [], []>} : vector<8x256xbf16>, vector<256x128xbf16>, vector<8x128xf32> -> vector<8x128xf32>
    %13 = arith.addf %9, %12 : vector<8x128xf32>
    %c0_10 = arith.constant 0 : index
    %c0_11 = arith.constant 0 : index
    %14 = vector.load %arg10[%c0_10, %c0_11] : memref<8x128xf32, #tpu.memory_space<vmem>>, vector<8x128xf32>
    tpu.vector_store %arg10[%c0_10, %c0_11], %13 {strides = array<i32>} : memref<8x128xf32, #tpu.memory_space<vmem>>, vector<8x128xf32>,
    %c0_i32_12 = arith.constant 0 : i32
    %15 = arith.cmpi eq, %arg4, %c0_i32_12 : i32
    %16 = arith.extui %15 : i1 to i32
    %c0_i32_13 = arith.constant 0 : i32
    %17 = arith.cmpi ne, %16, %c0_i32_13 : i32
    scf.if %17 {
      %c0_14 = arith.constant 0 : index
      %c0_15 = arith.constant 0 : index
      %18 = vector.load %arg10[%c0_14, %c0_15] : memref<8x128xf32, #tpu.memory_space<vmem>>, vector<8x128xf32>
      %c0_16 = arith.constant 0 : index
      %c0_17 = arith.constant 0 : index
      %c0_18 = arith.constant 0 : index
      %c0_19 = arith.constant 0 : index
      %19 = vector.load %arg7[%c0_16, %c0_17, %c0_18, %c0_19] : memref<1x1x8x128xf32, #tpu.memory_space<vmem>>, vector<1x1x8x128xf32>
      %20 = vector.shape_cast %19 : vector<1x1x8x128xf32> to vector<8x128xf32>
      %21 = vector.shape_cast %18 : vector<8x128xf32> to vector<1x1x8x128xf32>
      tpu.vector_store %arg7[%c0_16, %c0_17, %c0_18, %c0_19], %21 {strides = array<i32>} : memref<1x1x8x128xf32, #tpu.memory_space<vmem>>, vector<1x1x8x128xf32>,
      %c0_i32_20 = arith.constant 0 : i32
      %22 = arith.cmpi eq, %arg3, %c0_i32_20 : i32
      %23 = arith.extui %22 : i1 to i32
      %c0_i32_21 = arith.constant 0 : i32
      %24 = arith.cmpi ne, %23, %c0_i32_21 : i32
      scf.if %24 {
        %cst_40 = arith.constant 0.000000e+00 : f32
        %42 = vector.broadcast %cst_40 : f32 to vector<1x128xf32>
        %c0_41 = arith.constant 0 : index
        %c0_42 = arith.constant 0 : index
        %c0_43 = arith.constant 0 : index
        %c0_44 = arith.constant 0 : index
        %43 = vector.load %arg8[%c0_41, %c0_42, %c0_43, %c0_44] : memref<1x1x1x128xf32, #tpu.memory_space<vmem>>, vector<1x1x1x128xf32>
        %44 = vector.shape_cast %43 : vector<1x1x1x128xf32> to vector<1x128xf32>
        %45 = vector.shape_cast %42 : vector<1x128xf32> to vector<1x1x1x128xf32>
        tpu.vector_store %arg8[%c0_41, %c0_42, %c0_43, %c0_44], %45 {strides = array<i32>} : memref<1x1x1x128xf32, #tpu.memory_space<vmem>>, vector<1x1x1x128xf32>,
        %cst_45 = arith.constant 0.000000e+00 : f32
        %46 = vector.broadcast %cst_45 : f32 to vector<1x128xf32>
        %c0_46 = arith.constant 0 : index
        %c0_47 = arith.constant 0 : index
        %c0_48 = arith.constant 0 : index
        %c0_49 = arith.constant 0 : index
        %47 = vector.load %arg9[%c0_46, %c0_47, %c0_48, %c0_49] : memref<1x1x1x128xf32, #tpu.memory_space<vmem>>, vector<1x1x1x128xf32>
        %48 = vector.shape_cast %47 : vector<1x1x1x128xf32> to vector<1x128xf32>
        %49 = vector.shape_cast %46 : vector<1x128xf32> to vector<1x1x1x128xf32>
        tpu.vector_store %arg9[%c0_46, %c0_47, %c0_48, %c0_49], %49 {strides = array<i32>} : memref<1x1x1x128xf32, #tpu.memory_space<vmem>>, vector<1x1x1x128xf32>,
      } else {
      }
      %c0_22 = arith.constant 0 : index
      %c0_23 = arith.constant 0 : index
      %c0_24 = arith.constant 0 : index
      %c0_25 = arith.constant 0 : index
      %25 = vector.load %arg8[%c0_22, %c0_23, %c0_24, %c0_25] : memref<1x1x1x128xf32, #tpu.memory_space<vmem>>, vector<1x1x1x128xf32>
      %26 = vector.shape_cast %25 : vector<1x1x1x128xf32> to vector<1x128xf32>
      %cst_26 = arith.constant dense<0.000000e+00> : vector<128xf32>
      %27 = vector.multi_reduction <add>, %18, %cst_26 [0] : vector<8x128xf32> to vector<128xf32>
      %28 = vector.shape_cast %27 : vector<128xf32> to vector<1x128xf32>
      %29 = arith.addf %26, %28 : vector<1x128xf32>
      %c0_27 = arith.constant 0 : index
      %c0_28 = arith.constant 0 : index
      %c0_29 = arith.constant 0 : index
      %c0_30 = arith.constant 0 : index
      %30 = vector.load %arg8[%c0_27, %c0_28, %c0_29, %c0_30] : memref<1x1x1x128xf32, #tpu.memory_space<vmem>>, vector<1x1x1x128xf32>
      %31 = vector.shape_cast %30 : vector<1x1x1x128xf32> to vector<1x128xf32>
      %32 = vector.shape_cast %29 : vector<1x128xf32> to vector<1x1x1x128xf32>
      tpu.vector_store %arg8[%c0_27, %c0_28, %c0_29, %c0_30], %32 {strides = array<i32>} : memref<1x1x1x128xf32, #tpu.memory_space<vmem>>, vector<1x1x1x128xf32>,
      %c0_31 = arith.constant 0 : index
      %c0_32 = arith.constant 0 : index
      %c0_33 = arith.constant 0 : index
      %c0_34 = arith.constant 0 : index
      %33 = vector.load %arg9[%c0_31, %c0_32, %c0_33, %c0_34] : memref<1x1x1x128xf32, #tpu.memory_space<vmem>>, vector<1x1x1x128xf32>
      %34 = vector.shape_cast %33 : vector<1x1x1x128xf32> to vector<1x128xf32>
      %35 = arith.mulf %18, %18 : vector<8x128xf32>
      %cst_35 = arith.constant dense<0.000000e+00> : vector<128xf32>
      %36 = vector.multi_reduction <add>, %35, %cst_35 [0] : vector<8x128xf32> to vector<128xf32>
      %37 = vector.shape_cast %36 : vector<128xf32> to vector<1x128xf32>
      %38 = arith.addf %34, %37 : vector<1x128xf32>
      %c0_36 = arith.constant 0 : index
      %c0_37 = arith.constant 0 : index
      %c0_38 = arith.constant 0 : index
      %c0_39 = arith.constant 0 : index
      %39 = vector.load %arg9[%c0_36, %c0_37, %c0_38, %c0_39] : memref<1x1x1x128xf32, #tpu.memory_space<vmem>>, vector<1x1x1x128xf32>
      %40 = vector.shape_cast %39 : vector<1x1x1x128xf32> to vector<1x128xf32>
      %41 = vector.shape_cast %38 : vector<1x128xf32> to vector<1x1x1x128xf32>
      tpu.vector_store %arg9[%c0_36, %c0_37, %c0_38, %c0_39], %41 {strides = array<i32>} : memref<1x1x1x128xf32, #tpu.memory_space<vmem>>, vector<1x1x1x128xf32>,
    } else {
    }
    return
  }
  func.func @transform_0(%arg0: i32, %arg1: i32, %arg2: i32, %arg3: i32, %arg4: i32) -> (i32, i32, i32, i32) {
    %c0_i32 = arith.constant 0 : i32
    return %arg0, %arg1, %arg3, %arg4 : i32, i32, i32, i32
  }
  func.func @transform_1(%arg0: i32, %arg1: i32, %arg2: i32, %arg3: i32, %arg4: i32) -> (i32, i32, i32) {
    %c0_i32 = arith.constant 0 : i32
    return %arg0, %arg4, %arg2 : i32, i32, i32
  }
  func.func @transform_2(%arg0: i32, %arg1: i32, %arg2: i32, %arg3: i32, %arg4: i32) -> (i32, i32, i32, i32) {
    %c0_i32 = arith.constant 0 : i32
    return %arg0, %arg1, %arg3, %arg2 : i32, i32, i32, i32
  }
  func.func @transform_3(%arg0: i32, %arg1: i32, %arg2: i32, %arg3: i32, %arg4: i32) -> (i32, i32, i32, i32) {
    %c0_i32 = arith.constant 0 : i32
    %c0_i32_0 = arith.constant 0 : i32
    return %arg0, %arg1, %c0_i32, %arg2 : i32, i32, i32, i32
  }
  func.func @transform_4(%arg0: i32, %arg1: i32, %arg2: i32, %arg3: i32, %arg4: i32) -> (i32, i32, i32, i32) {
    %c0_i32 = arith.constant 0 : i32
    %c0_i32_0 = arith.constant 0 : i32
    return %arg0, %arg1, %c0_i32, %arg2 : i32, i32, i32, i32
  }
}

module attributes {stable_mosaic.version = 11 : i64} {
  func.func @_norm_apply_kernel(%arg0: i32, %arg1: i32, %arg2: i32, %arg3: i32, %arg4: memref<1x1x8x128xf32, #tpu.memory_space<vmem>>, %arg5: memref<1x1x1x128xf32, #tpu.memory_space<vmem>>, %arg6: memref<1x1x1x128xf32, #tpu.memory_space<vmem>>, %arg7: memref<1x1x8x128xf32, #tpu.memory_space<vmem>>) attributes {dimension_semantics = [#tpu.dimension_semantics<parallel>, #tpu.dimension_semantics<parallel>, #tpu.dimension_semantics<parallel>, #tpu.dimension_semantics<parallel>], iteration_bounds = array<i64: 8, 2, 1, 1>, scalar_prefetch = 0 : i64, scratch_operands = 0 : i64, tpu.core_type = #tpu.core_type<tc>, window_params = [{transform_indices = @transform_0, window_bounds = array<i64: 1, 1, 8, 128>}, {transform_indices = @transform_1, window_bounds = array<i64: 1, 1, 1, 128>}, {transform_indices = @transform_2, window_bounds = array<i64: 1, 1, 1, 128>}, {transform_indices = @transform_3, window_bounds = array<i64: 1, 1, 8, 128>}]} {
    %c0 = arith.constant 0 : index
    %c0_0 = arith.constant 0 : index
    %c0_1 = arith.constant 0 : index
    %c0_2 = arith.constant 0 : index
    %0 = vector.load %arg4[%c0, %c0_0, %c0_1, %c0_2] : memref<1x1x8x128xf32, #tpu.memory_space<vmem>>, vector<1x1x8x128xf32>
    %1 = vector.shape_cast %0 : vector<1x1x8x128xf32> to vector<8x128xf32>
    %c0_3 = arith.constant 0 : index
    %c0_4 = arith.constant 0 : index
    %c0_5 = arith.constant 0 : index
    %c0_6 = arith.constant 0 : index
    %2 = vector.load %arg5[%c0_3, %c0_4, %c0_5, %c0_6] : memref<1x1x1x128xf32, #tpu.memory_space<vmem>>, vector<1x1x1x128xf32>
    %3 = vector.shape_cast %2 : vector<1x1x1x128xf32> to vector<1x128xf32>
    %4 = vector.broadcast %3 : vector<1x128xf32> to vector<8x128xf32>
    %5 = arith.mulf %1, %4 : vector<8x128xf32>
    %c0_7 = arith.constant 0 : index
    %c0_8 = arith.constant 0 : index
    %c0_9 = arith.constant 0 : index
    %c0_10 = arith.constant 0 : index
    %6 = vector.load %arg6[%c0_7, %c0_8, %c0_9, %c0_10] : memref<1x1x1x128xf32, #tpu.memory_space<vmem>>, vector<1x1x1x128xf32>
    %7 = vector.shape_cast %6 : vector<1x1x1x128xf32> to vector<1x128xf32>
    %8 = vector.broadcast %7 : vector<1x128xf32> to vector<8x128xf32>
    %9 = arith.addf %5, %8 : vector<8x128xf32>
    %c0_11 = arith.constant 0 : index
    %c0_12 = arith.constant 0 : index
    %c0_13 = arith.constant 0 : index
    %c0_14 = arith.constant 0 : index
    %10 = vector.load %arg7[%c0_11, %c0_12, %c0_13, %c0_14] : memref<1x1x8x128xf32, #tpu.memory_space<vmem>>, vector<1x1x8x128xf32>
    %11 = vector.shape_cast %10 : vector<1x1x8x128xf32> to vector<8x128xf32>
    %12 = vector.shape_cast %9 : vector<8x128xf32> to vector<1x1x8x128xf32>
    tpu.vector_store %arg7[%c0_11, %c0_12, %c0_13, %c0_14], %12 {strides = array<i32>} : memref<1x1x8x128xf32, #tpu.memory_space<vmem>>, vector<1x1x8x128xf32>,
    return
  }
  func.func @transform_0(%arg0: i32, %arg1: i32, %arg2: i32, %arg3: i32) -> (i32, i32, i32, i32) {
    %c0_i32 = arith.constant 0 : i32
    return %arg0, %arg1, %arg2, %arg3 : i32, i32, i32, i32
  }
  func.func @transform_1(%arg0: i32, %arg1: i32, %arg2: i32, %arg3: i32) -> (i32, i32, i32, i32) {
    %c0_i32 = arith.constant 0 : i32
    %c0_i32_0 = arith.constant 0 : i32
    return %arg0, %arg1, %c0_i32, %arg3 : i32, i32, i32, i32
  }
  func.func @transform_2(%arg0: i32, %arg1: i32, %arg2: i32, %arg3: i32) -> (i32, i32, i32, i32) {
    %c0_i32 = arith.constant 0 : i32
    %c0_i32_0 = arith.constant 0 : i32
    return %arg0, %arg1, %c0_i32, %arg3 : i32, i32, i32, i32
  }
  func.func @transform_3(%arg0: i32, %arg1: i32, %arg2: i32, %arg3: i32) -> (i32, i32, i32, i32) {
    %c0_i32 = arith.constant 0 : i32
    return %arg0, %arg1, %arg2, %arg3 : i32, i32, i32, i32
  }
}

module attributes {stable_mosaic.version = 11 : i64} {
  func.func @kernel(%arg0: i32, %arg1: i32, %arg2: i32, %arg3: i32, %arg4: i32, %arg5: memref<1x1x16x128xbf16, #tpu.memory_space<vmem>>, %arg6: memref<1x128x128xbf16, #tpu.memory_space<vmem>>, %arg7: memref<1x1x16x128xf32, #tpu.memory_space<vmem>>, %arg8: memref<1x1x1x128xf32, #tpu.memory_space<vmem>>, %arg9: memref<1x1x1x128xf32, #tpu.memory_space<vmem>>, %arg10: memref<16x128xf32, #tpu.memory_space<vmem>>) attributes {dimension_semantics = [#tpu.dimension_semantics<parallel>, #tpu.dimension_semantics<parallel>, #tpu.dimension_semantics<parallel>, #tpu.dimension_semantics<arbitrary>, #tpu.dimension_semantics<arbitrary>], iteration_bounds = array<i64: 8, 2, 1, 1, 1>, scalar_prefetch = 0 : i64, scratch_operands = 1 : i64, tpu.core_type = #tpu.core_type<tc>, window_params = [{transform_indices = @transform_0, window_bounds = array<i64: 1, 1, 16, 128>}, {transform_indices = @transform_1, window_bounds = array<i64: 1, 128, 128>}, {transform_indices = @transform_2, window_bounds = array<i64: 1, 1, 16, 128>}, {transform_indices = @transform_3, window_bounds = array<i64: 1, 1, 1, 128>}, {transform_indices = @transform_4, window_bounds = array<i64: 1, 1, 1, 128>}]} {
    %c0_i32 = arith.constant 0 : i32
    %0 = arith.cmpi eq, %arg4, %c0_i32 : i32
    %1 = arith.extui %0 : i1 to i32
    %c0_i32_0 = arith.constant 0 : i32
    %2 = arith.cmpi ne, %1, %c0_i32_0 : i32
    scf.if %2 {
      %cst_14 = arith.constant 0.000000e+00 : f32
      %18 = vector.broadcast %cst_14 : f32 to vector<16x128xf32>
      %c0_15 = arith.constant 0 : index
      %c0_16 = arith.constant 0 : index
      %19 = vector.load %arg10[%c0_15, %c0_16] : memref<16x128xf32, #tpu.memory_space<vmem>>, vector<16x128xf32>
      tpu.vector_store %arg10[%c0_15, %c0_16], %18 {strides = array<i32>} : memref<16x128xf32, #tpu.memory_space<vmem>>, vector<16x128xf32>,
    } else {
    }
    %c0 = arith.constant 0 : index
    %c0_1 = arith.constant 0 : index
    %c0_2 = arith.constant 0 : index
    %c0_3 = arith.constant 0 : index
    %3 = vector.load %arg5[%c0, %c0_1, %c0_2, %c0_3] : memref<1x1x16x128xbf16, #tpu.memory_space<vmem>>, vector<1x1x16x128xbf16>
    %4 = vector.shape_cast %3 : vector<1x1x16x128xbf16> to vector<16x128xbf16>
    %5 = arith.extf %4 : vector<16x128xbf16> to vector<16x128xf32>
    %cst = arith.constant 0.000000e+00 : f32
    %6 = vector.broadcast %cst : f32 to vector<16x128xf32>
    %7 = arith.maximumf %5, %6 : vector<16x128xf32>
    %8 = arith.truncf %7 : vector<16x128xf32> to vector<16x128xbf16>
    %c0_4 = arith.constant 0 : index
    %c0_5 = arith.constant 0 : index
    %9 = vector.load %arg10[%c0_4, %c0_5] : memref<16x128xf32, #tpu.memory_space<vmem>>, vector<16x128xf32>
    %c0_6 = arith.constant 0 : index
    %c0_7 = arith.constant 0 : index
    %c0_8 = arith.constant 0 : index
    %10 = vector.load %arg6[%c0_6, %c0_7, %c0_8] : memref<1x128x128xbf16, #tpu.memory_space<vmem>>, vector<1x128x128xbf16>
    %11 = vector.shape_cast %10 : vector<1x128x128xbf16> to vector<128x128xbf16>
    %cst_9 = arith.constant dense<0.000000e+00> : vector<16x128xf32>
    %12 = tpu.matmul %8, %11, %cst_9 {dimension_numbers = #tpu.dot_dimension_numbers<[1], [0], [0], [1], [0, 0, 1, 1], [], []>} : vector<16x128xbf16>, vector<128x128xbf16>, vector<16x128xf32> -> vector<16x128xf32>
    %13 = arith.addf %9, %12 : vector<16x128xf32>
    %c0_10 = arith.constant 0 : index
    %c0_11 = arith.constant 0 : index
    %14 = vector.load %arg10[%c0_10, %c0_11] : memref<16x128xf32, #tpu.memory_space<vmem>>, vector<16x128xf32>
    tpu.vector_store %arg10[%c0_10, %c0_11], %13 {strides = array<i32>} : memref<16x128xf32, #tpu.memory_space<vmem>>, vector<16x128xf32>,
    %c0_i32_12 = arith.constant 0 : i32
    %15 = arith.cmpi eq, %arg4, %c0_i32_12 : i32
    %16 = arith.extui %15 : i1 to i32
    %c0_i32_13 = arith.constant 0 : i32
    %17 = arith.cmpi ne, %16, %c0_i32_13 : i32
    scf.if %17 {
      %c0_14 = arith.constant 0 : index
      %c0_15 = arith.constant 0 : index
      %18 = vector.load %arg10[%c0_14, %c0_15] : memref<16x128xf32, #tpu.memory_space<vmem>>, vector<16x128xf32>
      %c0_16 = arith.constant 0 : index
      %c0_17 = arith.constant 0 : index
      %c0_18 = arith.constant 0 : index
      %c0_19 = arith.constant 0 : index
      %19 = vector.load %arg7[%c0_16, %c0_17, %c0_18, %c0_19] : memref<1x1x16x128xf32, #tpu.memory_space<vmem>>, vector<1x1x16x128xf32>
      %20 = vector.shape_cast %19 : vector<1x1x16x128xf32> to vector<16x128xf32>
      %21 = vector.shape_cast %18 : vector<16x128xf32> to vector<1x1x16x128xf32>
      tpu.vector_store %arg7[%c0_16, %c0_17, %c0_18, %c0_19], %21 {strides = array<i32>} : memref<1x1x16x128xf32, #tpu.memory_space<vmem>>, vector<1x1x16x128xf32>,
      %c0_i32_20 = arith.constant 0 : i32
      %22 = arith.cmpi eq, %arg3, %c0_i32_20 : i32
      %23 = arith.extui %22 : i1 to i32
      %c0_i32_21 = arith.constant 0 : i32
      %24 = arith.cmpi ne, %23, %c0_i32_21 : i32
      scf.if %24 {
        %cst_40 = arith.constant 0.000000e+00 : f32
        %42 = vector.broadcast %cst_40 : f32 to vector<1x128xf32>
        %c0_41 = arith.constant 0 : index
        %c0_42 = arith.constant 0 : index
        %c0_43 = arith.constant 0 : index
        %c0_44 = arith.constant 0 : index
        %43 = vector.load %arg8[%c0_41, %c0_42, %c0_43, %c0_44] : memref<1x1x1x128xf32, #tpu.memory_space<vmem>>, vector<1x1x1x128xf32>
        %44 = vector.shape_cast %43 : vector<1x1x1x128xf32> to vector<1x128xf32>
        %45 = vector.shape_cast %42 : vector<1x128xf32> to vector<1x1x1x128xf32>
        tpu.vector_store %arg8[%c0_41, %c0_42, %c0_43, %c0_44], %45 {strides = array<i32>} : memref<1x1x1x128xf32, #tpu.memory_space<vmem>>, vector<1x1x1x128xf32>,
        %cst_45 = arith.constant 0.000000e+00 : f32
        %46 = vector.broadcast %cst_45 : f32 to vector<1x128xf32>
        %c0_46 = arith.constant 0 : index
        %c0_47 = arith.constant 0 : index
        %c0_48 = arith.constant 0 : index
        %c0_49 = arith.constant 0 : index
        %47 = vector.load %arg9[%c0_46, %c0_47, %c0_48, %c0_49] : memref<1x1x1x128xf32, #tpu.memory_space<vmem>>, vector<1x1x1x128xf32>
        %48 = vector.shape_cast %47 : vector<1x1x1x128xf32> to vector<1x128xf32>
        %49 = vector.shape_cast %46 : vector<1x128xf32> to vector<1x1x1x128xf32>
        tpu.vector_store %arg9[%c0_46, %c0_47, %c0_48, %c0_49], %49 {strides = array<i32>} : memref<1x1x1x128xf32, #tpu.memory_space<vmem>>, vector<1x1x1x128xf32>,
      } else {
      }
      %c0_22 = arith.constant 0 : index
      %c0_23 = arith.constant 0 : index
      %c0_24 = arith.constant 0 : index
      %c0_25 = arith.constant 0 : index
      %25 = vector.load %arg8[%c0_22, %c0_23, %c0_24, %c0_25] : memref<1x1x1x128xf32, #tpu.memory_space<vmem>>, vector<1x1x1x128xf32>
      %26 = vector.shape_cast %25 : vector<1x1x1x128xf32> to vector<1x128xf32>
      %cst_26 = arith.constant dense<0.000000e+00> : vector<128xf32>
      %27 = vector.multi_reduction <add>, %18, %cst_26 [0] : vector<16x128xf32> to vector<128xf32>
      %28 = vector.shape_cast %27 : vector<128xf32> to vector<1x128xf32>
      %29 = arith.addf %26, %28 : vector<1x128xf32>
      %c0_27 = arith.constant 0 : index
      %c0_28 = arith.constant 0 : index
      %c0_29 = arith.constant 0 : index
      %c0_30 = arith.constant 0 : index
      %30 = vector.load %arg8[%c0_27, %c0_28, %c0_29, %c0_30] : memref<1x1x1x128xf32, #tpu.memory_space<vmem>>, vector<1x1x1x128xf32>
      %31 = vector.shape_cast %30 : vector<1x1x1x128xf32> to vector<1x128xf32>
      %32 = vector.shape_cast %29 : vector<1x128xf32> to vector<1x1x1x128xf32>
      tpu.vector_store %arg8[%c0_27, %c0_28, %c0_29, %c0_30], %32 {strides = array<i32>} : memref<1x1x1x128xf32, #tpu.memory_space<vmem>>, vector<1x1x1x128xf32>,
      %c0_31 = arith.constant 0 : index
      %c0_32 = arith.constant 0 : index
      %c0_33 = arith.constant 0 : index
      %c0_34 = arith.constant 0 : index
      %33 = vector.load %arg9[%c0_31, %c0_32, %c0_33, %c0_34] : memref<1x1x1x128xf32, #tpu.memory_space<vmem>>, vector<1x1x1x128xf32>
      %34 = vector.shape_cast %33 : vector<1x1x1x128xf32> to vector<1x128xf32>
      %35 = arith.mulf %18, %18 : vector<16x128xf32>
      %cst_35 = arith.constant dense<0.000000e+00> : vector<128xf32>
      %36 = vector.multi_reduction <add>, %35, %cst_35 [0] : vector<16x128xf32> to vector<128xf32>
      %37 = vector.shape_cast %36 : vector<128xf32> to vector<1x128xf32>
      %38 = arith.addf %34, %37 : vector<1x128xf32>
      %c0_36 = arith.constant 0 : index
      %c0_37 = arith.constant 0 : index
      %c0_38 = arith.constant 0 : index
      %c0_39 = arith.constant 0 : index
      %39 = vector.load %arg9[%c0_36, %c0_37, %c0_38, %c0_39] : memref<1x1x1x128xf32, #tpu.memory_space<vmem>>, vector<1x1x1x128xf32>
      %40 = vector.shape_cast %39 : vector<1x1x1x128xf32> to vector<1x128xf32>
      %41 = vector.shape_cast %38 : vector<1x128xf32> to vector<1x1x1x128xf32>
      tpu.vector_store %arg9[%c0_36, %c0_37, %c0_38, %c0_39], %41 {strides = array<i32>} : memref<1x1x1x128xf32, #tpu.memory_space<vmem>>, vector<1x1x1x128xf32>,
    } else {
    }
    return
  }
  func.func @transform_0(%arg0: i32, %arg1: i32, %arg2: i32, %arg3: i32, %arg4: i32) -> (i32, i32, i32, i32) {
    %c0_i32 = arith.constant 0 : i32
    return %arg0, %arg1, %arg3, %arg4 : i32, i32, i32, i32
  }
  func.func @transform_1(%arg0: i32, %arg1: i32, %arg2: i32, %arg3: i32, %arg4: i32) -> (i32, i32, i32) {
    %c0_i32 = arith.constant 0 : i32
    return %arg0, %arg4, %arg2 : i32, i32, i32
  }
  func.func @transform_2(%arg0: i32, %arg1: i32, %arg2: i32, %arg3: i32, %arg4: i32) -> (i32, i32, i32, i32) {
    %c0_i32 = arith.constant 0 : i32
    return %arg0, %arg1, %arg3, %arg2 : i32, i32, i32, i32
  }
  func.func @transform_3(%arg0: i32, %arg1: i32, %arg2: i32, %arg3: i32, %arg4: i32) -> (i32, i32, i32, i32) {
    %c0_i32 = arith.constant 0 : i32
    %c0_i32_0 = arith.constant 0 : i32
    return %arg0, %arg1, %c0_i32, %arg2 : i32, i32, i32, i32
  }
  func.func @transform_4(%arg0: i32, %arg1: i32, %arg2: i32, %arg3: i32, %arg4: i32) -> (i32, i32, i32, i32) {
    %c0_i32 = arith.constant 0 : i32
    %c0_i32_0 = arith.constant 0 : i32
    return %arg0, %arg1, %c0_i32, %arg2 : i32, i32, i32, i32
  }
}

module attributes {stable_mosaic.version = 11 : i64} {
  func.func @_norm_apply_kernel(%arg0: i32, %arg1: i32, %arg2: i32, %arg3: i32, %arg4: memref<1x1x16x128xf32, #tpu.memory_space<vmem>>, %arg5: memref<1x1x1x128xf32, #tpu.memory_space<vmem>>, %arg6: memref<1x1x1x128xf32, #tpu.memory_space<vmem>>, %arg7: memref<1x1x16x128xf32, #tpu.memory_space<vmem>>) attributes {dimension_semantics = [#tpu.dimension_semantics<parallel>, #tpu.dimension_semantics<parallel>, #tpu.dimension_semantics<parallel>, #tpu.dimension_semantics<parallel>], iteration_bounds = array<i64: 8, 2, 1, 1>, scalar_prefetch = 0 : i64, scratch_operands = 0 : i64, tpu.core_type = #tpu.core_type<tc>, window_params = [{transform_indices = @transform_0, window_bounds = array<i64: 1, 1, 16, 128>}, {transform_indices = @transform_1, window_bounds = array<i64: 1, 1, 1, 128>}, {transform_indices = @transform_2, window_bounds = array<i64: 1, 1, 1, 128>}, {transform_indices = @transform_3, window_bounds = array<i64: 1, 1, 16, 128>}]} {
    %c0 = arith.constant 0 : index
    %c0_0 = arith.constant 0 : index
    %c0_1 = arith.constant 0 : index
    %c0_2 = arith.constant 0 : index
    %0 = vector.load %arg4[%c0, %c0_0, %c0_1, %c0_2] : memref<1x1x16x128xf32, #tpu.memory_space<vmem>>, vector<1x1x16x128xf32>
    %1 = vector.shape_cast %0 : vector<1x1x16x128xf32> to vector<16x128xf32>
    %c0_3 = arith.constant 0 : index
    %c0_4 = arith.constant 0 : index
    %c0_5 = arith.constant 0 : index
    %c0_6 = arith.constant 0 : index
    %2 = vector.load %arg5[%c0_3, %c0_4, %c0_5, %c0_6] : memref<1x1x1x128xf32, #tpu.memory_space<vmem>>, vector<1x1x1x128xf32>
    %3 = vector.shape_cast %2 : vector<1x1x1x128xf32> to vector<1x128xf32>
    %4 = vector.broadcast %3 : vector<1x128xf32> to vector<16x128xf32>
    %5 = arith.mulf %1, %4 : vector<16x128xf32>
    %c0_7 = arith.constant 0 : index
    %c0_8 = arith.constant 0 : index
    %c0_9 = arith.constant 0 : index
    %c0_10 = arith.constant 0 : index
    %6 = vector.load %arg6[%c0_7, %c0_8, %c0_9, %c0_10] : memref<1x1x1x128xf32, #tpu.memory_space<vmem>>, vector<1x1x1x128xf32>
    %7 = vector.shape_cast %6 : vector<1x1x1x128xf32> to vector<1x128xf32>
    %8 = vector.broadcast %7 : vector<1x128xf32> to vector<16x128xf32>
    %9 = arith.addf %5, %8 : vector<16x128xf32>
    %c0_11 = arith.constant 0 : index
    %c0_12 = arith.constant 0 : index
    %c0_13 = arith.constant 0 : index
    %c0_14 = arith.constant 0 : index
    %10 = vector.load %arg7[%c0_11, %c0_12, %c0_13, %c0_14] : memref<1x1x16x128xf32, #tpu.memory_space<vmem>>, vector<1x1x16x128xf32>
    %11 = vector.shape_cast %10 : vector<1x1x16x128xf32> to vector<16x128xf32>
    %12 = vector.shape_cast %9 : vector<16x128xf32> to vector<1x1x16x128xf32>
    tpu.vector_store %arg7[%c0_11, %c0_12, %c0_13, %c0_14], %12 {strides = array<i32>} : memref<1x1x16x128xf32, #tpu.memory_space<vmem>>, vector<1x1x16x128xf32>,
    return
  }
  func.func @transform_0(%arg0: i32, %arg1: i32, %arg2: i32, %arg3: i32) -> (i32, i32, i32, i32) {
    %c0_i32 = arith.constant 0 : i32
    return %arg0, %arg1, %arg2, %arg3 : i32, i32, i32, i32
  }
  func.func @transform_1(%arg0: i32, %arg1: i32, %arg2: i32, %arg3: i32) -> (i32, i32, i32, i32) {
    %c0_i32 = arith.constant 0 : i32
    %c0_i32_0 = arith.constant 0 : i32
    return %arg0, %arg1, %c0_i32, %arg3 : i32, i32, i32, i32
  }
  func.func @transform_2(%arg0: i32, %arg1: i32, %arg2: i32, %arg3: i32) -> (i32, i32, i32, i32) {
    %c0_i32 = arith.constant 0 : i32
    %c0_i32_0 = arith.constant 0 : i32
    return %arg0, %arg1, %c0_i32, %arg3 : i32, i32, i32, i32
  }
  func.func @transform_3(%arg0: i32, %arg1: i32, %arg2: i32, %arg3: i32) -> (i32, i32, i32, i32) {
    %c0_i32 = arith.constant 0 : i32
    return %arg0, %arg1, %arg2, %arg3 : i32, i32, i32, i32
  }
}

module attributes {stable_mosaic.version = 11 : i64} {
  func.func @kernel(%arg0: i32, %arg1: i32, %arg2: i32, %arg3: i32, %arg4: i32, %arg5: memref<1x1x64x128xbf16, #tpu.memory_space<vmem>>, %arg6: memref<1x128x128xbf16, #tpu.memory_space<vmem>>, %arg7: memref<1x1x128xf32, #tpu.memory_space<vmem>>, %arg8: memref<1x1x64x128xf32, #tpu.memory_space<vmem>>, %arg9: memref<64x128xf32, #tpu.memory_space<vmem>>) attributes {dimension_semantics = [#tpu.dimension_semantics<parallel>, #tpu.dimension_semantics<parallel>, #tpu.dimension_semantics<parallel>, #tpu.dimension_semantics<parallel>, #tpu.dimension_semantics<arbitrary>], iteration_bounds = array<i64: 8, 2, 1, 1, 1>, scalar_prefetch = 0 : i64, scratch_operands = 1 : i64, tpu.core_type = #tpu.core_type<tc>, window_params = [{transform_indices = @transform_0, window_bounds = array<i64: 1, 1, 64, 128>}, {transform_indices = @transform_1, window_bounds = array<i64: 1, 128, 128>}, {transform_indices = @transform_2, window_bounds = array<i64: 1, 1, 128>}, {transform_indices = @transform_3, window_bounds = array<i64: 1, 1, 64, 128>}]} {
    %c0_i32 = arith.constant 0 : i32
    %0 = arith.cmpi eq, %arg4, %c0_i32 : i32
    %1 = arith.extui %0 : i1 to i32
    %c0_i32_0 = arith.constant 0 : i32
    %2 = arith.cmpi ne, %1, %c0_i32_0 : i32
    scf.if %2 {
      %cst_14 = arith.constant 0.000000e+00 : f32
      %18 = vector.broadcast %cst_14 : f32 to vector<64x128xf32>
      %c0_15 = arith.constant 0 : index
      %c0_16 = arith.constant 0 : index
      %19 = vector.load %arg9[%c0_15, %c0_16] : memref<64x128xf32, #tpu.memory_space<vmem>>, vector<64x128xf32>
      tpu.vector_store %arg9[%c0_15, %c0_16], %18 {strides = array<i32>} : memref<64x128xf32, #tpu.memory_space<vmem>>, vector<64x128xf32>,
    } else {
    }
    %c0 = arith.constant 0 : index
    %c0_1 = arith.constant 0 : index
    %c0_2 = arith.constant 0 : index
    %c0_3 = arith.constant 0 : index
    %3 = vector.load %arg5[%c0, %c0_1, %c0_2, %c0_3] : memref<1x1x64x128xbf16, #tpu.memory_space<vmem>>, vector<1x1x64x128xbf16>
    %4 = vector.shape_cast %3 : vector<1x1x64x128xbf16> to vector<64x128xbf16>
    %5 = arith.extf %4 : vector<64x128xbf16> to vector<64x128xf32>
    %cst = arith.constant 0.000000e+00 : f32
    %6 = vector.broadcast %cst : f32 to vector<64x128xf32>
    %7 = arith.maximumf %5, %6 : vector<64x128xf32>
    %8 = arith.truncf %7 : vector<64x128xf32> to vector<64x128xbf16>
    %c0_4 = arith.constant 0 : index
    %c0_5 = arith.constant 0 : index
    %9 = vector.load %arg9[%c0_4, %c0_5] : memref<64x128xf32, #tpu.memory_space<vmem>>, vector<64x128xf32>
    %c0_6 = arith.constant 0 : index
    %c0_7 = arith.constant 0 : index
    %c0_8 = arith.constant 0 : index
    %10 = vector.load %arg6[%c0_6, %c0_7, %c0_8] : memref<1x128x128xbf16, #tpu.memory_space<vmem>>, vector<1x128x128xbf16>
    %11 = vector.shape_cast %10 : vector<1x128x128xbf16> to vector<128x128xbf16>
    %cst_9 = arith.constant dense<0.000000e+00> : vector<64x128xf32>
    %12 = tpu.matmul %8, %11, %cst_9 {dimension_numbers = #tpu.dot_dimension_numbers<[1], [0], [0], [1], [0, 0, 1, 1], [], []>} : vector<64x128xbf16>, vector<128x128xbf16>, vector<64x128xf32> -> vector<64x128xf32>
    %13 = arith.addf %9, %12 : vector<64x128xf32>
    %c0_10 = arith.constant 0 : index
    %c0_11 = arith.constant 0 : index
    %14 = vector.load %arg9[%c0_10, %c0_11] : memref<64x128xf32, #tpu.memory_space<vmem>>, vector<64x128xf32>
    tpu.vector_store %arg9[%c0_10, %c0_11], %13 {strides = array<i32>} : memref<64x128xf32, #tpu.memory_space<vmem>>, vector<64x128xf32>,
    %c0_i32_12 = arith.constant 0 : i32
    %15 = arith.cmpi eq, %arg4, %c0_i32_12 : i32
    %16 = arith.extui %15 : i1 to i32
    %c0_i32_13 = arith.constant 0 : i32
    %17 = arith.cmpi ne, %16, %c0_i32_13 : i32
    scf.if %17 {
      %c0_14 = arith.constant 0 : index
      %c0_15 = arith.constant 0 : index
      %18 = vector.load %arg9[%c0_14, %c0_15] : memref<64x128xf32, #tpu.memory_space<vmem>>, vector<64x128xf32>
      %c0_16 = arith.constant 0 : index
      %c0_17 = arith.constant 0 : index
      %c0_18 = arith.constant 0 : index
      %19 = vector.load %arg7[%c0_16, %c0_17, %c0_18] : memref<1x1x128xf32, #tpu.memory_space<vmem>>, vector<1x1x128xf32>
      %20 = vector.shape_cast %19 : vector<1x1x128xf32> to vector<1x128xf32>
      %21 = vector.broadcast %20 : vector<1x128xf32> to vector<64x128xf32>
      %22 = arith.addf %18, %21 : vector<64x128xf32>
      %23 = math.tanh %22 : vector<64x128xf32>
      %c0_19 = arith.constant 0 : index
      %c0_20 = arith.constant 0 : index
      %c0_21 = arith.constant 0 : index
      %c0_22 = arith.constant 0 : index
      %24 = vector.load %arg8[%c0_19, %c0_20, %c0_21, %c0_22] : memref<1x1x64x128xf32, #tpu.memory_space<vmem>>, vector<1x1x64x128xf32>
      %25 = vector.shape_cast %24 : vector<1x1x64x128xf32> to vector<64x128xf32>
      %26 = vector.shape_cast %23 : vector<64x128xf32> to vector<1x1x64x128xf32>
      tpu.vector_store %arg8[%c0_19, %c0_20, %c0_21, %c0_22], %26 {strides = array<i32>} : memref<1x1x64x128xf32, #tpu.memory_space<vmem>>, vector<1x1x64x128xf32>,
    } else {
    }
    return
  }
  func.func @transform_0(%arg0: i32, %arg1: i32, %arg2: i32, %arg3: i32, %arg4: i32) -> (i32, i32, i32, i32) {
    %c0_i32 = arith.constant 0 : i32
    return %arg0, %arg1, %arg3, %arg4 : i32, i32, i32, i32
  }
  func.func @transform_1(%arg0: i32, %arg1: i32, %arg2: i32, %arg3: i32, %arg4: i32) -> (i32, i32, i32) {
    %c0_i32 = arith.constant 0 : i32
    return %arg0, %arg4, %arg2 : i32, i32, i32
  }
  func.func @transform_2(%arg0: i32, %arg1: i32, %arg2: i32, %arg3: i32, %arg4: i32) -> (i32, i32, i32) {
    %c0_i32 = arith.constant 0 : i32
    %c0_i32_0 = arith.constant 0 : i32
    return %arg0, %c0_i32, %arg2 : i32, i32, i32
  }
  func.func @transform_3(%arg0: i32, %arg1: i32, %arg2: i32, %arg3: i32, %arg4: i32) -> (i32, i32, i32, i32) {
    %c0_i32 = arith.constant 0 : i32
    return %arg0, %arg1, %arg3, %arg2 : i32, i32, i32, i32
  }
}

</mosaic_0001>

<bundles_post_ra>
// kernel: cyclegan_forward.26
= control target key start
LH: loop header
LB: loop body
LE: loop exit
PB: predicated region body
PF: predicated region fallthrough
CT: control target
= control target key end

     0   :  { %s906_s12 = smov 0   ;;  %s908_s13 = smov 0   ;;  %s987_s0 = inlined_call_operand.vmem [shape: bf16[2,2,64,128], index: 0, kind: input, shape index: {}]   ;;  %s988_s1 = inlined_call_operand.vmem [shape: bf16[2,128,128], index: 1, kind: input, shape index: {}]   ;;  %s989_s2 = inlined_call_operand.vmem [shape: f32[2,1,128], index: 2, kind: input, shape index: {}]   ;;  %s990_s3 = inlined_call_operand.vmem [shape: f32[2,2,64,128], index: 3, kind: output, shape index: {}]  }
   0x1   :  { %s910_s14 = smov 0   ;;  %s912_s15 = smov 0  }
   0x2   :  { %s914_s16 = smov 0  }
   0x3 LB: > { %s42_s17 = sadd.s32 1, %s876_s14  ;;  %s46_s18 = sadd.s32 1, %s880_s15  ;;  %s884_s16 = sphi %s914_s16, %s13_s16   ;;  %s880_s15 = sphi %s912_s15, %s994_s15   ;;  %s876_s14 = sphi %s910_s14, %s993_s14   ;;  %s872_s13 = sphi %s908_s13, %s992_s13   ;;  %s868_s12 = sphi %s906_s12, %s991_s12  }
   0x4   : > { %p44_p0 = scmp.ge.s32.totalorder %s42_s17, 2  ;;  %p709_p1 = scmp.ge.s32.totalorder %s884_s16, 1 }
   0x5   : > { %p229_p2 = scmp.lt.s32.totalorder %s884_s16, 5 }
   0x6   : > { %s996_s17 = smov (%p44_p0, %s42_s17), 0  ;;  %s998_s18 = smov (!%p44_p0, %s46_s18), %s880_s15 }
   0x7   : > { %p230_p3 = pnand %p709_p1, %p229_p2  ;;  %p48_p4 = scmp.ge.s32.totalorder %s998_s18, 2 }
   0x8   : > { %p294_p5 = scmp.lt.s32.totalorder (!%p230_p3), %s872_s13, 1  ;;  %p296_p6 = scmp.lt.s32.totalorder (!%p230_p3), %s868_s12, 1 }
   0x9   : > { %s1000_s18 = smov (%p48_p4, %s998_s18), 0  ;;  %233 = sbr.rel (%p230_p3) target bundleno = 194 (0xc2), region = 32 }
   0xe   : > { %s1002_s13 = smov (!%p294_p5, %s872_s13), 1  ;;  %s1004_s12 = smov (!%p296_p6, %s868_s12), 1 }
   0xf   : > { %s768_s19 = sshll.u32 %s1002_s13, 6  ;;  %s328_s25 = scalar_lea.vmem %s989_s2, %s1002_s13 }
  0x10   : > { %s944_s22 = scalar_lea.vmem %s988_s1, %s768_s19  ;;  %s710_s26 = sshll.u32 %s1004_s12, 3  ;;  %v845_v12 = vld [vmem:[%s328_s25] ss:$0 sm:$0xff] }
  0x11   : > { %v780_v0 = vld [vmem:[%s944_s22 + $0x38] sm:$0xff]  ;;  %v779_v1 = vld [vmem:[%s944_s22 + $0x30] sm:$0xff]  ;;  %v778_v2 = vld [vmem:[%s944_s22 + $0x28] sm:$0xff]  ;;  %s711_s27 = sshll.u32 %s1002_s13, 4 }
  0x12   : > { %462 = vmatpush.bf16.msra.mxu0 %v780_v0  ;;  %781 = vmatpush.bf16.msra.mxu1 %v780_v0  ;;  %v777_v3 = vld [vmem:[%s944_s22 + $0x20] sm:$0xff]  ;;  %v776_v4 = vld [vmem:[%s944_s22 + $0x18] sm:$0xff]  ;;  %v775_v5 = vld [vmem:[%s944_s22 + $0x10] sm:$0xff]  ;;  %s306_s28 = sadd.s32 %s711_s27, %s710_s26 }
  0x13   : > { %782 = vmatpush.bf16.msra.mxu2 %v780_v0  ;;  %783 = vmatpush.bf16.msra.mxu3 %v780_v0  ;;  %v774_v6 = vld [vmem:[%s944_s22 + $0x8] sm:$0xff]  ;;  %s712_s29 = sshll.u32 %s306_s28, 2  ;;  %v773_v7 = vld [vmem:[%s944_s22] sm:$0xff]  ;;  %s717_s6 = sshll.u32 %s306_s28, 3 }
  0x14   : > { %s308_s5 = scalar_lea.vmem %s987_s0, %s712_s29  ;;  %s344_s11 = scalar_lea.vmem %s990_s3, %s717_s6 }
  0x15   : > { %v769_v8 = vld [vmem:[%s308_s5] sm:$0xff]  ;;  %v770_v9 = vld [vmem:[%s308_s5 + $0x8] sm:$0xff]  ;;  %v771_v10 = vld [vmem:[%s308_s5 + $0x10] sm:$0xff] }
  0x16   : > { %463 = vmatpush.bf16.msra.mxu0 %v779_v1  ;;  %784 = vmatpush.bf16.msra.mxu1 %v779_v1  ;;  %v772_v11 = vld [vmem:[%s308_s5 + $0x18] sm:$0xff] }
  0x17   : > { %785 = vmatpush.bf16.msra.mxu2 %v779_v1  ;;  %786 = vmatpush.bf16.msra.mxu3 %v779_v1 }
  0x1a   : > { %464 = vmatpush.bf16.msra.mxu0 %v778_v2  ;;  %787 = vmatpush.bf16.msra.mxu1 %v778_v2 }
  0x1b   : > { %788 = vmatpush.bf16.msra.mxu2 %v778_v2  ;;  %789 = vmatpush.bf16.msra.mxu3 %v778_v2 }
  0x1e   : > { %465 = vmatpush.bf16.msra.mxu0 %v777_v3  ;;  %790 = vmatpush.bf16.msra.mxu1 %v777_v3 }
  0x1f   : > { %791 = vmatpush.bf16.msra.mxu2 %v777_v3  ;;  %792 = vmatpush.bf16.msra.mxu3 %v777_v3 }
  0x22   : > { %466 = vmatpush.bf16.msra.mxu0 %v776_v4  ;;  %793 = vmatpush.bf16.msra.mxu1 %v776_v4 }
  0x23   : > { %794 = vmatpush.bf16.msra.mxu2 %v776_v4  ;;  %795 = vmatpush.bf16.msra.mxu3 %v776_v4 }
  0x26   : > { %467 = vmatpush.bf16.msra.mxu0 %v775_v5  ;;  %796 = vmatpush.bf16.msra.mxu1 %v775_v5 }
  0x27   : > { %797 = vmatpush.bf16.msra.mxu2 %v775_v5  ;;  %798 = vmatpush.bf16.msra.mxu3 %v775_v5 }
  0x2a   : > { %468 = vmatpush.bf16.msra.mxu0 %v774_v6  ;;  %799 = vmatpush.bf16.msra.mxu1 %v774_v6 }
  0x2b   : > { %800 = vmatpush.bf16.msra.mxu2 %v774_v6  ;;  %801 = vmatpush.bf16.msra.mxu3 %v774_v6 }
  0x2e   : > { %469 = vmatpush.bf16.msra.mxu0 %v773_v7  ;;  %802 = vmatpush.bf16.msra.mxu1 %v773_v7 }
  0x2f   : > { %803 = vmatpush.bf16.msra.mxu2 %v773_v7  ;;  %804 = vmatpush.bf16.msra.mxu3 %v773_v7 }
  0x31   : > { %470 = vmatmul.bf16.vlgmr.msra.gmra.mxu0 %v769_v8  ;;  %475 = vmatmul.bf16.vlgmr.msra.gmra.mxu1 %v770_v9 }
  0x32   : > { %480 = vmatmul.bf16.vlgmr.msra.gmra.mxu2 %v771_v10  ;;  %485 = vmatmul.bf16.vlgmr.msra.gmra.mxu3 %v772_v11 }
  0xae   : > { %v471_v13 = vpop.f32.mrf.mxu0  ;;  %v476_v14 = vpop.f32.mrf.mxu1 }
  0xaf   : > { %v522_v15 = vadd.f32 %v845_v12, %v471_v13  ;;  %v524_v16 = vadd.f32 %v845_v12, %v476_v14 }
  0xb1   : > { %530 = vst [vmem:[%s344_s11] sm:$0xff] %v522_v15 }
  0xb2   : > { %532 = vst [vmem:[%s344_s11 + $0x10] sm:$0xff] %v524_v16 }
  0xb5   : > { %v481_v17 = vpop.f32.mrf.mxu2  ;;  %v486_v18 = vpop.f32.mrf.mxu3 }
  0xb6   : > { %v526_v19 = vadd.f32 %v845_v12, %v481_v17  ;;  %v528_v20 = vadd.f32 %v845_v12, %v486_v18  ;;  %v473_v21 = vpop.f32.mrf.mxu0  ;;  %v478_v22 = vpop.f32.mrf.mxu1 }
  0xb7   : > { %v523_v23 = vadd.f32 %v845_v12, %v473_v21  ;;  %v525_v24 = vadd.f32 %v845_v12, %v478_v22 }
  0xb8   : > { %534 = vst [vmem:[%s344_s11 + $0x20] sm:$0xff] %v526_v19 }
  0xb9   : > { %536 = vst [vmem:[%s344_s11 + $0x30] sm:$0xff] %v528_v20 }
  0xba   : > { %531 = vst [vmem:[%s344_s11 + $0x8] sm:$0xff] %v523_v23 }
  0xbb   : > { %533 = vst [vmem:[%s344_s11 + $0x18] sm:$0xff] %v525_v24 }
  0xbd   : > { %v483_v25 = vpop.f32.mrf.mxu2  ;;  %v488_v26 = vpop.f32.mrf.mxu3 }
  0xbe   : > { %v527_v27 = vadd.f32 %v845_v12, %v483_v25  ;;  %v529_v28 = vadd.f32 %v845_v12, %v488_v26 }
  0xc0   : > { %535 = vst [vmem:[%s344_s11 + $0x28] sm:$0xff] %v527_v27 }
  0xc1   : > { %537 = vst [vmem:[%s344_s11 + $0x38] sm:$0xff] %v529_v28 }
  0xc2 PF: > { %s13_s16 = sadd.s32 1, %s884_s16   ;;  %s991_s12 = smov %s876_s14 }
  0xc3   : > { %p10_p7 = scmp.ge.s32.totalorder %s13_s16, 6   ;;  %s992_s13 = smov %s880_s15 }
  0xc4   : > { %s993_s14 = smov %s996_s17  ;;  %s994_s15 = smov %s1000_s18 }
  0xc5   :  { %12 = sbr.rel (!%p10_p7) target bundleno = 3 (0x3), region = 76 }

// kernel: cyclegan_forward.28
= control target key start
LH: loop header
LB: loop body
LE: loop exit
PB: predicated region body
PF: predicated region fallthrough
CT: control target
= control target key end

     0   :  { %s645_s12 = smov 0   ;;  %s647_s13 = smov 0   ;;  %s702_s0 = inlined_call_operand.vmem [shape: f32[2,2,16,128], index: 0, kind: input, shape index: {}]   ;;  %s703_s1 = inlined_call_operand.vmem [shape: f32[2,2,1,128], index: 1, kind: input, shape index: {}]   ;;  %s704_s2 = inlined_call_operand.vmem [shape: f32[2,2,1,128], index: 2, kind: input, shape index: {}]   ;;  %s705_s3 = inlined_call_operand.vmem [shape: f32[2,2,16,128], index: 3, kind: output, shape index: {}]  }
   0x1   :  { %s649_s14 = smov 0   ;;  %s651_s15 = smov 0  }
   0x2   :  { %s653_s16 = smov 0  }
   0x3 LB: > { %s35_s17 = sadd.s32 1, %s615_s14  ;;  %s39_s18 = sadd.s32 1, %s619_s15  ;;  %s623_s16 = sphi %s653_s16, %s13_s16   ;;  %s619_s15 = sphi %s651_s15, %s709_s15   ;;  %s615_s14 = sphi %s649_s14, %s708_s14   ;;  %s611_s13 = sphi %s647_s13, %s707_s13   ;;  %s607_s12 = sphi %s645_s12, %s706_s12  }
   0x4   : > { %p37_p0 = scmp.ge.s32.totalorder %s35_s17, 2  ;;  %p532_p1 = scmp.ge.s32.totalorder %s623_s16, 1 }
   0x5   : > { %p225_p2 = scmp.lt.s32.totalorder %s623_s16, 5 }
   0x6   : > { %s711_s17 = smov (%p37_p0, %s35_s17), 0  ;;  %s713_s18 = smov (!%p37_p0, %s39_s18), %s619_s15 }
   0x7   : > { %p226_p3 = pnand %p532_p1, %p225_p2  ;;  %p41_p4 = scmp.ge.s32.totalorder %s713_s18, 2 }
   0x8   : > { %p292_p5 = scmp.lt.s32.totalorder (!%p226_p3), %s611_s13, 1  ;;  %p294_p6 = scmp.lt.s32.totalorder (!%p226_p3), %s607_s12, 1 }
   0x9   : > { %s715_s18 = smov (%p41_p4, %s713_s18), 0  ;;  %229 = sbr.rel (%p226_p3) target bundleno = 27 (0x1b), region = 32 }
   0xe   : > { %s717_s13 = smov (!%p292_p5, %s611_s13), 1  ;;  %s719_s12 = smov (!%p294_p6, %s607_s12), 1 }
   0xf   : > { %s534_s19 = sshll.u32 %s717_s13, 2  ;;  %s536_s20 = sshll.u32 %s717_s13, 1 }
  0x10   : > { %s533_s21 = sshll.u32 %s719_s12, 1  ;;  %s316_s22 = sadd.s32 %s536_s20, %s719_s12 }
  0x11   : > { %s304_s23 = sadd.s32 %s534_s19, %s533_s21  ;;  %s317_s26 = scalar_lea.vmem %s703_s1, %s316_s22 }
  0x12   : > { %s535_s27 = sshll.u32 %s304_s23, 3  ;;  %s327_s30 = scalar_lea.vmem %s704_s2, %s316_s22  ;;  %v583_v0 = vld [vmem:[%s317_s26] ss:$0 sm:$0xff] }
  0x13   : > { %s306_s6 = scalar_lea.vmem %s702_s0, %s535_s27  ;;  %v584_v1 = vld [vmem:[%s327_s30] ss:$0 sm:$0xff]  ;;  %s343_s9 = scalar_lea.vmem %s705_s3, %s535_s27 }
  0x14   : > { %v345_v2 = vld [vmem:[%s306_s6] sm:$0xff]  ;;  %v346_v3 = vld [vmem:[%s306_s6 + $0x8] sm:$0xff] }
  0x15   : > { %v351_v4 = vmul.f32 %v583_v0, %v345_v2  ;;  %v352_v5 = vmul.f32 %v583_v0, %v346_v3 }
  0x17   : > { %v357_v6 = vadd.f32 %v584_v1, %v351_v4  ;;  %v358_v7 = vadd.f32 %v584_v1, %v352_v5 }
  0x19   : > { %359 = vst [vmem:[%s343_s9] sm:$0xff] %v357_v6 }
  0x1a   : > { %360 = vst [vmem:[%s343_s9 + $0x8] sm:$0xff] %v358_v7 }
  0x1b PF: > { %s13_s16 = sadd.s32 1, %s623_s16   ;;  %s706_s12 = smov %s615_s14 }
  0x1c   : > { %p10_p7 = scmp.ge.s32.totalorder %s13_s16, 6   ;;  %s707_s13 = smov %s619_s15 }
  0x1d   : > { %s708_s14 = smov %s711_s17  ;;  %s709_s15 = smov %s715_s18 }
  0x1e   :  { %12 = sbr.rel (!%p10_p7) target bundleno = 3 (0x3), region = 68 }

// kernel: cyclegan_forward.27
= control target key start
LH: loop header
LB: loop body
LE: loop exit
PB: predicated region body
PF: predicated region fallthrough
CT: control target
= control target key end

     0   :  { %s963_s15 = smov 0   ;;  %s965_s16 = smov 0   ;;  %s1041_s0 = inlined_call_operand.vmem [shape: bf16[2,2,16,128], index: 0, kind: input, shape index: {}]   ;;  %s1042_s1 = inlined_call_operand.vmem [shape: bf16[2,128,128], index: 1, kind: input, shape index: {}]   ;;  %s1043_s2 = inlined_call_operand.vmem [shape: f32[2,2,16,128], index: 2, kind: output, shape index: {0}]   ;;  %s1044_s3 = inlined_call_operand.vmem [shape: f32[2,2,1,128], index: 3, kind: output, shape index: {1}]   ;;  %s1045_s4 = inlined_call_operand.vmem [shape: f32[2,2,1,128], index: 4, kind: output, shape index: {2}]  }
   0x1   :  { %s967_s17 = smov 0   ;;  %s969_s18 = smov 0  }
   0x2   :  { %s971_s19 = smov 0  }
   0x3 LB: > { %s44_s20 = sadd.s32 1, %s927_s17  ;;  %s48_s21 = sadd.s32 1, %s931_s18  ;;  %s935_s19 = sphi %s971_s19, %s15_s19   ;;  %s931_s18 = sphi %s969_s18, %s1049_s18   ;;  %s927_s17 = sphi %s967_s17, %s1048_s17   ;;  %s923_s16 = sphi %s965_s16, %s1047_s16   ;;  %s919_s15 = sphi %s963_s15, %s1046_s15  }
   0x4   : > { %p46_p0 = scmp.ge.s32.totalorder %s44_s20, 2  ;;  %p798_p1 = scmp.ge.s32.totalorder %s935_s19, 1 }
   0x5   : > { %p254_p2 = scmp.lt.s32.totalorder %s935_s19, 5 }
   0x6   : > { %s1051_s20 = smov (%p46_p0, %s44_s20), 0  ;;  %s1053_s21 = smov (!%p46_p0, %s48_s21), %s931_s18 }
   0x7   : > { %p255_p3 = pnand %p798_p1, %p254_p2  ;;  %p50_p4 = scmp.ge.s32.totalorder %s1053_s21, 2 }
   0x8   : > { %p335_p5 = scmp.lt.s32.totalorder (!%p255_p3), %s923_s16, 1  ;;  %p337_p6 = scmp.lt.s32.totalorder (!%p255_p3), %s919_s15, 1 }
   0x9   : > { %s1055_s21 = smov (%p50_p4, %s1053_s21), 0  ;;  %258 = sbr.rel (%p255_p3) target bundleno = 202 (0xca), region = 28 }
   0xe   : > { %s1057_s16 = smov (!%p335_p5, %s923_s16), 1  ;;  %s1059_s15 = smov (!%p337_p6, %s919_s15), 1  ;;  %v937_v16 = vmov 0.0  }
   0xf   : > { %s843_s22 = sshll.u32 %s1057_s16, 6  ;;  %s799_s26 = sshll.u32 %s1059_s15, 1 }
  0x10   : > { %s362_s25 = scalar_lea.vmem %s1042_s1, %s843_s22  ;;  %s800_s27 = sshll.u32 %s1057_s16, 2 }
  0x11   : > { %v851_v0 = vld [vmem:[%s362_s25 + $0x38] sm:$0xff]  ;;  %v850_v1 = vld [vmem:[%s362_s25 + $0x30] sm:$0xff]  ;;  %v849_v2 = vld [vmem:[%s362_s25 + $0x28] sm:$0xff]  ;;  %s1003_s28 = sadd.s32 %s800_s27, %s799_s26  ;;  %s807_s7 = sshll.u32 %s1057_s16, 1 }
  0x12   : > { %484 = vmatpush.bf16.msra.mxu0 %v851_v0  ;;  %s801_s29 = sshll.u32 %s1003_s28, 2  ;;  %v848_v3 = vld [vmem:[%s362_s25 + $0x20] sm:$0xff]  ;;  %v847_v4 = vld [vmem:[%s362_s25 + $0x18] sm:$0xff]  ;;  %v846_v6 = vld [vmem:[%s362_s25 + $0x10] sm:$0xff]  ;;  %s389_s8 = sadd.s32 %s807_s7, %s1059_s15 }
  0x13   : > { %s349_s6 = scalar_lea.vmem %s1041_s0, %s801_s29  ;;  %v845_v9 = vld [vmem:[%s362_s25 + $0x8] sm:$0xff]  ;;  %v844_v12 = vld [vmem:[%s362_s25] sm:$0xff]  ;;  %s390_s11 = scalar_lea.vmem %s1044_s3, %s389_s8 }
  0x14   : > { %v853_v5 = vld [vmem:[%s349_s6] sm:$0xff]   ;;  %s1017_s14 = scalar_lea.vmem %s1045_s4, %s389_s8  ;;  %513 = vst [vmem:[%s390_s11] sm:$0x1] %v937_v16  ;;  %s806_s22 = sshll.u32 %s1003_s28, 3 }
  0x15   : > { %v854_v7 = vunpack.c.l.bf16 %v853_v5  ;;  %v855_v8 = vunpack.c.h.bf16 %v853_v5  ;;  %514 = vst [vmem:[%s1017_s14] sm:$0x1] %v937_v16  ;;  %s379_s16 = scalar_lea.vmem %s1043_s2, %s806_s22 }
  0x16   : > { %485 = vmatpush.bf16.msra.mxu0 %v850_v1 }
  0x17   : > { %v413_v10 = vmul.f32 0.2, %v854_v7  ;;  %v414_v11 = vmul.f32 0.2, %v855_v8  ;;  %vm411_vm0 = vcmp.gt.f32.partialorder %v854_v7, 0.0  ;;  %vm412_vm1 = vcmp.gt.f32.partialorder %v855_v8, 0.0 }
  0x19   : > { %v415_v13 = vsel %vm411_vm0, %v854_v7, %v413_v10  ;;  %v416_v14 = vsel %vm412_vm1, %v855_v8, %v414_v11 }
  0x1a   : > { %486 = vmatpush.bf16.msra.mxu0 %v849_v2  ;;  %v417_v15 = vpack.c.bf16 %v416_v14, %v415_v13 }
  0x1b   : > { %v515_v32 = vld [vmem:[%s390_s11] sm:$0x1] }
  0x1c   : > { %v525_v35 = vld [vmem:[%s1017_s14] sm:$0x1] }
  0x1e   : > { %487 = vmatpush.bf16.msra.mxu0 %v848_v3 }
  0x22   : > { %488 = vmatpush.bf16.msra.mxu0 %v847_v4 }
  0x26   : > { %489 = vmatpush.bf16.msra.mxu0 %v846_v6 }
  0x2a   : > { %490 = vmatpush.bf16.msra.mxu0 %v845_v9 }
  0x2e   : > { %491 = vmatpush.bf16.msra.mxu0 %v844_v12 }
  0x31   : > { %492 = vmatmul.bf16.vlgmr.msra.gmra.mxu0 %v417_v15 }
  0xae   : > { %v493_v17 = vpop.f32.mrf.mxu0 }
  0xaf   : > { %507 = vst [vmem:[%s379_s16] sm:$0xff] %v493_v17  ;;  %v526_v19 = vmul.f32 %v493_v17, %v493_v17 }
  0xb6   : > { %v495_v18 = vpop.f32.mrf.mxu0 }
  0xb7   : > { %508 = vst [vmem:[%s379_s16 + $0x8] sm:$0xff] %v495_v18  ;;  %v516_v20 = vadd.f32 %v495_v18, %v493_v17  ;;  %v527_v21 = vmul.f32 %v495_v18, %v495_v18 }
  0xb9   : > { %v517_v22 = vrot.slane %v516_v20, 4  ;;  %v528_v23 = vadd.f32 %v527_v21, %v526_v19 }
  0xbb   : > { %v518_v24 = vadd.f32 %v517_v22, %v516_v20  ;;  %v529_v25 = vrot.slane %v528_v23, 4 }
  0xbd   : > { %v519_v26 = vrot.slane %v518_v24, 2  ;;  %v530_v27 = vadd.f32 %v529_v25, %v528_v23 }
  0xbf   : > { %v520_v28 = vadd.f32 %v519_v26, %v518_v24  ;;  %v531_v29 = vrot.slane %v530_v27, 2 }
  0xc1   : > { %v521_v30 = vrot.slane %v520_v28, 1  ;;  %v532_v31 = vadd.f32 %v531_v29, %v530_v27 }
  0xc3   : > { %v522_v33 = vadd.f32 %v521_v30, %v520_v28  ;;  %v533_v34 = vrot.slane %v532_v31, 1 }
  0xc5   : > { %v523_v36 = vadd.f32 %v522_v33, %v515_v32  ;;  %v534_v37 = vadd.f32 %v533_v34, %v532_v31 }
  0xc7   : > { %524 = vst [vmem:[%s390_s11] sm:$0x1] %v523_v36  ;;  %v535_v38 = vadd.f32 %v534_v37, %v525_v35 }
  0xc9   : > { %536 = vst [vmem:[%s1017_s14] sm:$0x1] %v535_v38 }
  0xca PF: > { %s15_s19 = sadd.s32 1, %s935_s19   ;;  %s1046_s15 = smov %s927_s17 }
  0xcb   : > { %p12_p7 = scmp.ge.s32.totalorder %s15_s19, 6   ;;  %s1047_s16 = smov %s931_s18 }
  0xcc   : > { %s1048_s17 = smov %s1051_s20  ;;  %s1049_s18 = smov %s1055_s21 }
  0xcd   :  { %14 = sbr.rel (!%p12_p7) target bundleno = 3 (0x3), region = 97 }

// kernel: cyclegan_forward.30
= control target key start
LH: loop header
LB: loop body
LE: loop exit
PB: predicated region body
PF: predicated region fallthrough
CT: control target
= control target key end

     0   :  { %s613_s12 = smov 0   ;;  %s615_s13 = smov 0   ;;  %s664_s0 = inlined_call_operand.vmem [shape: f32[2,2,8,128], index: 0, kind: input, shape index: {}]   ;;  %s665_s1 = inlined_call_operand.vmem [shape: f32[2,2,1,128], index: 1, kind: input, shape index: {}]   ;;  %s666_s2 = inlined_call_operand.vmem [shape: f32[2,2,1,128], index: 2, kind: input, shape index: {}]   ;;  %s667_s3 = inlined_call_operand.vmem [shape: f32[2,2,8,128], index: 3, kind: output, shape index: {}]  }
   0x1   :  { %s617_s14 = smov 0   ;;  %s619_s15 = smov 0  }
   0x2   :  { %s621_s16 = smov 0  }
   0x3 LB: > { %s35_s17 = sadd.s32 1, %s583_s14  ;;  %s39_s18 = sadd.s32 1, %s587_s15  ;;  %s591_s16 = sphi %s621_s16, %s13_s16   ;;  %s587_s15 = sphi %s619_s15, %s671_s15   ;;  %s583_s14 = sphi %s617_s14, %s670_s14   ;;  %s579_s13 = sphi %s615_s13, %s669_s13   ;;  %s575_s12 = sphi %s613_s12, %s668_s12  }
   0x4   : > { %p37_p0 = scmp.ge.s32.totalorder %s35_s17, 2  ;;  %p502_p1 = scmp.ge.s32.totalorder %s591_s16, 1 }
   0x5   : > { %p222_p2 = scmp.lt.s32.totalorder %s591_s16, 5 }
   0x6   : > { %s673_s17 = smov (%p37_p0, %s35_s17), 0  ;;  %s675_s18 = smov (!%p37_p0, %s39_s18), %s587_s15 }
   0x7   : > { %p223_p3 = pnand %p502_p1, %p222_p2  ;;  %p41_p4 = scmp.ge.s32.totalorder %s675_s18, 2 }
   0x8   : > { %p284_p5 = scmp.lt.s32.totalorder (!%p223_p3), %s579_s13, 1  ;;  %p286_p6 = scmp.lt.s32.totalorder (!%p223_p3), %s575_s12, 1 }
   0x9   : > { %s677_s18 = smov (%p41_p4, %s675_s18), 0  ;;  %226 = sbr.rel (%p223_p3) target bundleno = 25 (0x19), region = 32 }
   0xe   : > { %s679_s13 = smov (!%p284_p5, %s579_s13), 1  ;;  %s681_s12 = smov (!%p286_p6, %s575_s12), 1 }
   0xf   : > { %s503_s19 = sshll.u32 %s679_s13, 1 }
  0x10   : > { %s295_s20 = sadd.s32 %s503_s19, %s681_s12 }
  0x11   : > { %s504_s21 = sshll.u32 %s295_s20, 3  ;;  %s307_s24 = scalar_lea.vmem %s665_s1, %s295_s20 }
  0x12   : > { %s297_s27 = scalar_lea.vmem %s664_s0, %s504_s21  ;;  %s317_s30 = scalar_lea.vmem %s666_s2, %s295_s20  ;;  %v551_v0 = vld [vmem:[%s307_s24] ss:$0 sm:$0xff] }
  0x13   : > { %v332_v1 = vld [vmem:[%s297_s27] sm:$0xff]  ;;  %s331_s6 = scalar_lea.vmem %s667_s3, %s504_s21 }
  0x14   : > { %v552_v2 = vld [vmem:[%s317_s30] ss:$0 sm:$0xff]  ;;  %v337_v3 = vmul.f32 %v551_v0, %v332_v1 }
  0x16   : > { %v342_v4 = vadd.f32 %v552_v2, %v337_v3 }
  0x18   : > { %343 = vst [vmem:[%s331_s6] sm:$0xff] %v342_v4 }
  0x19 PF: > { %s13_s16 = sadd.s32 1, %s591_s16   ;;  %s668_s12 = smov %s583_s14 }
  0x1a   : > { %p10_p7 = scmp.ge.s32.totalorder %s13_s16, 6   ;;  %s669_s13 = smov %s587_s15 }
  0x1b   : > { %s670_s14 = smov %s673_s17  ;;  %s671_s15 = smov %s677_s18 }
  0x1c   :  { %12 = sbr.rel (!%p10_p7) target bundleno = 3 (0x3), region = 68 }

// kernel: cyclegan_forward.29
= control target key start
LH: loop header
LB: loop body
LE: loop exit
PB: predicated region body
PF: predicated region fallthrough
CT: control target
= control target key end

     0   :  { %s1056_s15 = smov 0   ;;  %s1058_s16 = smov 0   ;;  %s1143_s0 = inlined_call_operand.vmem [shape: bf16[2,2,8,256], index: 0, kind: input, shape index: {}]   ;;  %s1144_s1 = inlined_call_operand.vmem [shape: bf16[2,256,128], index: 1, kind: input, shape index: {}]   ;;  %s1145_s2 = inlined_call_operand.vmem [shape: f32[2,2,8,128], index: 2, kind: output, shape index: {0}]   ;;  %s1146_s3 = inlined_call_operand.vmem [shape: f32[2,2,1,128], index: 3, kind: output, shape index: {1}]   ;;  %s1147_s4 = inlined_call_operand.vmem [shape: f32[2,2,1,128], index: 4, kind: output, shape index: {2}]  }
   0x1   :  { %s1060_s17 = smov 0   ;;  %s1062_s18 = smov 0  }
   0x2   :  { %s1064_s19 = smov 0  }
   0x3 LB: > { %s44_s20 = sadd.s32 1, %s1020_s17  ;;  %s48_s21 = sadd.s32 1, %s1024_s18  ;;  %s1028_s19 = sphi %s1064_s19, %s15_s19   ;;  %s1024_s18 = sphi %s1062_s18, %s1151_s18   ;;  %s1020_s17 = sphi %s1060_s17, %s1150_s17   ;;  %s1016_s16 = sphi %s1058_s16, %s1149_s16   ;;  %s1012_s15 = sphi %s1056_s15, %s1148_s15  }
   0x4   : > { %p46_p0 = scmp.ge.s32.totalorder %s44_s20, 2  ;;  %p856_p1 = scmp.ge.s32.totalorder %s1028_s19, 1 }
   0x5   : > { %p255_p2 = scmp.lt.s32.totalorder %s1028_s19, 5 }
   0x6   : > { %s1153_s20 = smov (%p46_p0, %s44_s20), 0  ;;  %s1155_s21 = smov (!%p46_p0, %s48_s21), %s1024_s18 }
   0x7   : > { %p256_p3 = pnand %p856_p1, %p255_p2  ;;  %p50_p4 = scmp.ge.s32.totalorder %s1155_s21, 2 }
   0x8   : > { %p335_p5 = scmp.lt.s32.totalorder (!%p256_p3), %s1016_s16, 1  ;;  %p337_p6 = scmp.lt.s32.totalorder (!%p256_p3), %s1012_s15, 1 }
   0x9   : > { %s1157_s21 = smov (%p50_p4, %s1155_s21), 0  ;;  %259 = sbr.rel (%p256_p3) target bundleno = 195 (0xc3), region = 28 }
   0xe   : > { %s1159_s16 = smov (!%p335_p5, %s1016_s16), 1  ;;  %s1161_s15 = smov (!%p337_p6, %s1012_s15), 1  ;;  %v1030_v25 = vmov 0.0  }
   0xf   : > { %s932_s22 = sshll.u32 %s1159_s16, 7  ;;  %s857_s26 = sshll.u32 %s1161_s15, 1 }
  0x10   : > { %s1094_s25 = scalar_lea.vmem %s1144_s1, %s932_s22  ;;  %s858_s27 = sshll.u32 %s1159_s16, 2 }
  0x11   : > { %v940_v0 = vld [vmem:[%s1094_s25 + $0x38] sm:$0xff]  ;;  %v939_v2 = vld [vmem:[%s1094_s25 + $0x30] sm:$0xff]  ;;  %v938_v4 = vld [vmem:[%s1094_s25 + $0x28] sm:$0xff]  ;;  %s348_s28 = sadd.s32 %s858_s27, %s857_s26  ;;  %s862_s7 = sshll.u32 %s1159_s16, 1 }
  0x12   : > { %v948_v1 = vld [vmem:[%s1094_s25 + $0x78] sm:$0xff]  ;;  %544 = vmatpush.bf16.msra.mxu0 %v940_v0  ;;  %v947_v3 = vld [vmem:[%s1094_s25 + $0x70] sm:$0xff]  ;;  %v946_v5 = vld [vmem:[%s1094_s25 + $0x68] sm:$0xff]  ;;  %s859_s29 = sshll.u32 %s348_s28, 2  ;;  %s376_s8 = sadd.s32 %s862_s7, %s1161_s15 }
  0x13   : > { %557 = vmatpush.bf16.msra.mxu1 %v948_v1  ;;  %v937_v6 = vld [vmem:[%s1094_s25 + $0x20] sm:$0xff]  ;;  %s350_s6 = scalar_lea.vmem %s1143_s0, %s859_s29  ;;  %v936_v8 = vld [vmem:[%s1094_s25 + $0x18] sm:$0xff]  ;;  %v935_v11 = vld [vmem:[%s1094_s25 + $0x10] sm:$0xff]  ;;  %s388_s11 = scalar_lea.vmem %s1146_s3, %s376_s8 }
  0x14   : > { %v945_v7 = vld [vmem:[%s1094_s25 + $0x60] sm:$0xff]  ;;  %v944_v9 = vld [vmem:[%s1094_s25 + $0x58] sm:$0xff]  ;;  %v943_v12 = vld [vmem:[%s1094_s25 + $0x50] sm:$0xff]  ;;  %s398_s14 = scalar_lea.vmem %s1147_s4, %s376_s8  ;;  %581 = vst [vmem:[%s388_s11] sm:$0x1] %v1030_v25  ;;  %s863_s22 = sshll.u32 %s376_s8, 3 }
  0x15   : > { %v404_v10 = vld [vmem:[%s350_s6] sm:$0xff]  ;;  %v934_v15 = vld [vmem:[%s1094_s25 + $0x8] sm:$0xff]  ;;  %582 = vst [vmem:[%s398_s14] sm:$0x1] %v1030_v25  ;;  %s378_s24 = scalar_lea.vmem %s1145_s2, %s863_s22 }
  0x16   : > { %545 = vmatpush.bf16.msra.mxu0 %v939_v2  ;;  %v405_v13 = vunpack.c.l.bf16 %v404_v10  ;;  %v406_v14 = vunpack.c.h.bf16 %v404_v10  ;;  %v942_v16 = vld [vmem:[%s1094_s25 + $0x48] sm:$0xff]  ;;  %v933_v19 = vld [vmem:[%s1094_s25] sm:$0xff] }
  0x17   : > { %558 = vmatpush.bf16.msra.mxu1 %v947_v3  ;;  %v941_v20 = vld [vmem:[%s1094_s25 + $0x40] sm:$0xff] }
  0x18   : > { %v409_v17 = vmul.f32 0.2, %v405_v13  ;;  %v410_v18 = vmul.f32 0.2, %v406_v14  ;;  %vm407_vm0 = vcmp.gt.f32.partialorder %v405_v13, 0.0  ;;  %vm408_vm1 = vcmp.gt.f32.partialorder %v406_v14, 0.0 }
  0x1a   : > { %546 = vmatpush.bf16.msra.mxu0 %v938_v4  ;;  %v411_v21 = vsel %vm407_vm0, %v405_v13, %v409_v17  ;;  %v412_v22 = vsel %vm408_vm1, %v406_v14, %v410_v18 }
  0x1b   : > { %559 = vmatpush.bf16.msra.mxu1 %v946_v5  ;;  %v413_v23 = vpack.c.bf16 %v411_v21, %v411_v21  ;;  %v414_v24 = vpack.c.bf16 %v412_v22, %v412_v22  ;;  %v583_v41 = vld [vmem:[%s388_s11] sm:$0x1] }
  0x1c   : > { %v592_v44 = vld [vmem:[%s398_s14] sm:$0x1] }
  0x1e   : > { %547 = vmatpush.bf16.msra.mxu0 %v937_v6 }
  0x1f   : > { %560 = vmatpush.bf16.msra.mxu1 %v945_v7 }
  0x22   : > { %548 = vmatpush.bf16.msra.mxu0 %v936_v8 }
  0x23   : > { %561 = vmatpush.bf16.msra.mxu1 %v944_v9 }
  0x26   : > { %549 = vmatpush.bf16.msra.mxu0 %v935_v11 }
  0x27   : > { %562 = vmatpush.bf16.msra.mxu1 %v943_v12 }
  0x2a   : > { %550 = vmatpush.bf16.msra.mxu0 %v934_v15 }
  0x2b   : > { %563 = vmatpush.bf16.msra.mxu1 %v942_v16 }
  0x2e   : > { %551 = vmatpush.bf16.msra.mxu0 %v933_v19 }
  0x2f   : > { %564 = vmatpush.bf16.msra.mxu1 %v941_v20 }
  0x31   : > { %552 = vmatmul.bf16.vlgmr.msra.gmra.mxu0 %v413_v23 }
  0x32   : > { %565 = vmatmul.bf16.vlgmr.msra.gmra.mxu1 %v414_v24 }
  0xae   : > { %v553_v26 = vpop.f32.mrf.mxu0 }
  0xaf   : > { %v566_v27 = vpop.f32.mrf.mxu1 }
  0xb0   : > { %v567_v28 = vadd.f32 %v566_v27, %v553_v26 }
  0xb2   : > { %576 = vst [vmem:[%s378_s24] sm:$0xff] %v567_v28  ;;  %v584_v29 = vrot.slane %v567_v28, 4  ;;  %v593_v30 = vmul.f32 %v567_v28, %v567_v28 }
  0xb4   : > { %v585_v31 = vadd.f32 %v584_v29, %v567_v28  ;;  %v594_v32 = vrot.slane %v593_v30, 4 }
  0xb6   : > { %v586_v33 = vrot.slane %v585_v31, 2  ;;  %v595_v34 = vadd.f32 %v594_v32, %v593_v30  ;;  %v555_v35 = vpop.f32.mrf.mxu0 }
  0xb7   : > { %v568_v36 = vpop.f32.mrf.mxu1 }
  0xb8   : > { %v587_v37 = vadd.f32 %v586_v33, %v585_v31  ;;  %v596_v38 = vrot.slane %v595_v34, 2 }
  0xba   : > { %v588_v39 = vrot.slane %v587_v37, 1  ;;  %v597_v40 = vadd.f32 %v596_v38, %v595_v34 }
  0xbc   : > { %v589_v42 = vadd.f32 %v588_v39, %v587_v37  ;;  %v598_v43 = vrot.slane %v597_v40, 1 }
  0xbe   : > { %v590_v45 = vadd.f32 %v589_v42, %v583_v41  ;;  %v599_v46 = vadd.f32 %v598_v43, %v597_v40 }
  0xc0   : > { %591 = vst [vmem:[%s388_s11] sm:$0x1] %v590_v45  ;;  %v600_v47 = vadd.f32 %v599_v46, %v592_v44 }
  0xc2   : > { %601 = vst [vmem:[%s398_s14] sm:$0x1] %v600_v47 }
  0xc3 PF: > { %s15_s19 = sadd.s32 1, %s1028_s19   ;;  %s1148_s15 = smov %s1020_s17 }
  0xc4   : > { %p12_p7 = scmp.ge.s32.totalorder %s15_s19, 6   ;;  %s1149_s16 = smov %s1024_s18 }
  0xc5   : > { %s1150_s17 = smov %s1153_s20  ;;  %s1151_s18 = smov %s1157_s21 }
  0xc6   :  { %14 = sbr.rel (!%p12_p7) target bundleno = 3 (0x3), region = 97 }

// kernel: cyclegan_forward.31
= control target key start
LH: loop header
LB: loop body
LE: loop exit
PB: predicated region body
PF: predicated region fallthrough
CT: control target
= control target key end

     0   :  { %s1128_s12 = smov 0   ;;  %s1130_s13 = smov 0   ;;  %s1229_s0 = inlined_call_operand.vmem [shape: bf16[2,2,8,512], index: 0, kind: input, shape index: {}]   ;;  %s1230_s1 = inlined_call_operand.vmem [shape: bf16[2,512,128], index: 1, kind: input, shape index: {}]   ;;  %s1231_s2 = inlined_call_operand.vmem [shape: f32[2,1,128], index: 2, kind: input, shape index: {}]   ;;  %s1232_s3 = inlined_call_operand.vmem [shape: f32[2,2,8,128], index: 3, kind: output, shape index: {}]  }
   0x1   :  { %s1132_s14 = smov 0   ;;  %s1134_s15 = smov 0  }
   0x2   :  { %s1136_s16 = smov 0  }
   0x3 LB: > { %s42_s17 = sadd.s32 1, %s1098_s14  ;;  %s46_s18 = sadd.s32 1, %s1102_s15  ;;  %s1106_s16 = sphi %s1136_s16, %s13_s16   ;;  %s1102_s15 = sphi %s1134_s15, %s1236_s15   ;;  %s1098_s14 = sphi %s1132_s14, %s1235_s14   ;;  %s1094_s13 = sphi %s1130_s13, %s1234_s13   ;;  %s1090_s12 = sphi %s1128_s12, %s1233_s12  }
   0x4   : > { %p44_p0 = scmp.ge.s32.totalorder %s42_s17, 2  ;;  %p856_p1 = scmp.ge.s32.totalorder %s1106_s16, 1 }
   0x5   : > { %p230_p2 = scmp.lt.s32.totalorder %s1106_s16, 5 }
   0x6   : > { %s1238_s17 = smov (%p44_p0, %s42_s17), 0  ;;  %s1240_s18 = smov (!%p44_p0, %s46_s18), %s1102_s15 }
   0x7   : > { %p231_p3 = pnand %p856_p1, %p230_p2  ;;  %p48_p4 = scmp.ge.s32.totalorder %s1240_s18, 2 }
   0x8   : > { %p294_p5 = scmp.lt.s32.totalorder (!%p231_p3), %s1094_s13, 1  ;;  %p296_p6 = scmp.lt.s32.totalorder (!%p231_p3), %s1090_s12, 1 }
   0x9   : > { %s1242_s18 = smov (%p48_p4, %s1240_s18), 0  ;;  %234 = sbr.rel (%p231_p3) target bundleno = 192 (0xc0), region = 32 }
   0xe   : > { %s1244_s13 = smov (!%p294_p5, %s1094_s13), 1  ;;  %s1246_s12 = smov (!%p296_p6, %s1090_s12), 1 }
   0xf   : > { %s994_s19 = sshll.u32 %s1244_s13, 8  ;;  %s857_s23 = sshll.u32 %s1246_s12, 2 }
  0x10   : > { %s1166_s22 = scalar_lea.vmem %s1230_s1, %s994_s19  ;;  %s858_s24 = sshll.u32 %s1244_s13, 3 }
  0x11   : > { %v1002_v0 = vld [vmem:[%s1166_s22 + $0x38] sm:$0xff]  ;;  %v1001_v4 = vld [vmem:[%s1166_s22 + $0x30] sm:$0xff]  ;;  %v1000_v8 = vld [vmem:[%s1166_s22 + $0x28] sm:$0xff]  ;;  %s307_s25 = sadd.s32 %s858_s24, %s857_s23  ;;  %s329_s5 = scalar_lea.vmem %s1231_s2, %s1244_s13 }
  0x12   : > { %v1010_v1 = vld [vmem:[%s1166_s22 + $0x78] sm:$0xff]  ;;  %628 = vmatpush.bf16.msra.mxu0 %v1002_v0  ;;  %v1009_v5 = vld [vmem:[%s1166_s22 + $0x70] sm:$0xff]  ;;  %v1008_v9 = vld [vmem:[%s1166_s22 + $0x68] sm:$0xff]  ;;  %s859_s26 = sshll.u32 %s307_s25, 2  ;;  %s862_s6 = sshll.u32 %s1244_s13, 1 }
  0x13   : > { %v1018_v2 = vld [vmem:[%s1166_s22 + $0xb8] sm:$0xff]  ;;  %641 = vmatpush.bf16.msra.mxu1 %v1010_v1  ;;  %v1017_v6 = vld [vmem:[%s1166_s22 + $0xb0] sm:$0xff]  ;;  %v1016_v10 = vld [vmem:[%s1166_s22 + $0xa8] sm:$0xff]  ;;  %s309_s29 = scalar_lea.vmem %s1229_s0, %s859_s26  ;;  %s341_s7 = sadd.s32 %s862_s6, %s1246_s12 }
  0x14   : > { %v1026_v3 = vld [vmem:[%s1166_s22 + $0xf8] sm:$0xff]  ;;  %654 = vmatpush.bf16.msra.mxu2 %v1018_v2  ;;  %v1025_v7 = vld [vmem:[%s1166_s22 + $0xf0] sm:$0xff]  ;;  %v1024_v11 = vld [vmem:[%s1166_s22 + $0xe8] sm:$0xff]  ;;  %s863_s8 = sshll.u32 %s341_s7, 3 }
  0x15   : > { %667 = vmatpush.bf16.msra.mxu3 %v1026_v3  ;;  %v999_v12 = vld [vmem:[%s1166_s22 + $0x20] sm:$0xff]  ;;  %v998_v16 = vld [vmem:[%s1166_s22 + $0x18] sm:$0xff]  ;;  %v350_v21 = vld [vmem:[%s309_s29 + $0x8] sm:$0xff]  ;;  %s343_s11 = scalar_lea.vmem %s1232_s3, %s863_s8 }
  0x16   : > { %629 = vmatpush.bf16.msra.mxu0 %v1001_v4  ;;  %v1007_v13 = vld [vmem:[%s1166_s22 + $0x60] sm:$0xff]  ;;  %v1006_v17 = vld [vmem:[%s1166_s22 + $0x58] sm:$0xff]  ;;  %v997_v22 = vld [vmem:[%s1166_s22 + $0x10] sm:$0xff]  ;;  %v353_v28 = vunpack.c.l.bf16 %v350_v21  ;;  %v354_v29 = vunpack.c.h.bf16 %v350_v21 }
  0x17   : > { %642 = vmatpush.bf16.msra.mxu1 %v1009_v5  ;;  %v1015_v14 = vld [vmem:[%s1166_s22 + $0xa0] sm:$0xff]  ;;  %v1014_v18 = vld [vmem:[%s1166_s22 + $0x98] sm:$0xff]  ;;  %v1005_v23 = vld [vmem:[%s1166_s22 + $0x50] sm:$0xff] }
  0x18   : > { %655 = vmatpush.bf16.msra.mxu2 %v1017_v6  ;;  %v1023_v15 = vld [vmem:[%s1166_s22 + $0xe0] sm:$0xff]  ;;  %v1022_v19 = vld [vmem:[%s1166_s22 + $0xd8] sm:$0xff]  ;;  %v1013_v26 = vld [vmem:[%s1166_s22 + $0x90] sm:$0xff]  ;;  %v361_v36 = vmul.f32 0.2, %v353_v28  ;;  %vm357_vm2 = vcmp.gt.f32.partialorder %v353_v28, 0.0 }
  0x19   : > { %668 = vmatpush.bf16.msra.mxu3 %v1025_v7  ;;  %v349_v20 = vld [vmem:[%s309_s29] sm:$0xff]  ;;  %v1021_v27 = vld [vmem:[%s1166_s22 + $0xd0] sm:$0xff]  ;;  %v996_v30 = vld [vmem:[%s1166_s22 + $0x8] sm:$0xff]  ;;  %v362_v37 = vmul.f32 0.2, %v354_v29  ;;  %vm358_vm3 = vcmp.gt.f32.partialorder %v354_v29, 0.0 }
  0x1a   : > { %630 = vmatpush.bf16.msra.mxu0 %v1000_v8  ;;  %v351_v24 = vunpack.c.l.bf16 %v349_v20  ;;  %v352_v25 = vunpack.c.h.bf16 %v349_v20  ;;  %v1004_v31 = vld [vmem:[%s1166_s22 + $0x48] sm:$0xff]  ;;  %v995_v38 = vld [vmem:[%s1166_s22] sm:$0xff]  ;;  %v365_v44 = vsel %vm357_vm2, %v353_v28, %v361_v36 }
  0x1b   : > { %643 = vmatpush.bf16.msra.mxu1 %v1008_v9  ;;  %v1012_v32 = vld [vmem:[%s1166_s22 + $0x88] sm:$0xff]  ;;  %v1003_v39 = vld [vmem:[%s1166_s22 + $0x40] sm:$0xff]  ;;  %v366_v45 = vsel %vm358_vm3, %v354_v29, %v362_v37  ;;  %v369_v48 = vpack.c.bf16 %v365_v44, %v365_v44 }
  0x1c   : > { %656 = vmatpush.bf16.msra.mxu2 %v1016_v10  ;;  %v1020_v33 = vld [vmem:[%s1166_s22 + $0xc8] sm:$0xff]  ;;  %v359_v34 = vmul.f32 0.2, %v351_v24  ;;  %v360_v35 = vmul.f32 0.2, %v352_v25  ;;  %vm355_vm0 = vcmp.gt.f32.partialorder %v351_v24, 0.0  ;;  %v370_v49 = vpack.c.bf16 %v366_v45, %v366_v45 }
  0x1d   : > { %669 = vmatpush.bf16.msra.mxu3 %v1024_v11  ;;  %vm356_vm1 = vcmp.gt.f32.partialorder %v352_v25, 0.0  ;;  %v1011_v42 = vld [vmem:[%s1166_s22 + $0x80] sm:$0xff] }
  0x1e   : > { %631 = vmatpush.bf16.msra.mxu0 %v999_v12  ;;  %v363_v40 = vsel %vm355_vm0, %v351_v24, %v359_v34  ;;  %v364_v41 = vsel %vm356_vm1, %v352_v25, %v360_v35  ;;  %v1019_v43 = vld [vmem:[%s1166_s22 + $0xc0] sm:$0xff] }
  0x1f   : > { %644 = vmatpush.bf16.msra.mxu1 %v1007_v13  ;;  %v367_v46 = vpack.c.bf16 %v363_v40, %v363_v40  ;;  %v368_v47 = vpack.c.bf16 %v364_v41, %v364_v41  ;;  %v1067_v56 = vld [vmem:[%s329_s5] ss:$0 sm:$0xff] }
  0x20   : > { %657 = vmatpush.bf16.msra.mxu2 %v1015_v14 }
  0x21   : > { %670 = vmatpush.bf16.msra.mxu3 %v1023_v15 }
  0x22   : > { %632 = vmatpush.bf16.msra.mxu0 %v998_v16 }
  0x23   : > { %645 = vmatpush.bf16.msra.mxu1 %v1006_v17 }
  0x24   : > { %658 = vmatpush.bf16.msra.mxu2 %v1014_v18 }
  0x25   : > { %671 = vmatpush.bf16.msra.mxu3 %v1022_v19 }
  0x26   : > { %633 = vmatpush.bf16.msra.mxu0 %v997_v22 }
  0x27   : > { %646 = vmatpush.bf16.msra.mxu1 %v1005_v23 }
  0x28   : > { %659 = vmatpush.bf16.msra.mxu2 %v1013_v26 }
  0x29   : > { %672 = vmatpush.bf16.msra.mxu3 %v1021_v27 }
  0x2a   : > { %634 = vmatpush.bf16.msra.mxu0 %v996_v30 }
  0x2b   : > { %647 = vmatpush.bf16.msra.mxu1 %v1004_v31 }
  0x2c   : > { %660 = vmatpush.bf16.msra.mxu2 %v1012_v32 }
  0x2d   : > { %673 = vmatpush.bf16.msra.mxu3 %v1020_v33 }
  0x2e   : > { %635 = vmatpush.bf16.msra.mxu0 %v995_v38 }
  0x2f   : > { %648 = vmatpush.bf16.msra.mxu1 %v1003_v39 }
  0x30   : > { %661 = vmatpush.bf16.msra.mxu2 %v1011_v42 }
  0x31   : > { %674 = vmatpush.bf16.msra.mxu3 %v1019_v43  ;;  %636 = vmatmul.bf16.vlgmr.msra.gmra.mxu0 %v367_v46 }
  0x32   : > { %649 = vmatmul.bf16.vlgmr.msra.gmra.mxu1 %v368_v47 }
  0x33   : > { %662 = vmatmul.bf16.vlgmr.msra.gmra.mxu2 %v369_v48 }
  0x34   : > { %675 = vmatmul.bf16.vlgmr.msra.gmra.mxu3 %v370_v49 }
  0xae   : > { %v637_v50 = vpop.f32.mrf.mxu0 }
  0xaf   : > { %v650_v51 = vpop.f32.mrf.mxu1 }
  0xb0   : > { %v651_v52 = vadd.f32 %v650_v51, %v637_v50 }
  0xb6   : > { %v663_v53 = vpop.f32.mrf.mxu2  ;;  %v639_v57 = vpop.f32.mrf.mxu0 }
  0xb7   : > { %v676_v54 = vpop.f32.mrf.mxu3  ;;  %v664_v55 = vadd.f32 %v663_v53, %v651_v52  ;;  %v652_v58 = vpop.f32.mrf.mxu1 }
  0xb9   : > { %v677_v59 = vadd.f32 %v676_v54, %v664_v55 }
  0xbb   : > { %v690_v60 = vadd.f32 %v1067_v56, %v677_v59 }
  0xbd   : > { %691 = vst [vmem:[%s343_s11] sm:$0xff] %v690_v60 }
  0xbe   : > { %v665_v61 = vpop.f32.mrf.mxu2 }
  0xbf   : > { %v678_v62 = vpop.f32.mrf.mxu3 }
  0xc0 PF: > { %s13_s16 = sadd.s32 1, %s1106_s16   ;;  %s1233_s12 = smov %s1098_s14 }
  0xc1   : > { %p10_p7 = scmp.ge.s32.totalorder %s13_s16, 6   ;;  %s1234_s13 = smov %s1102_s15 }
  0xc2   : > { %s1235_s14 = smov %s1238_s17  ;;  %s1236_s15 = smov %s1242_s18 }
  0xc3   :  { %12 = sbr.rel (!%p10_p7) target bundleno = 3 (0x3), region = 76 }

// kernel: cyclegan_forward.32
= control target key start
LH: loop header
LB: loop body
LE: loop exit
PB: predicated region body
PF: predicated region fallthrough
CT: control target
= control target key end

     0   :  { %s1052_s15 = smov 0   ;;  %s1054_s16 = smov 0   ;;  %s1145_s0 = inlined_call_operand.vmem [shape: bf16[8,2,8,256], index: 0, kind: input, shape index: {}]   ;;  %s1146_s1 = inlined_call_operand.vmem [shape: bf16[8,256,128], index: 1, kind: input, shape index: {}]   ;;  %s1147_s2 = inlined_call_operand.vmem [shape: f32[8,2,8,128], index: 2, kind: output, shape index: {0}]   ;;  %s1148_s3 = inlined_call_operand.vmem [shape: f32[8,2,1,128], index: 3, kind: output, shape index: {1}]   ;;  %s1149_s4 = inlined_call_operand.vmem [shape: f32[8,2,1,128], index: 4, kind: output, shape index: {2}]  }
   0x1   :  { %s1056_s17 = smov 0   ;;  %s1058_s18 = smov 0  }
   0x2   :  { %s1060_s19 = smov 0  }
   0x3 LB: > { %s44_s20 = sadd.s32 1, %s1016_s17  ;;  %s48_s21 = sadd.s32 1, %s1020_s18  ;;  %s1024_s19 = sphi %s1060_s19, %s15_s19   ;;  %s1020_s18 = sphi %s1058_s18, %s1153_s18   ;;  %s1016_s17 = sphi %s1056_s17, %s1152_s17   ;;  %s1012_s16 = sphi %s1054_s16, %s1151_s16   ;;  %s1008_s15 = sphi %s1052_s15, %s1150_s15  }
   0x4   : > { %p46_p0 = scmp.ge.s32.totalorder %s44_s20, 2  ;;  %p852_p1 = scmp.ge.s32.totalorder %s1024_s19, 1 }
   0x5   : > { %p255_p2 = scmp.lt.s32.totalorder %s1024_s19, 17 }
   0x6   : > { %s1155_s20 = smov (%p46_p0, %s44_s20), 0  ;;  %s1157_s21 = smov (!%p46_p0, %s48_s21), %s1020_s18 }
   0x7   : > { %p256_p3 = pnand %p852_p1, %p255_p2  ;;  %p50_p4 = scmp.ge.s32.totalorder %s1157_s21, 8 }
   0x8   : > { %p335_p5 = scmp.lt.s32.totalorder (!%p256_p3), %s1012_s16, 7  ;;  %p337_p6 = scmp.lt.s32.totalorder (!%p256_p3), %s1008_s15, 1 }
   0x9   : > { %s1159_s21 = smov (%p50_p4, %s1157_s21), 0  ;;  %259 = sbr.rel (%p256_p3) target bundleno = 195 (0xc3), region = 28 }
   0xe   : > { %s1161_s16 = smov (!%p335_p5, %s1012_s16), 7  ;;  %s1163_s15 = smov (!%p337_p6, %s1008_s15), 1  ;;  %v1026_v4 = vmov 0.0  }
   0xf   : > { %s928_s22 = sshll.u32 %s1161_s16, 7  ;;  %s858_s26 = sshll.u32 %s1161_s16, 1 }
  0x10   : > { %s1085_s25 = scalar_lea.vmem %s1146_s1, %s928_s22  ;;  %s1089_s27 = sadd.s32 %s858_s26, %s1163_s15 }
  0x11   : > { %v936_v0 = vld [vmem:[%s1085_s25 + $0x38] sm:$0xff]  ;;  %v935_v2 = vld [vmem:[%s1085_s25 + $0x30] sm:$0xff]  ;;  %s1097_s30 = scalar_lea.vmem %s1148_s3, %s1089_s27  ;;  %s1103_s7 = scalar_lea.vmem %s1149_s4, %s1089_s27  ;;  %v934_v5 = vld [vmem:[%s1085_s25 + $0x28] sm:$0xff] }
  0x12   : > { %v944_v1 = vld [vmem:[%s1085_s25 + $0x78] sm:$0xff]  ;;  %540 = vmatpush.bf16.msra.mxu0 %v936_v0  ;;  %v943_v3 = vld [vmem:[%s1085_s25 + $0x70] sm:$0xff]  ;;  %577 = vst [vmem:[%s1097_s30] sm:$0x1] %v1026_v4  ;;  %v942_v6 = vld [vmem:[%s1085_s25 + $0x68] sm:$0xff]  ;;  %s853_s8 = sshll.u32 %s1163_s15, 1  ;;  %s854_s9 = sshll.u32 %s1161_s16, 2 }
  0x13   : > { %553 = vmatpush.bf16.msra.mxu1 %v944_v1  ;;  %578 = vst [vmem:[%s1103_s7] sm:$0x1] %v1026_v4  ;;  %s348_s10 = sadd.s32 %s854_s9, %s853_s8  ;;  %v933_v7 = vld [vmem:[%s1085_s25 + $0x20] sm:$0xff]  ;;  %v932_v9 = vld [vmem:[%s1085_s25 + $0x18] sm:$0xff]  ;;  %v931_v11 = vld [vmem:[%s1085_s25 + $0x10] sm:$0xff]  ;;  %s859_s15 = sshll.u32 %s1089_s27, 3 }
  0x14   : > { %v941_v8 = vld [vmem:[%s1085_s25 + $0x60] sm:$0xff]  ;;  %s855_s11 = sshll.u32 %s348_s10, 2  ;;  %v940_v10 = vld [vmem:[%s1085_s25 + $0x58] sm:$0xff]  ;;  %v939_v12 = vld [vmem:[%s1085_s25 + $0x50] sm:$0xff]  ;;  %s378_s23 = scalar_lea.vmem %s1147_s2, %s859_s15 }
  0x15   : > { %s350_s14 = scalar_lea.vmem %s1145_s0, %s855_s11  ;;  %v930_v16 = vld [vmem:[%s1085_s25 + $0x8] sm:$0xff]  ;;  %v929_v20 = vld [vmem:[%s1085_s25] sm:$0xff] }
  0x16   : > { %541 = vmatpush.bf16.msra.mxu0 %v935_v2  ;;  %v404_v13 = vld [vmem:[%s350_s14] sm:$0xff]  ;;  %v938_v17 = vld [vmem:[%s1085_s25 + $0x48] sm:$0xff] }
  0x17   : > { %554 = vmatpush.bf16.msra.mxu1 %v943_v3  ;;  %v405_v14 = vunpack.c.l.bf16 %v404_v13  ;;  %v406_v15 = vunpack.c.h.bf16 %v404_v13  ;;  %v937_v21 = vld [vmem:[%s1085_s25 + $0x40] sm:$0xff] }
  0x19   : > { %v407_v18 = vmax.f32 %v405_v14, 0.0  ;;  %v408_v19 = vmax.f32 %v406_v15, 0.0  ;;  %v579_v39 = vld [vmem:[%s1097_s30] sm:$0x1] }
  0x1a   : > { %542 = vmatpush.bf16.msra.mxu0 %v934_v5  ;;  %v588_v42 = vld [vmem:[%s1103_s7] sm:$0x1] }
  0x1b   : > { %555 = vmatpush.bf16.msra.mxu1 %v942_v6  ;;  %v409_v22 = vpack.c.bf16 %v407_v18, %v407_v18  ;;  %v410_v23 = vpack.c.bf16 %v408_v19, %v408_v19 }
  0x1e   : > { %543 = vmatpush.bf16.msra.mxu0 %v933_v7 }
  0x1f   : > { %556 = vmatpush.bf16.msra.mxu1 %v941_v8 }
  0x22   : > { %544 = vmatpush.bf16.msra.mxu0 %v932_v9 }
  0x23   : > { %557 = vmatpush.bf16.msra.mxu1 %v940_v10 }
  0x26   : > { %545 = vmatpush.bf16.msra.mxu0 %v931_v11 }
  0x27   : > { %558 = vmatpush.bf16.msra.mxu1 %v939_v12 }
  0x2a   : > { %546 = vmatpush.bf16.msra.mxu0 %v930_v16 }
  0x2b   : > { %559 = vmatpush.bf16.msra.mxu1 %v938_v17 }
  0x2e   : > { %547 = vmatpush.bf16.msra.mxu0 %v929_v20 }
  0x2f   : > { %560 = vmatpush.bf16.msra.mxu1 %v937_v21 }
  0x31   : > { %548 = vmatmul.bf16.vlgmr.msra.gmra.mxu0 %v409_v22 }
  0x32   : > { %561 = vmatmul.bf16.vlgmr.msra.gmra.mxu1 %v410_v23 }
  0xae   : > { %v549_v24 = vpop.f32.mrf.mxu0 }
  0xaf   : > { %v562_v25 = vpop.f32.mrf.mxu1 }
  0xb0   : > { %v563_v26 = vadd.f32 %v562_v25, %v549_v24 }
  0xb2   : > { %572 = vst [vmem:[%s378_s23] sm:$0xff] %v563_v26  ;;  %v580_v27 = vrot.slane %v563_v26, 4  ;;  %v589_v28 = vmul.f32 %v563_v26, %v563_v26 }
  0xb4   : > { %v581_v29 = vadd.f32 %v580_v27, %v563_v26  ;;  %v590_v30 = vrot.slane %v589_v28, 4 }
  0xb6   : > { %v582_v31 = vrot.slane %v581_v29, 2  ;;  %v591_v32 = vadd.f32 %v590_v30, %v589_v28  ;;  %v551_v33 = vpop.f32.mrf.mxu0 }
  0xb7   : > { %v564_v34 = vpop.f32.mrf.mxu1 }
  0xb8   : > { %v583_v35 = vadd.f32 %v582_v31, %v581_v29  ;;  %v592_v36 = vrot.slane %v591_v32, 2 }
  0xba   : > { %v584_v37 = vrot.slane %v583_v35, 1  ;;  %v593_v38 = vadd.f32 %v592_v36, %v591_v32 }
  0xbc   : > { %v585_v40 = vadd.f32 %v584_v37, %v583_v35  ;;  %v594_v41 = vrot.slane %v593_v38, 1 }
  0xbe   : > { %v586_v43 = vadd.f32 %v585_v40, %v579_v39  ;;  %v595_v44 = vadd.f32 %v594_v41, %v593_v38 }
  0xc0   : > { %587 = vst [vmem:[%s1097_s30] sm:$0x1] %v586_v43  ;;  %v596_v45 = vadd.f32 %v595_v44, %v588_v42 }
  0xc2   : > { %597 = vst [vmem:[%s1103_s7] sm:$0x1] %v596_v45 }
  0xc3 PF: > { %s15_s19 = sadd.s32 1, %s1024_s19   ;;  %s1150_s15 = smov %s1016_s17 }
  0xc4   : > { %p12_p7 = scmp.ge.s32.totalorder %s15_s19, 18   ;;  %s1151_s16 = smov %s1020_s18 }
  0xc5   : > { %s1152_s17 = smov %s1155_s20  ;;  %s1153_s18 = smov %s1159_s21 }
  0xc6   :  { %14 = sbr.rel (!%p12_p7) target bundleno = 3 (0x3), region = 97 }

// kernel: cyclegan_forward.33
= control target key start
LH: loop header
LB: loop body
LE: loop exit
PB: predicated region body
PF: predicated region fallthrough
CT: control target
= control target key end

     0   :  { %s613_s12 = smov 0   ;;  %s615_s13 = smov 0   ;;  %s664_s0 = inlined_call_operand.vmem [shape: f32[8,2,8,128], index: 0, kind: input, shape index: {}]   ;;  %s665_s1 = inlined_call_operand.vmem [shape: f32[8,2,1,128], index: 1, kind: input, shape index: {}]   ;;  %s666_s2 = inlined_call_operand.vmem [shape: f32[8,2,1,128], index: 2, kind: input, shape index: {}]   ;;  %s667_s3 = inlined_call_operand.vmem [shape: f32[8,2,8,128], index: 3, kind: output, shape index: {}]  }
   0x1   :  { %s617_s14 = smov 0   ;;  %s619_s15 = smov 0  }
   0x2   :  { %s621_s16 = smov 0  }
   0x3 LB: > { %s35_s17 = sadd.s32 1, %s583_s14  ;;  %s39_s18 = sadd.s32 1, %s587_s15  ;;  %s591_s16 = sphi %s621_s16, %s13_s16   ;;  %s587_s15 = sphi %s619_s15, %s671_s15   ;;  %s583_s14 = sphi %s617_s14, %s670_s14   ;;  %s579_s13 = sphi %s615_s13, %s669_s13   ;;  %s575_s12 = sphi %s613_s12, %s668_s12  }
   0x4   : > { %p37_p0 = scmp.ge.s32.totalorder %s35_s17, 2  ;;  %p502_p1 = scmp.ge.s32.totalorder %s591_s16, 1 }
   0x5   : > { %p222_p2 = scmp.lt.s32.totalorder %s591_s16, 17 }
   0x6   : > { %s673_s17 = smov (%p37_p0, %s35_s17), 0  ;;  %s675_s18 = smov (!%p37_p0, %s39_s18), %s587_s15 }
   0x7   : > { %p223_p3 = pnand %p502_p1, %p222_p2  ;;  %p41_p4 = scmp.ge.s32.totalorder %s675_s18, 8 }
   0x8   : > { %p284_p5 = scmp.lt.s32.totalorder (!%p223_p3), %s579_s13, 7  ;;  %p286_p6 = scmp.lt.s32.totalorder (!%p223_p3), %s575_s12, 1 }
   0x9   : > { %s677_s18 = smov (%p41_p4, %s675_s18), 0  ;;  %226 = sbr.rel (%p223_p3) target bundleno = 25 (0x19), region = 32 }
   0xe   : > { %s679_s13 = smov (!%p284_p5, %s579_s13), 7  ;;  %s681_s12 = smov (!%p286_p6, %s575_s12), 1 }
   0xf   : > { %s503_s19 = sshll.u32 %s679_s13, 1 }
  0x10   : > { %s295_s20 = sadd.s32 %s503_s19, %s681_s12 }
  0x11   : > { %s504_s21 = sshll.u32 %s295_s20, 3  ;;  %s307_s24 = scalar_lea.vmem %s665_s1, %s295_s20 }
  0x12   : > { %s297_s27 = scalar_lea.vmem %s664_s0, %s504_s21  ;;  %s317_s30 = scalar_lea.vmem %s666_s2, %s295_s20  ;;  %v551_v0 = vld [vmem:[%s307_s24] ss:$0 sm:$0xff] }
  0x13   : > { %v332_v1 = vld [vmem:[%s297_s27] sm:$0xff]  ;;  %s331_s6 = scalar_lea.vmem %s667_s3, %s504_s21 }
  0x14   : > { %v552_v2 = vld [vmem:[%s317_s30] ss:$0 sm:$0xff]  ;;  %v337_v3 = vmul.f32 %v551_v0, %v332_v1 }
  0x16   : > { %v342_v4 = vadd.f32 %v552_v2, %v337_v3 }
  0x18   : > { %343 = vst [vmem:[%s331_s6] sm:$0xff] %v342_v4 }
  0x19 PF: > { %s13_s16 = sadd.s32 1, %s591_s16   ;;  %s668_s12 = smov %s583_s14 }
  0x1a   : > { %p10_p7 = scmp.ge.s32.totalorder %s13_s16, 18   ;;  %s669_s13 = smov %s587_s15 }
  0x1b   : > { %s670_s14 = smov %s673_s17  ;;  %s671_s15 = smov %s677_s18 }
  0x1c   :  { %12 = sbr.rel (!%p10_p7) target bundleno = 3 (0x3), region = 68 }

// kernel: cyclegan_forward.36
= control target key start
LH: loop header
LB: loop body
LE: loop exit
PB: predicated region body
PF: predicated region fallthrough
CT: control target
= control target key end

     0   :  { %s959_s15 = smov 0   ;;  %s961_s16 = smov 0   ;;  %s1039_s0 = inlined_call_operand.vmem [shape: bf16[8,2,16,128], index: 0, kind: input, shape index: {}]   ;;  %s1040_s1 = inlined_call_operand.vmem [shape: bf16[8,128,128], index: 1, kind: input, shape index: {}]   ;;  %s1041_s2 = inlined_call_operand.vmem [shape: f32[8,2,16,128], index: 2, kind: output, shape index: {0}]   ;;  %s1042_s3 = inlined_call_operand.vmem [shape: f32[8,2,1,128], index: 3, kind: output, shape index: {1}]   ;;  %s1043_s4 = inlined_call_operand.vmem [shape: f32[8,2,1,128], index: 4, kind: output, shape index: {2}]  }
   0x1   :  { %s963_s17 = smov 0   ;;  %s965_s18 = smov 0  }
   0x2   :  { %s967_s19 = smov 0  }
   0x3 LB: > { %s44_s20 = sadd.s32 1, %s923_s17  ;;  %s48_s21 = sadd.s32 1, %s927_s18  ;;  %s931_s19 = sphi %s967_s19, %s15_s19   ;;  %s927_s18 = sphi %s965_s18, %s1047_s18   ;;  %s923_s17 = sphi %s963_s17, %s1046_s17   ;;  %s919_s16 = sphi %s961_s16, %s1045_s16   ;;  %s915_s15 = sphi %s959_s15, %s1044_s15  }
   0x4   : > { %p46_p0 = scmp.ge.s32.totalorder %s44_s20, 2  ;;  %p794_p1 = scmp.ge.s32.totalorder %s931_s19, 1 }
   0x5   : > { %p254_p2 = scmp.lt.s32.totalorder %s931_s19, 17 }
   0x6   : > { %s1049_s20 = smov (%p46_p0, %s44_s20), 0  ;;  %s1051_s21 = smov (!%p46_p0, %s48_s21), %s927_s18 }
   0x7   : > { %p255_p3 = pnand %p794_p1, %p254_p2  ;;  %p50_p4 = scmp.ge.s32.totalorder %s1051_s21, 8 }
   0x8   : > { %p335_p5 = scmp.lt.s32.totalorder (!%p255_p3), %s919_s16, 7  ;;  %p337_p6 = scmp.lt.s32.totalorder (!%p255_p3), %s915_s15, 1 }
   0x9   : > { %s1053_s21 = smov (%p50_p4, %s1051_s21), 0  ;;  %258 = sbr.rel (%p255_p3) target bundleno = 202 (0xca), region = 28 }
   0xe   : > { %s1055_s16 = smov (!%p335_p5, %s919_s16), 7  ;;  %s1057_s15 = smov (!%p337_p6, %s915_s15), 1  ;;  %v933_v2 = vmov 0.0  }
   0xf   : > { %s839_s22 = sshll.u32 %s1055_s16, 6  ;;  %s803_s26 = sshll.u32 %s1055_s16, 1 }
  0x10   : > { %s992_s25 = scalar_lea.vmem %s1040_s1, %s839_s22  ;;  %s389_s27 = sadd.s32 %s803_s26, %s1057_s15 }
  0x11   : > { %v847_v0 = vld [vmem:[%s992_s25 + $0x38] sm:$0xff]  ;;  %v846_v1 = vld [vmem:[%s992_s25 + $0x30] sm:$0xff]  ;;  %s999_s30 = scalar_lea.vmem %s1042_s3, %s389_s27  ;;  %s1004_s7 = scalar_lea.vmem %s1043_s4, %s389_s27  ;;  %v845_v3 = vld [vmem:[%s992_s25 + $0x28] sm:$0xff] }
  0x12   : > { %480 = vmatpush.bf16.msra.mxu0 %v847_v0  ;;  %509 = vst [vmem:[%s999_s30] sm:$0x1] %v933_v2  ;;  %s795_s8 = sshll.u32 %s1057_s15, 1  ;;  %s796_s9 = sshll.u32 %s1055_s16, 2  ;;  %v844_v4 = vld [vmem:[%s992_s25 + $0x20] sm:$0xff]  ;;  %v843_v5 = vld [vmem:[%s992_s25 + $0x18] sm:$0xff]  ;;  %v842_v6 = vld [vmem:[%s992_s25 + $0x10] sm:$0xff] }
  0x13   : > { %510 = vst [vmem:[%s1004_s7] sm:$0x1] %v933_v2  ;;  %s347_s10 = sadd.s32 %s796_s9, %s795_s8  ;;  %v841_v10 = vld [vmem:[%s992_s25 + $0x8] sm:$0xff]  ;;  %v840_v13 = vld [vmem:[%s992_s25] sm:$0xff] }
  0x14   : > { %s797_s11 = sshll.u32 %s347_s10, 2  ;;  %s802_s15 = sshll.u32 %s347_s10, 3 }
  0x15   : > { %s349_s14 = scalar_lea.vmem %s1039_s0, %s797_s11  ;;  %s379_s23 = scalar_lea.vmem %s1041_s2, %s802_s15 }
  0x16   : > { %481 = vmatpush.bf16.msra.mxu0 %v846_v1  ;;  %v849_v7 = vld [vmem:[%s349_s14] sm:$0xff]  }
  0x17   : > { %v850_v8 = vunpack.c.l.bf16 %v849_v7  ;;  %v851_v9 = vunpack.c.h.bf16 %v849_v7 }
  0x19   : > { %v411_v11 = vmax.f32 %v850_v8, 0.0  ;;  %v412_v12 = vmax.f32 %v851_v9, 0.0  ;;  %v511_v30 = vld [vmem:[%s999_s30] sm:$0x1] }
  0x1a   : > { %482 = vmatpush.bf16.msra.mxu0 %v845_v3  ;;  %v521_v33 = vld [vmem:[%s1004_s7] sm:$0x1] }
  0x1b   : > { %v413_v14 = vpack.c.bf16 %v412_v12, %v411_v11 }
  0x1e   : > { %483 = vmatpush.bf16.msra.mxu0 %v844_v4 }
  0x22   : > { %484 = vmatpush.bf16.msra.mxu0 %v843_v5 }
  0x26   : > { %485 = vmatpush.bf16.msra.mxu0 %v842_v6 }
  0x2a   : > { %486 = vmatpush.bf16.msra.mxu0 %v841_v10 }
  0x2e   : > { %487 = vmatpush.bf16.msra.mxu0 %v840_v13 }
  0x31   : > { %488 = vmatmul.bf16.vlgmr.msra.gmra.mxu0 %v413_v14 }
  0xae   : > { %v489_v15 = vpop.f32.mrf.mxu0 }
  0xaf   : > { %503 = vst [vmem:[%s379_s23] sm:$0xff] %v489_v15  ;;  %v522_v17 = vmul.f32 %v489_v15, %v489_v15 }
  0xb6   : > { %v491_v16 = vpop.f32.mrf.mxu0 }
  0xb7   : > { %504 = vst [vmem:[%s379_s23 + $0x8] sm:$0xff] %v491_v16  ;;  %v512_v18 = vadd.f32 %v491_v16, %v489_v15  ;;  %v523_v19 = vmul.f32 %v491_v16, %v491_v16 }
  0xb9   : > { %v513_v20 = vrot.slane %v512_v18, 4  ;;  %v524_v21 = vadd.f32 %v523_v19, %v522_v17 }
  0xbb   : > { %v514_v22 = vadd.f32 %v513_v20, %v512_v18  ;;  %v525_v23 = vrot.slane %v524_v21, 4 }
  0xbd   : > { %v515_v24 = vrot.slane %v514_v22, 2  ;;  %v526_v25 = vadd.f32 %v525_v23, %v524_v21 }
  0xbf   : > { %v516_v26 = vadd.f32 %v515_v24, %v514_v22  ;;  %v527_v27 = vrot.slane %v526_v25, 2 }
  0xc1   : > { %v517_v28 = vrot.slane %v516_v26, 1  ;;  %v528_v29 = vadd.f32 %v527_v27, %v526_v25 }
  0xc3   : > { %v518_v31 = vadd.f32 %v517_v28, %v516_v26  ;;  %v529_v32 = vrot.slane %v528_v29, 1 }
  0xc5   : > { %v519_v34 = vadd.f32 %v518_v31, %v511_v30  ;;  %v530_v35 = vadd.f32 %v529_v32, %v528_v29 }
  0xc7   : > { %520 = vst [vmem:[%s999_s30] sm:$0x1] %v519_v34  ;;  %v531_v36 = vadd.f32 %v530_v35, %v521_v33 }
  0xc9   : > { %532 = vst [vmem:[%s1004_s7] sm:$0x1] %v531_v36 }
  0xca PF: > { %s15_s19 = sadd.s32 1, %s931_s19   ;;  %s1044_s15 = smov %s923_s17 }
  0xcb   : > { %p12_p7 = scmp.ge.s32.totalorder %s15_s19, 18   ;;  %s1045_s16 = smov %s927_s18 }
  0xcc   : > { %s1046_s17 = smov %s1049_s20  ;;  %s1047_s18 = smov %s1053_s21 }
  0xcd   :  { %14 = sbr.rel (!%p12_p7) target bundleno = 3 (0x3), region = 97 }

// kernel: cyclegan_forward.37
= control target key start
LH: loop header
LB: loop body
LE: loop exit
PB: predicated region body
PF: predicated region fallthrough
CT: control target
= control target key end

     0   :  { %s645_s12 = smov 0   ;;  %s647_s13 = smov 0   ;;  %s702_s0 = inlined_call_operand.vmem [shape: f32[8,2,16,128], index: 0, kind: input, shape index: {}]   ;;  %s703_s1 = inlined_call_operand.vmem [shape: f32[8,2,1,128], index: 1, kind: input, shape index: {}]   ;;  %s704_s2 = inlined_call_operand.vmem [shape: f32[8,2,1,128], index: 2, kind: input, shape index: {}]   ;;  %s705_s3 = inlined_call_operand.vmem [shape: f32[8,2,16,128], index: 3, kind: output, shape index: {}]  }
   0x1   :  { %s649_s14 = smov 0   ;;  %s651_s15 = smov 0  }
   0x2   :  { %s653_s16 = smov 0  }
   0x3 LB: > { %s35_s17 = sadd.s32 1, %s615_s14  ;;  %s39_s18 = sadd.s32 1, %s619_s15  ;;  %s623_s16 = sphi %s653_s16, %s13_s16   ;;  %s619_s15 = sphi %s651_s15, %s709_s15   ;;  %s615_s14 = sphi %s649_s14, %s708_s14   ;;  %s611_s13 = sphi %s647_s13, %s707_s13   ;;  %s607_s12 = sphi %s645_s12, %s706_s12  }
   0x4   : > { %p37_p0 = scmp.ge.s32.totalorder %s35_s17, 2  ;;  %p532_p1 = scmp.ge.s32.totalorder %s623_s16, 1 }
   0x5   : > { %p225_p2 = scmp.lt.s32.totalorder %s623_s16, 17 }
   0x6   : > { %s711_s17 = smov (%p37_p0, %s35_s17), 0  ;;  %s713_s18 = smov (!%p37_p0, %s39_s18), %s619_s15 }
   0x7   : > { %p226_p3 = pnand %p532_p1, %p225_p2  ;;  %p41_p4 = scmp.ge.s32.totalorder %s713_s18, 8 }
   0x8   : > { %p292_p5 = scmp.lt.s32.totalorder (!%p226_p3), %s611_s13, 7  ;;  %p294_p6 = scmp.lt.s32.totalorder (!%p226_p3), %s607_s12, 1 }
   0x9   : > { %s715_s18 = smov (%p41_p4, %s713_s18), 0  ;;  %229 = sbr.rel (%p226_p3) target bundleno = 27 (0x1b), region = 32 }
   0xe   : > { %s717_s13 = smov (!%p292_p5, %s611_s13), 7  ;;  %s719_s12 = smov (!%p294_p6, %s607_s12), 1 }
   0xf   : > { %s534_s19 = sshll.u32 %s717_s13, 2  ;;  %s536_s20 = sshll.u32 %s717_s13, 1 }
  0x10   : > { %s533_s21 = sshll.u32 %s719_s12, 1  ;;  %s316_s22 = sadd.s32 %s536_s20, %s719_s12 }
  0x11   : > { %s304_s23 = sadd.s32 %s534_s19, %s533_s21  ;;  %s317_s26 = scalar_lea.vmem %s703_s1, %s316_s22 }
  0x12   : > { %s535_s27 = sshll.u32 %s304_s23, 3  ;;  %s327_s30 = scalar_lea.vmem %s704_s2, %s316_s22  ;;  %v583_v0 = vld [vmem:[%s317_s26] ss:$0 sm:$0xff] }
  0x13   : > { %s306_s6 = scalar_lea.vmem %s702_s0, %s535_s27  ;;  %v584_v1 = vld [vmem:[%s327_s30] ss:$0 sm:$0xff]  ;;  %s343_s9 = scalar_lea.vmem %s705_s3, %s535_s27 }
  0x14   : > { %v345_v2 = vld [vmem:[%s306_s6] sm:$0xff]  ;;  %v346_v3 = vld [vmem:[%s306_s6 + $0x8] sm:$0xff] }
  0x15   : > { %v351_v4 = vmul.f32 %v583_v0, %v345_v2  ;;  %v352_v5 = vmul.f32 %v583_v0, %v346_v3 }
  0x17   : > { %v357_v6 = vadd.f32 %v584_v1, %v351_v4  ;;  %v358_v7 = vadd.f32 %v584_v1, %v352_v5 }
  0x19   : > { %359 = vst [vmem:[%s343_s9] sm:$0xff] %v357_v6 }
  0x1a   : > { %360 = vst [vmem:[%s343_s9 + $0x8] sm:$0xff] %v358_v7 }
  0x1b PF: > { %s13_s16 = sadd.s32 1, %s623_s16   ;;  %s706_s12 = smov %s615_s14 }
  0x1c   : > { %p10_p7 = scmp.ge.s32.totalorder %s13_s16, 18   ;;  %s707_s13 = smov %s619_s15 }
  0x1d   : > { %s708_s14 = smov %s711_s17  ;;  %s709_s15 = smov %s715_s18 }
  0x1e   :  { %12 = sbr.rel (!%p10_p7) target bundleno = 3 (0x3), region = 68 }

// kernel: cyclegan_forward.38
= control target key start
LH: loop header
LB: loop body
LE: loop exit
PB: predicated region body
PF: predicated region fallthrough
CT: control target
= control target key end

     0   :  { %s925_s12 = smov 0   ;;  %s927_s13 = smov 0   ;;  %s1016_s0 = inlined_call_operand.vmem [shape: bf16[8,2,64,128], index: 0, kind: input, shape index: {}]   ;;  %s1017_s1 = inlined_call_operand.vmem [shape: bf16[8,128,128], index: 1, kind: input, shape index: {}]   ;;  %s1018_s2 = inlined_call_operand.vmem [shape: f32[8,1,128], index: 2, kind: input, shape index: {}]   ;;  %s1019_s3 = inlined_call_operand.vmem [shape: f32[8,2,64,128], index: 3, kind: output, shape index: {}]  }
   0x1   :  { %s929_s14 = smov 0   ;;  %s931_s15 = smov 0  }
   0x2   :  { %s933_s16 = smov 0  }
   0x3 LB: > { %s42_s17 = sadd.s32 1, %s895_s14  ;;  %s46_s18 = sadd.s32 1, %s899_s15  ;;  %s903_s16 = sphi %s933_s16, %s13_s16   ;;  %s899_s15 = sphi %s931_s15, %s1023_s15   ;;  %s895_s14 = sphi %s929_s14, %s1022_s14   ;;  %s891_s13 = sphi %s927_s13, %s1021_s13   ;;  %s887_s12 = sphi %s925_s12, %s1020_s12  }
   0x4   : > { %p44_p0 = scmp.ge.s32.totalorder %s42_s17, 2  ;;  %p713_p1 = scmp.ge.s32.totalorder %s903_s16, 1 }
   0x5   : > { %p229_p2 = scmp.lt.s32.totalorder %s903_s16, 17 }
   0x6   : > { %s1025_s17 = smov (%p44_p0, %s42_s17), 0  ;;  %s1027_s18 = smov (!%p44_p0, %s46_s18), %s899_s15 }
   0x7   : > { %p230_p3 = pnand %p713_p1, %p229_p2  ;;  %p48_p4 = scmp.ge.s32.totalorder %s1027_s18, 8 }
   0x8   : > { %p294_p5 = scmp.lt.s32.totalorder (!%p230_p3), %s891_s13, 7  ;;  %p296_p6 = scmp.lt.s32.totalorder (!%p230_p3), %s887_s12, 1 }
   0x9   : > { %s1029_s18 = smov (%p48_p4, %s1027_s18), 0  ;;  %233 = sbr.rel (%p230_p3) target bundleno = 201 (0xc9), region = 32 }
   0xe   : > { %s1031_s13 = smov (!%p294_p5, %s891_s13), 7  ;;  %s1033_s12 = smov (!%p296_p6, %s887_s12), 1 }
   0xf   : > { %s756_s19 = sshll.u32 %s1031_s13, 6  ;;  %s328_s25 = scalar_lea.vmem %s1018_s2, %s1031_s13 }
  0x10   : > { %s961_s22 = scalar_lea.vmem %s1017_s1, %s756_s19  ;;  %s714_s26 = sshll.u32 %s1033_s12, 3  ;;  %v848_v32 = vld [vmem:[%s328_s25] ss:$0 sm:$0xff] }
  0x11   : > { %v764_v0 = vld [vmem:[%s961_s22 + $0x38] sm:$0xff]  ;;  %v763_v1 = vld [vmem:[%s961_s22 + $0x30] sm:$0xff]  ;;  %v762_v2 = vld [vmem:[%s961_s22 + $0x28] sm:$0xff]  ;;  %s715_s27 = sshll.u32 %s1031_s13, 4 }
  0x12   : > { %458 = vmatpush.bf16.msra.mxu0 %v764_v0  ;;  %784 = vmatpush.bf16.msra.mxu1 %v764_v0  ;;  %s971_s28 = sadd.s32 %s715_s27, %s714_s26  ;;  %v761_v3 = vld [vmem:[%s961_s22 + $0x20] sm:$0xff]  ;;  %v760_v4 = vld [vmem:[%s961_s22 + $0x18] sm:$0xff]  ;;  %v759_v5 = vld [vmem:[%s961_s22 + $0x10] sm:$0xff] }
  0x13   : > { %785 = vmatpush.bf16.msra.mxu2 %v764_v0  ;;  %786 = vmatpush.bf16.msra.mxu3 %v764_v0  ;;  %s716_s29 = sshll.u32 %s971_s28, 2  ;;  %v758_v14 = vld [vmem:[%s961_s22 + $0x8] sm:$0xff]  ;;  %v757_v23 = vld [vmem:[%s961_s22] sm:$0xff]  ;;  %s721_s8 = sshll.u32 %s971_s28, 3 }
  0x14   : > { %s308_s5 = scalar_lea.vmem %s1016_s0, %s716_s29  ;;  %s991_s11 = scalar_lea.vmem %s1019_s3, %s721_s8 }
  0x15   : > { %v766_v6 = vld [vmem:[%s308_s5] sm:$0xff]   ;;  %v781_v7 = vld [vmem:[%s308_s5 + $0x8] sm:$0xff]   ;;  %v782_v8 = vld [vmem:[%s308_s5 + $0x10] sm:$0xff]  }
  0x16   : > { %459 = vmatpush.bf16.msra.mxu0 %v763_v1  ;;  %787 = vmatpush.bf16.msra.mxu1 %v763_v1  ;;  %v783_v9 = vld [vmem:[%s308_s5 + $0x18] sm:$0xff]   ;;  %v767_v10 = vunpack.c.l.bf16 %v766_v6  ;;  %v768_v11 = vunpack.c.h.bf16 %v766_v6  ;;  %v771_v12 = vunpack.c.l.bf16 %v781_v7  ;;  %v772_v13 = vunpack.c.h.bf16 %v781_v7 }
  0x17   : > { %788 = vmatpush.bf16.msra.mxu2 %v763_v1  ;;  %789 = vmatpush.bf16.msra.mxu3 %v763_v1  ;;  %v775_v15 = vunpack.c.l.bf16 %v782_v8  ;;  %v776_v16 = vunpack.c.h.bf16 %v782_v8  ;;  %v779_v17 = vunpack.c.l.bf16 %v783_v9  ;;  %v780_v18 = vunpack.c.h.bf16 %v783_v9 }
  0x18   : > { %v374_v19 = vmax.f32 %v767_v10, 0.0  ;;  %v375_v20 = vmax.f32 %v768_v11, 0.0  ;;  %v376_v21 = vmax.f32 %v771_v12, 0.0  ;;  %v377_v22 = vmax.f32 %v772_v13, 0.0 }
  0x19   : > { %v378_v24 = vmax.f32 %v775_v15, 0.0  ;;  %v379_v25 = vmax.f32 %v776_v16, 0.0  ;;  %v380_v26 = vmax.f32 %v779_v17, 0.0  ;;  %v381_v27 = vmax.f32 %v780_v18, 0.0 }
  0x1a   : > { %460 = vmatpush.bf16.msra.mxu0 %v762_v2  ;;  %790 = vmatpush.bf16.msra.mxu1 %v762_v2  ;;  %v382_v28 = vpack.c.bf16 %v375_v20, %v374_v19  ;;  %v383_v29 = vpack.c.bf16 %v377_v22, %v376_v21 }
  0x1b   : > { %791 = vmatpush.bf16.msra.mxu2 %v762_v2  ;;  %792 = vmatpush.bf16.msra.mxu3 %v762_v2  ;;  %v384_v30 = vpack.c.bf16 %v379_v25, %v378_v24  ;;  %v385_v31 = vpack.c.bf16 %v381_v27, %v380_v26 }
  0x1e   : > { %461 = vmatpush.bf16.msra.mxu0 %v761_v3  ;;  %793 = vmatpush.bf16.msra.mxu1 %v761_v3 }
  0x1f   : > { %794 = vmatpush.bf16.msra.mxu2 %v761_v3  ;;  %795 = vmatpush.bf16.msra.mxu3 %v761_v3 }
  0x22   : > { %462 = vmatpush.bf16.msra.mxu0 %v760_v4  ;;  %796 = vmatpush.bf16.msra.mxu1 %v760_v4 }
  0x23   : > { %797 = vmatpush.bf16.msra.mxu2 %v760_v4  ;;  %798 = vmatpush.bf16.msra.mxu3 %v760_v4 }
  0x26   : > { %463 = vmatpush.bf16.msra.mxu0 %v759_v5  ;;  %799 = vmatpush.bf16.msra.mxu1 %v759_v5 }
  0x27   : > { %800 = vmatpush.bf16.msra.mxu2 %v759_v5  ;;  %801 = vmatpush.bf16.msra.mxu3 %v759_v5 }
  0x2a   : > { %464 = vmatpush.bf16.msra.mxu0 %v758_v14  ;;  %802 = vmatpush.bf16.msra.mxu1 %v758_v14 }
  0x2b   : > { %803 = vmatpush.bf16.msra.mxu2 %v758_v14  ;;  %804 = vmatpush.bf16.msra.mxu3 %v758_v14 }
  0x2e   : > { %465 = vmatpush.bf16.msra.mxu0 %v757_v23  ;;  %805 = vmatpush.bf16.msra.mxu1 %v757_v23 }
  0x2f   : > { %806 = vmatpush.bf16.msra.mxu2 %v757_v23  ;;  %807 = vmatpush.bf16.msra.mxu3 %v757_v23 }
  0x31   : > { %466 = vmatmul.bf16.vlgmr.msra.gmra.mxu0 %v382_v28  ;;  %471 = vmatmul.bf16.vlgmr.msra.gmra.mxu1 %v383_v29 }
  0x32   : > { %476 = vmatmul.bf16.vlgmr.msra.gmra.mxu2 %v384_v30  ;;  %481 = vmatmul.bf16.vlgmr.msra.gmra.mxu3 %v385_v31 }
  0xae   : > { %v467_v33 = vpop.f32.mrf.mxu0  ;;  %v472_v34 = vpop.f32.mrf.mxu1 }
  0xaf   : > { %v518_v35 = vadd.f32 %v848_v32, %v467_v33  ;;  %v520_v36 = vadd.f32 %v848_v32, %v472_v34 }
  0xb1   : > { %849 = vtanh.f32 %v518_v35 }
  0xb2   : > { %851 = vtanh.f32 %v520_v36 }
  0xb5   : > { %v477_v37 = vpop.f32.mrf.mxu2  ;;  %v482_v38 = vpop.f32.mrf.mxu3 }
  0xb6   : > { %v522_v39 = vadd.f32 %v848_v32, %v477_v37  ;;  %v524_v40 = vadd.f32 %v848_v32, %v482_v38  ;;  %v469_v41 = vpop.f32.mrf.mxu0  ;;  %v474_v42 = vpop.f32.mrf.mxu1 }
  0xb7   : > { %v850_v43 = vpop.eup %849  ;;  %v519_v44 = vadd.f32 %v848_v32, %v469_v41  ;;  %v521_v45 = vadd.f32 %v848_v32, %v474_v42 }
  0xb8   : > { %v852_v46 = vpop.eup %851  ;;  %534 = vst [vmem:[%s991_s11] sm:$0xff] %v850_v43  ;;  %853 = vtanh.f32 %v522_v39 }
  0xb9   : > { %536 = vst [vmem:[%s991_s11 + $0x10] sm:$0xff] %v852_v46  ;;  %855 = vtanh.f32 %v524_v40 }
  0xba   : > { %857 = vtanh.f32 %v519_v44 }
  0xbb   : > { %859 = vtanh.f32 %v521_v45 }
  0xbd   : > { %v479_v47 = vpop.f32.mrf.mxu2  ;;  %v484_v48 = vpop.f32.mrf.mxu3 }
  0xbe   : > { %v854_v49 = vpop.eup %853  ;;  %v523_v50 = vadd.f32 %v848_v32, %v479_v47  ;;  %v525_v51 = vadd.f32 %v848_v32, %v484_v48 }
  0xbf   : > { %v856_v52 = vpop.eup %855  ;;  %538 = vst [vmem:[%s991_s11 + $0x20] sm:$0xff] %v854_v49 }
  0xc0   : > { %v858_v53 = vpop.eup %857  ;;  %540 = vst [vmem:[%s991_s11 + $0x30] sm:$0xff] %v856_v52  ;;  %861 = vtanh.f32 %v523_v50 }
  0xc1   : > { %v860_v54 = vpop.eup %859  ;;  %535 = vst [vmem:[%s991_s11 + $0x8] sm:$0xff] %v858_v53  ;;  %863 = vtanh.f32 %v525_v51 }
  0xc2   : > { %537 = vst [vmem:[%s991_s11 + $0x18] sm:$0xff] %v860_v54 }
  0xc6   : > { %v862_v55 = vpop.eup %861 }
  0xc7   : > { %v864_v56 = vpop.eup %863  ;;  %539 = vst [vmem:[%s991_s11 + $0x28] sm:$0xff] %v862_v55 }
  0xc8   : > { %541 = vst [vmem:[%s991_s11 + $0x38] sm:$0xff] %v864_v56 }
  0xc9 PF: > { %s13_s16 = sadd.s32 1, %s903_s16   ;;  %s1020_s12 = smov %s895_s14 }
  0xca   : > { %p10_p7 = scmp.ge.s32.totalorder %s13_s16, 18   ;;  %s1021_s13 = smov %s899_s15 }
  0xcb   : > { %s1022_s14 = smov %s1025_s17  ;;  %s1023_s15 = smov %s1029_s18 }
  0xcc   :  { %12 = sbr.rel (!%p10_p7) target bundleno = 3 (0x3), region = 76 }

// kernel: squeeze.4
= control target key start
LH: loop header
LB: loop body
LE: loop exit
PB: predicated region body
PF: predicated region fallthrough
CT: control target
= control target key end

     0   :  { %vm5_vm0 = vcmask 1047556   ;;  %s1261_s14 = smov 14   ;;  %s2134_s0 = inlined_call_operand.vmem [shape: f32[1,2,8,2,8,2,3], index: 0, kind: input, shape index: {}]   ;;  %s2135_s1 = inlined_call_operand.hbm [shape: f32[2,16,16,3], index: 1, kind: output, shape index: {}]  }
   0x1   :  { %v1063_v0 = vld [vmem:[%s2134_s0 + $0x207] ss:$8 sm:$0xf]  }
   0x2   :  { %v1064_v1 = vld [vmem:[%s2134_s0 + $0x207] ss:$8 sm:$0xf0]  }
   0x3   :  { %v1059_v2 = vld [vmem:[%s2134_s0 + $0x7] ss:$8 sm:$0xf]   ;;  %v134_v3 = vsel %vm5_vm0, %v1064_v1, %v1063_v0 }
   0x4   :  { %v1060_v4 = vld [vmem:[%s2134_s0 + $0x7] ss:$8 sm:$0xf0]   ;;  %135 = vrot.lane.b32.xlu1 %v134_v3, %s1261_s14 }
   0x5   :  { %v113_v5 = vsel %vm5_vm0, %v1060_v4, %v1059_v2  ;;  %v1065_v6 = vld [vmem:[%s2134_s0 + $0x47] ss:$8 sm:$0xf]  }
   0x6   :  { %114 = vrot.lane.b32.xlu0 %v113_v5, %s1261_s14  ;;  %v1066_v7 = vld [vmem:[%s2134_s0 + $0x47] ss:$8 sm:$0xf0]  }
   0x7   :  { %v1061_v8 = vld [vmem:[%s2134_s0 + $0x107] ss:$8 sm:$0xf]   ;;  %v145_v12 = vsel %vm5_vm0, %v1066_v7, %v1065_v6 }
   0x8   :  { %v1062_v9 = vld [vmem:[%s2134_s0 + $0x107] ss:$8 sm:$0xf0]  }
   0x9   :  { %v1067_v10 = vld [vmem:[%s2134_s0 + $0x147] ss:$8 sm:$0xf]   ;;  %v123_v14 = vsel %vm5_vm0, %v1062_v9, %v1061_v8 }
   0xa   :  { %v1068_v11 = vld [vmem:[%s2134_s0 + $0x147] ss:$8 sm:$0xf0]  }
   0xb   :  { %v156_v13 = vsel %vm5_vm0, %v1068_v11, %v1067_v10  ;;  %v1069_v15 = vld [vmem:[%s2134_s0 + $0x247] ss:$8 sm:$0xf]  }
   0xc   :  { %157 = vrot.lane.b32.xlu2 %v156_v13, %s1261_s14  ;;  %146 = vrot.lane.b32.xlu1 %v145_v12, %s1261_s14  ;;  %v1070_v16 = vld [vmem:[%s2134_s0 + $0x247] ss:$8 sm:$0xf0]  }
   0xd   :  { %v1073_v17 = vld [vmem:[%s2134_s0 + $0x187] ss:$8 sm:$0xf]   ;;  %v167_v21 = vsel %vm5_vm0, %v1070_v16, %v1069_v15 }
   0xe   :  { %124 = vrot.lane.b32.xlu0 %v123_v14, %s1261_s14  ;;  %v1074_v18 = vld [vmem:[%s2134_s0 + $0x187] ss:$8 sm:$0xf0]  }
   0xf   :  { %v1071_v19 = vld [vmem:[%s2134_s0 + $0x87] ss:$8 sm:$0xf]   ;;  %v189_v22 = vsel %vm5_vm0, %v1074_v18, %v1073_v17 }
  0x10   :  { %v1072_v20 = vld [vmem:[%s2134_s0 + $0x87] ss:$8 sm:$0xf0]  }
  0x11   :  { %v178_v23 = vsel %vm5_vm0, %v1072_v20, %v1071_v19  ;;  %v1075_v24 = vld [vmem:[%s2134_s0 + $0x287] ss:$8 sm:$0xf]  }
  0x12   :  { %v1076_v25 = vld [vmem:[%s2134_s0 + $0x287] ss:$8 sm:$0xf0]  }
  0x14   :  { %168 = vrot.lane.b32.xlu2 %v167_v21, %s1261_s14  ;;  %190 = vrot.lane.b32.xlu1 %v189_v22, %s1261_s14 }
  0x15   :  { %2 = vsyncpa [#allocation1], 0  ;;  %v1079_v26 = vld [vmem:[%s2134_s0 + $0x1c7] ss:$8 sm:$0xf]   ;;  %v200_v30 = vsel %vm5_vm0, %v1076_v25, %v1075_v24  ;;  %vm7_vm1 = vcmask 15360  }
  0x16   :  { %179 = vrot.lane.b32.xlu0 %v178_v23, %s1261_s14  ;;  %v1080_v27 = vld [vmem:[%s2134_s0 + $0x1c7] ss:$8 sm:$0xf0]   ;;  %v1085_v35 = vld [vmem:[%s2134_s0 + $0x106] ss:$8 sm:$0xf]  }
  0x17   :  { %v1077_v28 = vld [vmem:[%s2134_s0 + $0xc7] ss:$8 sm:$0xf]   ;;  %v222_v31 = vsel %vm5_vm0, %v1080_v27, %v1079_v26  ;;  %v1086_v36 = vld [vmem:[%s2134_s0 + $0x106] ss:$8 sm:$0xf0]  }
  0x18   :  { %v1078_v29 = vld [vmem:[%s2134_s0 + $0xc7] ss:$8 sm:$0xf0]   ;;  %v1083_v37 = vld [vmem:[%s2134_s0 + $0x6] ss:$8 sm:$0xf]   ;;  %v254_v40 = vsel %vm5_vm0, %v1086_v36, %v1085_v35 }
  0x19   :  { %v211_v32 = vsel %vm5_vm0, %v1078_v29, %v1077_v28  ;;  %v1081_v33 = vld [vmem:[%s2134_s0 + $0x2c7] ss:$8 sm:$0xf]   ;;  %v1084_v38 = vld [vmem:[%s2134_s0 + $0x6] ss:$8 sm:$0xf0]  }
  0x1a   :  { %v1082_v34 = vld [vmem:[%s2134_s0 + $0x2c7] ss:$8 sm:$0xf0]   ;;  %v244_v41 = vsel %vm5_vm0, %v1084_v38, %v1083_v37  ;;  %v1087_v42 = vld [vmem:[%s2134_s0 + $0x206] ss:$8 sm:$0xf]  }
  0x1b   :  { %v233_v39 = vsel %vm5_vm0, %v1082_v34, %v1081_v33  ;;  %v1088_v43 = vld [vmem:[%s2134_s0 + $0x206] ss:$8 sm:$0xf0]   ;;  %v1109_v7 = vld [vmem:[%s2134_s0 + $0x105] ss:$8 sm:$0xf]  }
  0x1c   :  { %201 = vrot.lane.b32.xlu2 %v200_v30, %s1261_s14  ;;  %223 = vrot.lane.b32.xlu1 %v222_v31, %s1261_s14  ;;  %v1091_v44 = vld [vmem:[%s2134_s0 + $0x146] ss:$8 sm:$0xf]   ;;  %v265_v48 = vsel %vm5_vm0, %v1088_v43, %v1087_v42  ;;  %v1110_v8 = vld [vmem:[%s2134_s0 + $0x105] ss:$8 sm:$0xf0]  }
  0x1d   :  { %v1092_v45 = vld [vmem:[%s2134_s0 + $0x146] ss:$8 sm:$0xf0]   ;;  %v1107_v9 = vld [vmem:[%s2134_s0 + $0x5] ss:$8 sm:$0xf]   ;;  %v385_v12 = vsel %vm5_vm0, %v1110_v8, %v1109_v7 }
  0x1e   :  { %212 = vrot.lane.b32.xlu0 %v211_v32, %s1261_s14  ;;  %v1089_v46 = vld [vmem:[%s2134_s0 + $0x46] ss:$8 sm:$0xf]   ;;  %v287_v49 = vsel %vm5_vm0, %v1092_v45, %v1091_v44  ;;  %v1108_v10 = vld [vmem:[%s2134_s0 + $0x5] ss:$8 sm:$0xf0]  }
  0x1f   :  { %v1090_v47 = vld [vmem:[%s2134_s0 + $0x46] ss:$8 sm:$0xf0]   ;;  %v375_v13 = vsel %vm5_vm0, %v1108_v10, %v1107_v9  ;;  %v1111_v14 = vld [vmem:[%s2134_s0 + $0x205] ss:$8 sm:$0xf]  }
  0x20   :  { %v276_v50 = vsel %vm5_vm0, %v1090_v47, %v1089_v46  ;;  %v1093_v51 = vld [vmem:[%s2134_s0 + $0x246] ss:$8 sm:$0xf]   ;;  %v1112_v15 = vld [vmem:[%s2134_s0 + $0x205] ss:$8 sm:$0xf0]  }
  0x21   :  { %v1094_v52 = vld [vmem:[%s2134_s0 + $0x246] ss:$8 sm:$0xf0]   ;;  %v1115_v16 = vld [vmem:[%s2134_s0 + $0x145] ss:$8 sm:$0xf]   ;;  %v396_v20 = vsel %vm5_vm0, %v1112_v15, %v1111_v14 }
  0x22   :  { %v1097_v53 = vld [vmem:[%s2134_s0 + $0x186] ss:$8 sm:$0xf]   ;;  %v298_v57 = vsel %vm5_vm0, %v1094_v52, %v1093_v51  ;;  %v1116_v17 = vld [vmem:[%s2134_s0 + $0x145] ss:$8 sm:$0xf0]  }
  0x23   :  { %v1098_v54 = vld [vmem:[%s2134_s0 + $0x186] ss:$8 sm:$0xf0]   ;;  %v1113_v18 = vld [vmem:[%s2134_s0 + $0x45] ss:$8 sm:$0xf]   ;;  %v418_v21 = vsel %vm5_vm0, %v1116_v17, %v1115_v16 }
  0x24   :  { %234 = vrot.lane.b32.xlu2 %v233_v39, %s1261_s14  ;;  %s1262_s14 = smov 12   ;;  %v1095_v55 = vld [vmem:[%s2134_s0 + $0x86] ss:$8 sm:$0xf]   ;;  %v320_v58 = vsel %vm5_vm0, %v1098_v54, %v1097_v53  ;;  %vm116_vm2 = vcmask 130160   ;;  %vm247_vm3 = vcmask 113760  }
  0x25   :  { %255 = vrot.lane.b32.xlu1 %v254_v40, %s1262_s14  ;;  %v1096_v56 = vld [vmem:[%s2134_s0 + $0x86] ss:$8 sm:$0xf0]   ;;  %v1114_v19 = vld [vmem:[%s2134_s0 + $0x45] ss:$8 sm:$0xf0]  }
  0x26   :  { %245 = vrot.lane.b32.xlu0 %v244_v41, %s1262_s14  ;;  %v309_v59 = vsel %vm5_vm0, %v1096_v56, %v1095_v55  ;;  %v1099_v60 = vld [vmem:[%s2134_s0 + $0x286] ss:$8 sm:$0xf]   ;;  %v407_v22 = vsel %vm5_vm0, %v1114_v19, %v1113_v18  ;;  %v1117_v23 = vld [vmem:[%s2134_s0 + $0x245] ss:$8 sm:$0xf]  }
  0x27   :  { %v1100_v61 = vld [vmem:[%s2134_s0 + $0x286] ss:$8 sm:$0xf0]   ;;  %v1118_v24 = vld [vmem:[%s2134_s0 + $0x245] ss:$8 sm:$0xf0]  }
  0x28   :  { %v1103_v62 = vld [vmem:[%s2134_s0 + $0x1c6] ss:$8 sm:$0xf]   ;;  %v331_v2 = vsel %vm5_vm0, %v1100_v61, %v1099_v60  ;;  %v1121_v25 = vld [vmem:[%s2134_s0 + $0x185] ss:$8 sm:$0xf]   ;;  %v429_v29 = vsel %vm5_vm0, %v1118_v24, %v1117_v23 }
  0x29   :  { %v1104_v63 = vld [vmem:[%s2134_s0 + $0x1c6] ss:$8 sm:$0xf0]   ;;  %v1122_v26 = vld [vmem:[%s2134_s0 + $0x185] ss:$8 sm:$0xf0]  }
  0x2a   :  { %v1101_v0 = vld [vmem:[%s2134_s0 + $0xc6] ss:$8 sm:$0xf]   ;;  %v353_v3 = vsel %vm5_vm0, %v1104_v63, %v1103_v62  ;;  %v1119_v27 = vld [vmem:[%s2134_s0 + $0x85] ss:$8 sm:$0xf]   ;;  %v451_v30 = vsel %vm5_vm0, %v1122_v26, %v1121_v25 }
  0x2b   :  { %v1102_v1 = vld [vmem:[%s2134_s0 + $0xc6] ss:$8 sm:$0xf0]   ;;  %v1120_v28 = vld [vmem:[%s2134_s0 + $0x85] ss:$8 sm:$0xf0]  }
  0x2c   :  { %266 = vrot.lane.b32.xlu2 %v265_v48, %s1262_s14  ;;  %v342_v4 = vsel %vm5_vm0, %v1102_v1, %v1101_v0  ;;  %v1105_v5 = vld [vmem:[%s2134_s0 + $0x2c6] ss:$8 sm:$0xf]   ;;  %v440_v31 = vsel %vm5_vm0, %v1120_v28, %v1119_v27  ;;  %v1127_v32 = vld [vmem:[%s2134_s0 + $0x1c5] ss:$8 sm:$0xf]  }
  0x2d   :  { %288 = vrot.lane.b32.xlu1 %v287_v49, %s1262_s14  ;;  %v1106_v6 = vld [vmem:[%s2134_s0 + $0x2c6] ss:$8 sm:$0xf0]   ;;  %v1128_v33 = vld [vmem:[%s2134_s0 + $0x1c5] ss:$8 sm:$0xf0]  }
  0x2e   :  { %277 = vrot.lane.b32.xlu0 %v276_v50, %s1262_s14  ;;  %v364_v11 = vsel %vm5_vm0, %v1106_v6, %v1105_v5  ;;  %v1123_v34 = vld [vmem:[%s2134_s0 + $0x285] ss:$8 sm:$0xf]   ;;  %v1045_v38 = vld [vmem:[%s2134_s0 + $0x140] ss:$8 sm:$0xf]   ;;  %v484_v47 = vsel %vm5_vm0, %v1128_v33, %v1127_v32 }
  0x2f   :  { %v1124_v35 = vld [vmem:[%s2134_s0 + $0x285] ss:$8 sm:$0xf0]   ;;  %v1046_v39 = vld [vmem:[%s2134_s0 + $0x140] ss:$8 sm:$0xf0]  }
  0x30   :  { %v1125_v36 = vld [vmem:[%s2134_s0 + $0xc5] ss:$8 sm:$0xf]   ;;  %v1051_v40 = vld [vmem:[%s2134_s0 + $0x200] ss:$8 sm:$0xf]   ;;  %v462_v41 = vsel %vm5_vm0, %v1124_v35, %v1123_v34  ;;  %v50_v42 = vsel %vm5_vm0, %v1046_v39, %v1045_v38 }
  0x31   :  { %v1126_v37 = vld [vmem:[%s2134_s0 + $0xc5] ss:$8 sm:$0xf0]   ;;  %v1052_v43 = vld [vmem:[%s2134_s0 + $0x200] ss:$8 sm:$0xf0]  }
  0x32   :  { %v3_v44 = vld [vmem:[%s2134_s0] ss:$8 sm:$0xf]   ;;  %53 = vst.msk [vmem:[#allocation0 + $0x28] sm:$0xff] %vm7_vm1, %v50_v42   ;;  %v77_v45 = vsel %vm5_vm0, %v1052_v43, %v1051_v40  ;;  %v473_v49 = vsel %vm5_vm0, %v1126_v37, %v1125_v36  ;;  %vm378_vm4 = vcmask 97360   ;;  %vm509_vm5 = vcmask 80960  }
  0x33   :  { %v4_v46 = vld [vmem:[%s2134_s0] ss:$8 sm:$0xf0]   ;;  %80 = vst.msk [vmem:[#allocation0 + $0x40] sm:$0xff] %vm7_vm1, %v77_v45   ;;  %vm640_vm6 = vcmask 64560   ;;  %vm771_vm7 = vcmask 48160  }
  0x34   :  { %299 = vrot.lane.b32.xlu2 %v298_v57, %s1262_s14  ;;  %v6_v48 = vsel %vm5_vm0, %v4_v46, %v3_v44  ;;  %v1133_v50 = vld [vmem:[%s2134_s0 + $0x104] ss:$8 sm:$0xf]   ;;  %v1129_v52 = vld [vmem:[%s2134_s0 + $0x2c5] ss:$8 sm:$0xf]  }
  0x35   :  { %321 = vrot.lane.b32.xlu1 %v320_v58, %s1262_s14  ;;  %8 = vst.msk [vmem:[#allocation0] sm:$0xff] %vm7_vm1, %v6_v48   ;;  %v1134_v51 = vld [vmem:[%s2134_s0 + $0x104] ss:$8 sm:$0xf0]   ;;  %vm902_vm8 = vcmask 31760   ;;  %s1030_s1 = sshll.u32 %s2135_s1, 4  ;;  %s1031_s1 = int_to_ptr.hbm [resolvable:$true] %s1030_s1 }
  0x36   :  { %310 = vrot.lane.b32.xlu0 %v309_v59, %s1262_s14  ;;  %v1130_v53 = vld [vmem:[%s2134_s0 + $0x2c5] ss:$8 sm:$0xf0]   ;;  %v1131_v54 = vld [vmem:[%s2134_s0 + $0x4] ss:$8 sm:$0xf]   ;;  %v516_v1 = vsel %vm5_vm0, %v1134_v51, %v1133_v50 }
  0x37   :  { %v1132_v55 = vld [vmem:[%s2134_s0 + $0x4] ss:$8 sm:$0xf0]   ;;  %v1053_v56 = vld [vmem:[%s2134_s0 + $0x240] ss:$8 sm:$0xf]   ;;  %v495_v61 = vsel %vm5_vm0, %v1130_v53, %v1129_v52 }
  0x38   :  { %v1054_v57 = vld [vmem:[%s2134_s0 + $0x240] ss:$8 sm:$0xf0]   ;;  %v1140_v5 = vld [vmem:[%s2134_s0 + $0x144] ss:$8 sm:$0xf0]  }
  0x39   :  { %v86_v58 = vsel %vm5_vm0, %v1054_v57, %v1053_v56  ;;  %v1037_v59 = vld [vmem:[%s2134_s0 + $0x40] ss:$8 sm:$0xf]   ;;  %v1135_v7 = vld [vmem:[%s2134_s0 + $0x204] ss:$8 sm:$0xf]  }
  0x3a   :  { %v1038_v60 = vld [vmem:[%s2134_s0 + $0x40] ss:$8 sm:$0xf0]   ;;  %89 = vst.msk [vmem:[#allocation0 + $0x48] sm:$0xff] %vm7_vm1, %v86_v58  }
  0x3b   :  { %v14_v62 = vsel %vm5_vm0, %v1038_v60, %v1037_v59  ;;  %v1043_v63 = vld [vmem:[%s2134_s0 + $0x100] ss:$8 sm:$0xf]   ;;  %v1136_v8 = vld [vmem:[%s2134_s0 + $0x204] ss:$8 sm:$0xf0]  }
  0x3c   :  { %332 = vrot.lane.b32.xlu2 %v331_v2, %s1262_s14  ;;  %17 = vst.msk [vmem:[#allocation0 + $0x8] sm:$0xff] %vm7_vm1, %v14_v62   ;;  %v1044_v0 = vld [vmem:[%s2134_s0 + $0x100] ss:$8 sm:$0xf0]   ;;  %v527_v14 = vsel %vm5_vm0, %v1136_v8, %v1135_v7 }
  0x3d   :  { %354 = vrot.lane.b32.xlu1 %v353_v3, %s1262_s14  ;;  %v41_v2 = vsel %vm5_vm0, %v1044_v0, %v1043_v63  ;;  %v506_v3 = vsel %vm5_vm0, %v1132_v55, %v1131_v54  ;;  %v1137_v9 = vld [vmem:[%s2134_s0 + $0x44] ss:$8 sm:$0xf]   ;;  %v1048_v16 = vld [vmem:[%s2134_s0 + $0x180] ss:$8 sm:$0xf0]  }
  0x3e   :  { %343 = vrot.lane.b32.xlu0 %v342_v4, %s1262_s14  ;;  %44 = vst.msk [vmem:[#allocation0 + $0x20] sm:$0xff] %vm7_vm1, %v41_v2   ;;  %v1139_v4 = vld [vmem:[%s2134_s0 + $0x144] ss:$8 sm:$0xf]  }
  0x3f   :  { %v1138_v10 = vld [vmem:[%s2134_s0 + $0x44] ss:$8 sm:$0xf0]   ;;  %v1039_v17 = vld [vmem:[%s2134_s0 + $0x80] ss:$8 sm:$0xf]  }
  0x40   :  { %v1040_v19 = vld [vmem:[%s2134_s0 + $0x80] ss:$8 sm:$0xf0]   ;;  %v1145_v23 = vld [vmem:[%s2134_s0 + $0x184] ss:$8 sm:$0xf]  }
  0x41   :  { %v1146_v24 = vld [vmem:[%s2134_s0 + $0x184] ss:$8 sm:$0xf0]   ;;  %v1049_v32 = vld [vmem:[%s2134_s0 + $0x1c0] ss:$8 sm:$0xf]  }
  0x42   :  { %v1141_v26 = vld [vmem:[%s2134_s0 + $0x244] ss:$8 sm:$0xf]   ;;  %v1050_v35 = vld [vmem:[%s2134_s0 + $0x1c0] ss:$8 sm:$0xf0]   ;;  %v582_v39 = vsel %vm5_vm0, %v1146_v24, %v1145_v23 }
  0x43   :  { %v1142_v27 = vld [vmem:[%s2134_s0 + $0x244] ss:$8 sm:$0xf0]   ;;  %v1041_v36 = vld [vmem:[%s2134_s0 + $0xc0] ss:$8 sm:$0xf]   ;;  %v68_v37 = vsel %vm5_vm0, %v1050_v35, %v1049_v32 }
  0x44   :  { %365 = vrot.lane.b32.xlu2 %v364_v11, %s1262_s14  ;;  %s1263_s14 = smov 10   ;;  %v1055_v11 = vld [vmem:[%s2134_s0 + $0x280] ss:$8 sm:$0xf]   ;;  %v560_v33 = vsel %vm5_vm0, %v1142_v27, %v1141_v26  ;;  %71 = vst.msk [vmem:[#allocation0 + $0x38] sm:$0xff] %vm7_vm1, %v68_v37  }
  0x45   :  { %386 = vrot.lane.b32.xlu1 %v385_v12, %s1263_s14  ;;  %v1056_v12 = vld [vmem:[%s2134_s0 + $0x280] ss:$8 sm:$0xf0]   ;;  %v1143_v28 = vld [vmem:[%s2134_s0 + $0x84] ss:$8 sm:$0xf]  }
  0x46   :  { %376 = vrot.lane.b32.xlu0 %v375_v13, %s1263_s14  ;;  %v1047_v13 = vld [vmem:[%s2134_s0 + $0x180] ss:$8 sm:$0xf]   ;;  %v95_v15 = vsel %vm5_vm0, %v1056_v12, %v1055_v11  ;;  %v1147_v43 = vld [vmem:[%s2134_s0 + $0x284] ss:$8 sm:$0xf]  }
  0x47   :  { %98 = vst.msk [vmem:[#allocation0 + $0x50] sm:$0xff] %vm7_vm1, %v95_v15   ;;  %v59_v18 = vsel %vm5_vm0, %v1048_v16, %v1047_v13  ;;  %v1042_v38 = vld [vmem:[%s2134_s0 + $0xc0] ss:$8 sm:$0xf0]  }
  0x48   :  { %62 = vst.msk [vmem:[#allocation0 + $0x30] sm:$0xff] %vm7_vm1, %v59_v18   ;;  %v32_v40 = vsel %vm5_vm0, %v1042_v38, %v1041_v36  ;;  %v1148_v44 = vld [vmem:[%s2134_s0 + $0x284] ss:$8 sm:$0xf0]  }
  0x49   :  { %35 = vst.msk [vmem:[#allocation0 + $0x18] sm:$0xff] %vm7_vm1, %v32_v40   ;;  %v1151_v45 = vld [vmem:[%s2134_s0 + $0x1c4] ss:$8 sm:$0xf]   ;;  %v593_v51 = vsel %vm5_vm0, %v1148_v44, %v1147_v43 }
  0x4a   :  { %v1149_v48 = vld [vmem:[%s2134_s0 + $0xc4] ss:$8 sm:$0xf]   ;;  %v1157_v57 = vld [vmem:[%s2134_s0 + $0x103] ss:$8 sm:$0xf]  }
  0x4b   :  { %v1150_v50 = vld [vmem:[%s2134_s0 + $0xc4] ss:$8 sm:$0xf0]   ;;  %v1158_v59 = vld [vmem:[%s2134_s0 + $0x103] ss:$8 sm:$0xf0]  }
  0x4c   :  { %397 = vrot.lane.b32.xlu2 %v396_v20, %s1263_s14  ;;  %v549_v20 = vsel %vm5_vm0, %v1140_v5, %v1139_v4  ;;  %v604_v53 = vsel %vm5_vm0, %v1150_v50, %v1149_v48  ;;  %v1153_v55 = vld [vmem:[%s2134_s0 + $0x2c4] ss:$8 sm:$0xf]   ;;  %v1155_v60 = vld [vmem:[%s2134_s0 + $0x3] ss:$8 sm:$0xf]   ;;  %v647_v0 = vsel %vm5_vm0, %v1158_v59, %v1157_v57 }
  0x4d   :  { %419 = vrot.lane.b32.xlu1 %v418_v21, %s1263_s14  ;;  %v23_v21 = vsel %vm5_vm0, %v1040_v19, %v1039_v17  ;;  %v1154_v56 = vld [vmem:[%s2134_s0 + $0x2c4] ss:$8 sm:$0xf0]   ;;  %v1156_v62 = vld [vmem:[%s2134_s0 + $0x3] ss:$8 sm:$0xf0]  }
  0x4e   :  { %408 = vrot.lane.b32.xlu0 %v407_v22, %s1263_s14  ;;  %v538_v22 = vsel %vm5_vm0, %v1138_v10, %v1137_v9  ;;  %26 = vst.msk [vmem:[#allocation0 + $0x10] sm:$0xff] %vm7_vm1, %v23_v21   ;;  %v626_v63 = vsel %vm5_vm0, %v1154_v56, %v1153_v55  ;;  %v1160_v4 = vld [vmem:[%s2134_s0 + $0x203] ss:$8 sm:$0xf0]  }
  0x4f   :  { %v1163_v5 = vld [vmem:[%s2134_s0 + $0x143] ss:$8 sm:$0xf]   ;;  %v1182_v43 = vld [vmem:[%s2134_s0 + $0x102] ss:$8 sm:$0xf0]  }
  0x50   :  { %v1164_v7 = vld [vmem:[%s2134_s0 + $0x143] ss:$8 sm:$0xf0]   ;;  %v1179_v44 = vld [vmem:[%s2134_s0 + $0x2] ss:$8 sm:$0xf]  }
  0x51   :  { %v1161_v8 = vld [vmem:[%s2134_s0 + $0x43] ss:$8 sm:$0xf]   ;;  %v680_v12 = vsel %vm5_vm0, %v1164_v7, %v1163_v5  ;;  %v1188_v55 = vld [vmem:[%s2134_s0 + $0x142] ss:$8 sm:$0xf0]  }
  0x52   :  { %v1162_v10 = vld [vmem:[%s2134_s0 + $0x43] ss:$8 sm:$0xf0]   ;;  %v1185_v56 = vld [vmem:[%s2134_s0 + $0x42] ss:$8 sm:$0xf]  }
  0x53   :  { %v669_v13 = vsel %vm5_vm0, %v1162_v10, %v1161_v8  ;;  %v1165_v15 = vld [vmem:[%s2134_s0 + $0x243] ss:$8 sm:$0xf]  }
  0x54   :  { %430 = vrot.lane.b32.xlu2 %v429_v29, %s1263_s14  ;;  %v1144_v29 = vld [vmem:[%s2134_s0 + $0x84] ss:$8 sm:$0xf0]   ;;  %v1166_v16 = vld [vmem:[%s2134_s0 + $0x243] ss:$8 sm:$0xf0]  }
  0x55   :  { %452 = vrot.lane.b32.xlu1 %v451_v30, %s1263_s14  ;;  %v1057_v30 = vld [vmem:[%s2134_s0 + $0x2c0] ss:$8 sm:$0xf]   ;;  %v1169_v17 = vld [vmem:[%s2134_s0 + $0x183] ss:$8 sm:$0xf]   ;;  %v691_v23 = vsel %vm5_vm0, %v1166_v16, %v1165_v15 }
  0x56   :  { %441 = vrot.lane.b32.xlu0 %v440_v31, %s1263_s14  ;;  %v1058_v31 = vld [vmem:[%s2134_s0 + $0x2c0] ss:$8 sm:$0xf0]   ;;  %v1170_v19 = vld [vmem:[%s2134_s0 + $0x183] ss:$8 sm:$0xf0]  }
  0x57   :  { %v104_v34 = vsel %vm5_vm0, %v1058_v31, %v1057_v30  ;;  %v713_v24 = vsel %vm5_vm0, %v1170_v19, %v1169_v17  ;;  %v1171_v27 = vld [vmem:[%s2134_s0 + $0x283] ss:$8 sm:$0xf]   ;;  %v1200_v15 = vld [vmem:[%s2134_s0 + $0x1c2] ss:$8 sm:$0xf0]  }
  0x58   :  { %107 = vst.msk [vmem:[#allocation0 + $0x58] sm:$0xff] %vm7_vm1, %v104_v34   ;;  %v1176_v31 = vld [vmem:[%s2134_s0 + $0x1c3] ss:$8 sm:$0xf0]  }
  0x59   :  { %v1173_v32 = vld [vmem:[%s2134_s0 + $0xc3] ss:$8 sm:$0xf]   ;;  %v1197_v16 = vld [vmem:[%s2134_s0 + $0xc2] ss:$8 sm:$0xf]  }
  0x5a   :  { %v1174_v34 = vld [vmem:[%s2134_s0 + $0xc3] ss:$8 sm:$0xf0]  }
  0x5b   :  { %v735_v37 = vsel %vm5_vm0, %v1174_v34, %v1173_v32  ;;  %v1178_v40 = vld [vmem:[%s2134_s0 + $0x2c3] ss:$8 sm:$0xf0]  }
  0x5c   :  { %463 = vrot.lane.b32.xlu2 %v462_v41, %s1263_s14  ;;  %v571_v41 = vsel %vm5_vm0, %v1144_v29, %v1143_v28  ;;  %v1172_v28 = vld [vmem:[%s2134_s0 + $0x283] ss:$8 sm:$0xf0]  }
  0x5d   :  { %485 = vrot.lane.b32.xlu1 %v484_v47, %s1263_s14  ;;  %v1152_v47 = vld [vmem:[%s2134_s0 + $0x1c4] ss:$8 sm:$0xf0]   ;;  %v1175_v29 = vld [vmem:[%s2134_s0 + $0x1c3] ss:$8 sm:$0xf]   ;;  %v724_v35 = vsel %vm5_vm0, %v1172_v28, %v1171_v27 }
  0x5e   :  { %474 = vrot.lane.b32.xlu0 %v473_v49, %s1263_s14  ;;  %v615_v52 = vsel %vm5_vm0, %v1152_v47, %v1151_v45  ;;  %v746_v36 = vsel %vm5_vm0, %v1176_v31, %v1175_v29  ;;  %v1206_v27 = vld [vmem:[%s2134_s0 + $0x101] ss:$8 sm:$0xf0]  }
  0x5f   :  { %v1203_v28 = vld [vmem:[%s2134_s0 + $0x1] ss:$8 sm:$0xf]  }
  0x64   :  { %496 = vrot.lane.b32.xlu2 %v495_v61, %s1263_s14  ;;  %s1264_s14 = smov 8  }
  0x65   :  { %517 = vrot.lane.b32.xlu1 %v516_v1, %s1264_s14  ;;  %v637_v1 = vsel %vm5_vm0, %v1156_v62, %v1155_v60 }
  0x66   :  { %v158_v6 = vpop.permute.xlu2 %157   ;;  %507 = vrot.lane.b32.xlu0 %v506_v3, %s1264_s14  ;;  %v1159_v3 = vld [vmem:[%s2134_s0 + $0x203] ss:$8 sm:$0xf]  }
  0x67   :  { %161 = vst.msk [vmem:[#allocation0 + $0x28] sm:$0xff] %vm116_vm2, %v158_v6   ;;  %v658_v11 = vsel %vm5_vm0, %v1160_v4, %v1159_v3  ;;  %v1194_v3 = vld [vmem:[%s2134_s0 + $0x182] ss:$8 sm:$0xf0]  }
  0x68   :  { %v1191_v4 = vld [vmem:[%s2134_s0 + $0x82] ss:$8 sm:$0xf]  }
  0x6c   :  { %528 = vrot.lane.b32.xlu2 %v527_v14, %s1264_s14 }
  0x6d   :  { %550 = vrot.lane.b32.xlu1 %v549_v20, %s1264_s14  ;;  %v1167_v20 = vld [vmem:[%s2134_s0 + $0x83] ss:$8 sm:$0xf]  }
  0x6e   :  { %v169_v25 = vpop.permute.xlu2 %168   ;;  %539 = vrot.lane.b32.xlu0 %v538_v22, %s1264_s14  ;;  %v1168_v22 = vld [vmem:[%s2134_s0 + $0x83] ss:$8 sm:$0xf0]  }
  0x6f   :  { %172 = vst.msk [vmem:[#allocation0 + $0x48] sm:$0xff] %vm116_vm2, %v169_v25   ;;  %v702_v25 = vsel %vm5_vm0, %v1168_v22, %v1167_v20 }
  0x74   :  { %561 = vrot.lane.b32.xlu2 %v560_v33, %s1264_s14 }
  0x75   :  { %583 = vrot.lane.b32.xlu1 %v582_v39, %s1264_s14  ;;  %v1177_v39 = vld [vmem:[%s2134_s0 + $0x2c3] ss:$8 sm:$0xf]  }
  0x76   :  { %v202_v42 = vpop.permute.xlu2 %201   ;;  %572 = vrot.lane.b32.xlu0 %v571_v41, %s1264_s14  ;;  %v136_v46 = vpop.permute.xlu1 %135   ;;  %v1181_v41 = vld [vmem:[%s2134_s0 + $0x102] ss:$8 sm:$0xf]   ;;  %v757_v47 = vsel %vm5_vm0, %v1178_v40, %v1177_v39  ;;  %v1212_v39 = vld [vmem:[%s2134_s0 + $0x141] ss:$8 sm:$0xf0]  }
  0x77   :  { %205 = vst.msk [vmem:[#allocation0 + $0x50] sm:$0xff] %vm116_vm2, %v202_v42   ;;  %v778_v48 = vsel %vm5_vm0, %v1182_v43, %v1181_v41  ;;  %v1209_v40 = vld [vmem:[%s2134_s0 + $0x41] ss:$8 sm:$0xf]  }
  0x78   :  { %139 = vst.msk [vmem:[#allocation0 + $0x40] sm:$0xff] %vm116_vm2, %v136_v46   ;;  %v115_v49 = vpop.permute.xlu0 %114   ;;  %v1180_v46 = vld [vmem:[%s2134_s0 + $0x2] ss:$8 sm:$0xf0]  }
  0x79   :  { %117 = vst.msk [vmem:[#allocation0] sm:$0xff] %vm116_vm2, %v115_v49   ;;  %v768_v49 = vsel %vm5_vm0, %v1180_v46, %v1179_v44 }
  0x7c   :  { %594 = vrot.lane.b32.xlu2 %v593_v51, %s1264_s14  ;;  %v1183_v51 = vld [vmem:[%s2134_s0 + $0x202] ss:$8 sm:$0xf]  }
  0x7d   :  { %616 = vrot.lane.b32.xlu1 %v615_v52, %s1264_s14  ;;  %v1184_v52 = vld [vmem:[%s2134_s0 + $0x202] ss:$8 sm:$0xf0]  }
  0x7e   :  { %v235_v54 = vpop.permute.xlu2 %234   ;;  %605 = vrot.lane.b32.xlu0 %v604_v53, %s1264_s14  ;;  %v147_v58 = vpop.permute.xlu1 %146   ;;  %v1187_v53 = vld [vmem:[%s2134_s0 + $0x142] ss:$8 sm:$0xf]   ;;  %v789_v59 = vsel %vm5_vm0, %v1184_v52, %v1183_v51  ;;  %v1218_v51 = vld [vmem:[%s2134_s0 + $0x181] ss:$8 sm:$0xf0]  }
  0x7f   :  { %238 = vst.msk [vmem:[#allocation0 + $0x58] sm:$0xff] %vm116_vm2, %v235_v54   ;;  %v811_v60 = vsel %vm5_vm0, %v1188_v55, %v1187_v53  ;;  %v1215_v52 = vld [vmem:[%s2134_s0 + $0x81] ss:$8 sm:$0xf]  }
  0x80   :  { %150 = vst.msk [vmem:[#allocation0 + $0x8] sm:$0xff] %vm116_vm2, %v147_v58   ;;  %v125_v61 = vpop.permute.xlu0 %124   ;;  %v1186_v58 = vld [vmem:[%s2134_s0 + $0x42] ss:$8 sm:$0xf0]  }
  0x81   :  { %128 = vst.msk [vmem:[#allocation0 + $0x20] sm:$0xff] %vm116_vm2, %v125_v61   ;;  %v800_v61 = vsel %vm5_vm0, %v1186_v58, %v1185_v56 }
  0x84   :  { %627 = vrot.lane.b32.xlu2 %v626_v63, %s1264_s14  ;;  %s1265_s14 = smov 6   ;;  %v1189_v63 = vld [vmem:[%s2134_s0 + $0x242] ss:$8 sm:$0xf]  }
  0x85   :  { %648 = vrot.lane.b32.xlu1 %v647_v0, %s1265_s14  ;;  %v1190_v0 = vld [vmem:[%s2134_s0 + $0x242] ss:$8 sm:$0xf0]  }
  0x86   :  { %v267_v2 = vpop.permute.xlu2 %266   ;;  %638 = vrot.lane.b32.xlu0 %v637_v1, %s1265_s14  ;;  %v191_v6 = vpop.permute.xlu1 %190   ;;  %v1193_v1 = vld [vmem:[%s2134_s0 + $0x182] ss:$8 sm:$0xf]   ;;  %v822_v7 = vsel %vm5_vm0, %v1190_v0, %v1189_v63  ;;  %v1224_v63 = vld [vmem:[%s2134_s0 + $0x1c1] ss:$8 sm:$0xf0]  }
  0x87   :  { %270 = vst.msk [vmem:[#allocation0 + $0x40] sm:$0xff] %vm247_vm3, %v267_v2   ;;  %v844_v8 = vsel %vm5_vm0, %v1194_v3, %v1193_v1  ;;  %v1221_v0 = vld [vmem:[%s2134_s0 + $0xc1] ss:$8 sm:$0xf]  }
  0x88   :  { %194 = vst.msk [vmem:[#allocation0 + $0x30] sm:$0xff] %vm116_vm2, %v191_v6   ;;  %v180_v9 = vpop.permute.xlu0 %179   ;;  %v1192_v6 = vld [vmem:[%s2134_s0 + $0x82] ss:$8 sm:$0xf0]  }
  0x89   :  { %183 = vst.msk [vmem:[#allocation0 + $0x10] sm:$0xff] %vm116_vm2, %v180_v9   ;;  %v833_v9 = vsel %vm5_vm0, %v1192_v6, %v1191_v4 }
  0x8c   :  { %659 = vrot.lane.b32.xlu2 %v658_v11, %s1265_s14  ;;  %v1195_v11 = vld [vmem:[%s2134_s0 + $0x282] ss:$8 sm:$0xf]  }
  0x8d   :  { %681 = vrot.lane.b32.xlu1 %v680_v12, %s1265_s14  ;;  %v1196_v12 = vld [vmem:[%s2134_s0 + $0x282] ss:$8 sm:$0xf0]  }
  0x8e   :  { %v300_v14 = vpop.permute.xlu2 %299   ;;  %670 = vrot.lane.b32.xlu0 %v669_v13, %s1265_s14  ;;  %v224_v18 = vpop.permute.xlu1 %223   ;;  %v1199_v13 = vld [vmem:[%s2134_s0 + $0x1c2] ss:$8 sm:$0xf]   ;;  %v855_v19 = vsel %vm5_vm0, %v1196_v12, %v1195_v11 }
  0x8f   :  { %303 = vst.msk [vmem:[#allocation0 + $0x48] sm:$0xff] %vm247_vm3, %v300_v14   ;;  %v877_v20 = vsel %vm5_vm0, %v1200_v15, %v1199_v13 }
  0x90   :  { %227 = vst.msk [vmem:[#allocation0 + $0x38] sm:$0xff] %vm116_vm2, %v224_v18   ;;  %v213_v21 = vpop.permute.xlu0 %212   ;;  %v1198_v18 = vld [vmem:[%s2134_s0 + $0xc2] ss:$8 sm:$0xf0]  }
  0x91   :  { %216 = vst.msk [vmem:[#allocation0 + $0x18] sm:$0xff] %vm116_vm2, %v213_v21   ;;  %v866_v21 = vsel %vm5_vm0, %v1198_v18, %v1197_v16 }
  0x94   :  { %692 = vrot.lane.b32.xlu2 %v691_v23, %s1265_s14  ;;  %v1201_v23 = vld [vmem:[%s2134_s0 + $0x2c2] ss:$8 sm:$0xf]  }
  0x95   :  { %714 = vrot.lane.b32.xlu1 %v713_v24, %s1265_s14  ;;  %v1202_v24 = vld [vmem:[%s2134_s0 + $0x2c2] ss:$8 sm:$0xf0]  }
  0x96   :  { %v333_v26 = vpop.permute.xlu2 %332   ;;  %703 = vrot.lane.b32.xlu0 %v702_v25, %s1265_s14  ;;  %v1205_v25 = vld [vmem:[%s2134_s0 + $0x101] ss:$8 sm:$0xf]   ;;  %v888_v31 = vsel %vm5_vm0, %v1202_v24, %v1201_v23 }
  0x97   :  { %336 = vst.msk [vmem:[#allocation0 + $0x50] sm:$0xff] %vm247_vm3, %v333_v26   ;;  %v256_v30 = vpop.permute.xlu1 %255   ;;  %v909_v32 = vsel %vm5_vm0, %v1206_v27, %v1205_v25 }
  0x98   :  { %259 = vst.msk [vmem:[#allocation0 + $0x20] sm:$0xff] %vm247_vm3, %v256_v30   ;;  %v246_v33 = vpop.permute.xlu0 %245   ;;  %v1204_v30 = vld [vmem:[%s2134_s0 + $0x1] ss:$8 sm:$0xf0]  }
  0x99   :  { %248 = vst.msk [vmem:[#allocation0] sm:$0xff] %vm247_vm3, %v246_v33   ;;  %v899_v33 = vsel %vm5_vm0, %v1204_v30, %v1203_v28 }
  0x9c   :  { %725 = vrot.lane.b32.xlu2 %v724_v35, %s1265_s14  ;;  %v1207_v35 = vld [vmem:[%s2134_s0 + $0x201] ss:$8 sm:$0xf]  }
  0x9d   :  { %747 = vrot.lane.b32.xlu1 %v746_v36, %s1265_s14  ;;  %v1208_v36 = vld [vmem:[%s2134_s0 + $0x201] ss:$8 sm:$0xf0]  }
  0x9e   :  { %v366_v38 = vpop.permute.xlu2 %365   ;;  %736 = vrot.lane.b32.xlu0 %v735_v37, %s1265_s14  ;;  %v1211_v37 = vld [vmem:[%s2134_s0 + $0x141] ss:$8 sm:$0xf]   ;;  %v920_v43 = vsel %vm5_vm0, %v1208_v36, %v1207_v35 }
  0x9f   :  { %369 = vst.msk [vmem:[#allocation0 + $0x58] sm:$0xff] %vm247_vm3, %v366_v38   ;;  %v289_v42 = vpop.permute.xlu1 %288   ;;  %v942_v44 = vsel %vm5_vm0, %v1212_v39, %v1211_v37 }
  0xa0   :  { %292 = vst.msk [vmem:[#allocation0 + $0x28] sm:$0xff] %vm247_vm3, %v289_v42   ;;  %v278_v45 = vpop.permute.xlu0 %277   ;;  %v1210_v42 = vld [vmem:[%s2134_s0 + $0x41] ss:$8 sm:$0xf0]  }
  0xa1   :  { %281 = vst.msk [vmem:[#allocation0 + $0x8] sm:$0xff] %vm247_vm3, %v278_v45   ;;  %v931_v45 = vsel %vm5_vm0, %v1210_v42, %v1209_v40 }
  0xa4   :  { %758 = vrot.lane.b32.xlu2 %v757_v47, %s1265_s14  ;;  %s1266_s14 = smov 4   ;;  %v1213_v47 = vld [vmem:[%s2134_s0 + $0x241] ss:$8 sm:$0xf]  }
  0xa5   :  { %779 = vrot.lane.b32.xlu1 %v778_v48, %s1266_s14  ;;  %v1214_v48 = vld [vmem:[%s2134_s0 + $0x241] ss:$8 sm:$0xf0]  }
  0xa6   :  { %v398_v50 = vpop.permute.xlu2 %397   ;;  %769 = vrot.lane.b32.xlu0 %v768_v49, %s1266_s14  ;;  %v1217_v49 = vld [vmem:[%s2134_s0 + $0x181] ss:$8 sm:$0xf]   ;;  %v953_v55 = vsel %vm5_vm0, %v1214_v48, %v1213_v47 }
  0xa7   :  { %401 = vst.msk [vmem:[#allocation0 + $0x40] sm:$0xff] %vm378_vm4, %v398_v50   ;;  %v322_v54 = vpop.permute.xlu1 %321   ;;  %v975_v56 = vsel %vm5_vm0, %v1218_v51, %v1217_v49 }
  0xa8   :  { %325 = vst.msk [vmem:[#allocation0 + $0x30] sm:$0xff] %vm247_vm3, %v322_v54   ;;  %v311_v57 = vpop.permute.xlu0 %310   ;;  %v1216_v54 = vld [vmem:[%s2134_s0 + $0x81] ss:$8 sm:$0xf0]  }
  0xa9   :  { %314 = vst.msk [vmem:[#allocation0 + $0x10] sm:$0xff] %vm247_vm3, %v311_v57   ;;  %v964_v57 = vsel %vm5_vm0, %v1216_v54, %v1215_v52 }
  0xac   :  { %790 = vrot.lane.b32.xlu2 %v789_v59, %s1266_s14  ;;  %v1219_v59 = vld [vmem:[%s2134_s0 + $0x281] ss:$8 sm:$0xf]  }
  0xad   :  { %812 = vrot.lane.b32.xlu1 %v811_v60, %s1266_s14  ;;  %v1220_v60 = vld [vmem:[%s2134_s0 + $0x281] ss:$8 sm:$0xf0]  }
  0xae   :  { %v431_v62 = vpop.permute.xlu2 %430   ;;  %801 = vrot.lane.b32.xlu0 %v800_v61, %s1266_s14  ;;  %v1223_v61 = vld [vmem:[%s2134_s0 + $0x1c1] ss:$8 sm:$0xf]   ;;  %v986_v3 = vsel %vm5_vm0, %v1220_v60, %v1219_v59 }
  0xaf   :  { %434 = vst.msk [vmem:[#allocation0 + $0x48] sm:$0xff] %vm378_vm4, %v431_v62   ;;  %v355_v2 = vpop.permute.xlu1 %354   ;;  %v1008_v4 = vsel %vm5_vm0, %v1224_v63, %v1223_v61 }
  0xb0   :  { %358 = vst.msk [vmem:[#allocation0 + $0x38] sm:$0xff] %vm247_vm3, %v355_v2   ;;  %v344_v5 = vpop.permute.xlu0 %343   ;;  %v1222_v2 = vld [vmem:[%s2134_s0 + $0xc1] ss:$8 sm:$0xf0]  }
  0xb1   :  { %347 = vst.msk [vmem:[#allocation0 + $0x18] sm:$0xff] %vm247_vm3, %v344_v5   ;;  %v997_v5 = vsel %vm5_vm0, %v1222_v2, %v1221_v0 }
  0xb4   :  { %823 = vrot.lane.b32.xlu2 %v822_v7, %s1266_s14  ;;  %v1225_v7 = vld [vmem:[%s2134_s0 + $0x2c1] ss:$8 sm:$0xf]  }
  0xb5   :  { %845 = vrot.lane.b32.xlu1 %v844_v8, %s1266_s14  ;;  %v1226_v8 = vld [vmem:[%s2134_s0 + $0x2c1] ss:$8 sm:$0xf0]   ;;  %s1268_s0 = smov [#allocation0]  }
  0xb6   :  { %v464_v10 = vpop.permute.xlu2 %463   ;;  %834 = vrot.lane.b32.xlu0 %v833_v9, %s1266_s14  ;;  %v1019_v11 = vsel %vm5_vm0, %v1226_v8, %v1225_v7 }
  0xb7   :  { %467 = vst.msk [vmem:[#allocation0 + $0x50] sm:$0xff] %vm378_vm4, %v464_v10   ;;  %v387_v14 = vpop.permute.xlu1 %386  }
  0xb8   :  { %390 = vst.msk [vmem:[#allocation0 + $0x20] sm:$0xff] %vm378_vm4, %v387_v14   ;;  %v377_v17 = vpop.permute.xlu0 %376  }
  0xb9   :  { %379 = vst.msk [vmem:[#allocation0] sm:$0xff] %vm378_vm4, %v377_v17  }
  0xbc   :  { %856 = vrot.lane.b32.xlu2 %v855_v19, %s1266_s14 }
  0xbd   :  { %878 = vrot.lane.b32.xlu1 %v877_v20, %s1266_s14 }
  0xbe   :  { %v497_v22 = vpop.permute.xlu2 %496   ;;  %867 = vrot.lane.b32.xlu0 %v866_v21, %s1266_s14 }
  0xbf   :  { %500 = vst.msk [vmem:[#allocation0 + $0x58] sm:$0xff] %vm378_vm4, %v497_v22   ;;  %v420_v26 = vpop.permute.xlu1 %419  }
  0xc0   :  { %423 = vst.msk [vmem:[#allocation0 + $0x28] sm:$0xff] %vm378_vm4, %v420_v26   ;;  %v409_v29 = vpop.permute.xlu0 %408  }
  0xc1   :  { %412 = vst.msk [vmem:[#allocation0 + $0x8] sm:$0xff] %vm378_vm4, %v409_v29  }
  0xc4   :  { %889 = vrot.lane.b32.xlu2 %v888_v31, %s1266_s14  ;;  %s1267_s14 = smov 2  }
  0xc5   :  { %910 = vrot.lane.b32.xlu1 %v909_v32, %s1267_s14 }
  0xc6   :  { %v529_v34 = vpop.permute.xlu2 %528   ;;  %900 = vrot.lane.b32.xlu0 %v899_v33, %s1267_s14 }
  0xc7   :  { %532 = vst.msk [vmem:[#allocation0 + $0x40] sm:$0xff] %vm509_vm5, %v529_v34   ;;  %v453_v38 = vpop.permute.xlu1 %452  }
  0xc8   :  { %456 = vst.msk [vmem:[#allocation0 + $0x30] sm:$0xff] %vm378_vm4, %v453_v38   ;;  %v442_v41 = vpop.permute.xlu0 %441  }
  0xc9   :  { %445 = vst.msk [vmem:[#allocation0 + $0x10] sm:$0xff] %vm378_vm4, %v442_v41  }
  0xcc   :  { %921 = vrot.lane.b32.xlu2 %v920_v43, %s1267_s14 }
  0xcd   :  { %943 = vrot.lane.b32.xlu1 %v942_v44, %s1267_s14 }
  0xce   :  { %v562_v46 = vpop.permute.xlu2 %561   ;;  %932 = vrot.lane.b32.xlu0 %v931_v45, %s1267_s14 }
  0xcf   :  { %565 = vst.msk [vmem:[#allocation0 + $0x48] sm:$0xff] %vm509_vm5, %v562_v46   ;;  %v486_v50 = vpop.permute.xlu1 %485  }
  0xd0   :  { %489 = vst.msk [vmem:[#allocation0 + $0x38] sm:$0xff] %vm378_vm4, %v486_v50   ;;  %v475_v53 = vpop.permute.xlu0 %474  }
  0xd1   :  { %478 = vst.msk [vmem:[#allocation0 + $0x18] sm:$0xff] %vm378_vm4, %v475_v53  }
  0xd4   :  { %954 = vrot.lane.b32.xlu2 %v953_v55, %s1267_s14 }
  0xd5   :  { %976 = vrot.lane.b32.xlu1 %v975_v56, %s1267_s14 }
  0xd6   :  { %v595_v58 = vpop.permute.xlu2 %594   ;;  %965 = vrot.lane.b32.xlu0 %v964_v57, %s1267_s14 }
  0xd7   :  { %598 = vst.msk [vmem:[#allocation0 + $0x50] sm:$0xff] %vm509_vm5, %v595_v58   ;;  %v518_v62 = vpop.permute.xlu1 %517  }
  0xd8   :  { %521 = vst.msk [vmem:[#allocation0 + $0x20] sm:$0xff] %vm509_vm5, %v518_v62   ;;  %v508_v1 = vpop.permute.xlu0 %507  }
  0xd9   :  { %510 = vst.msk [vmem:[#allocation0] sm:$0xff] %vm509_vm5, %v508_v1  }
  0xdc   :  { %987 = vrot.lane.b32.xlu2 %v986_v3, %s1267_s14 }
  0xdd   :  { %1009 = vrot.lane.b32.xlu1 %v1008_v4, %s1267_s14 }
  0xde   :  { %v628_v6 = vpop.permute.xlu2 %627   ;;  %998 = vrot.lane.b32.xlu0 %v997_v5, %s1267_s14 }
  0xdf   :  { %631 = vst.msk [vmem:[#allocation0 + $0x58] sm:$0xff] %vm509_vm5, %v628_v6   ;;  %v551_v9 = vpop.permute.xlu1 %550  }
  0xe0   :  { %554 = vst.msk [vmem:[#allocation0 + $0x28] sm:$0xff] %vm509_vm5, %v551_v9   ;;  %v540_v10 = vpop.permute.xlu0 %539  }
  0xe1   :  { %543 = vst.msk [vmem:[#allocation0 + $0x8] sm:$0xff] %vm509_vm5, %v540_v10  }
  0xe4   :  { %1020 = vrot.lane.b32.xlu2 %v1019_v11, %s1267_s14  ;;  %s1028_s14 = sshll.u32 %s1268_s0, 4  ;;  %s1029_s14 = int_to_ptr.vmem [resolvable:$true] %s1028_s14 }
  0xe6   :  { %v660_v12 = vpop.permute.xlu2 %659  }
  0xe7   :  { %663 = vst.msk [vmem:[#allocation0 + $0x40] sm:$0xff] %vm640_vm6, %v660_v12   ;;  %v584_v13 = vpop.permute.xlu1 %583  }
  0xe8   :  { %587 = vst.msk [vmem:[#allocation0 + $0x30] sm:$0xff] %vm509_vm5, %v584_v13   ;;  %v573_v14 = vpop.permute.xlu0 %572  }
  0xe9   :  { %576 = vst.msk [vmem:[#allocation0 + $0x10] sm:$0xff] %vm509_vm5, %v573_v14  }
  0xee   :  { %v693_v15 = vpop.permute.xlu2 %692  }
  0xef   :  { %696 = vst.msk [vmem:[#allocation0 + $0x48] sm:$0xff] %vm640_vm6, %v693_v15   ;;  %v617_v16 = vpop.permute.xlu1 %616  }
  0xf0   :  { %620 = vst.msk [vmem:[#allocation0 + $0x38] sm:$0xff] %vm509_vm5, %v617_v16   ;;  %v606_v17 = vpop.permute.xlu0 %605  }
  0xf1   :  { %609 = vst.msk [vmem:[#allocation0 + $0x18] sm:$0xff] %vm509_vm5, %v606_v17  }
  0xf6   :  { %v726_v18 = vpop.permute.xlu2 %725  }
  0xf7   :  { %729 = vst.msk [vmem:[#allocation0 + $0x50] sm:$0xff] %vm640_vm6, %v726_v18   ;;  %v649_v19 = vpop.permute.xlu1 %648  }
  0xf8   :  { %652 = vst.msk [vmem:[#allocation0 + $0x20] sm:$0xff] %vm640_vm6, %v649_v19   ;;  %v639_v20 = vpop.permute.xlu0 %638  }
  0xf9   :  { %641 = vst.msk [vmem:[#allocation0] sm:$0xff] %vm640_vm6, %v639_v20  }
  0xfe   :  { %v759_v21 = vpop.permute.xlu2 %758  }
  0xff   :  { %762 = vst.msk [vmem:[#allocation0 + $0x58] sm:$0xff] %vm640_vm6, %v759_v21   ;;  %v682_v22 = vpop.permute.xlu1 %681  }
 0x100   :  { %685 = vst.msk [vmem:[#allocation0 + $0x28] sm:$0xff] %vm640_vm6, %v682_v22   ;;  %v671_v23 = vpop.permute.xlu0 %670  }
 0x101   :  { %674 = vst.msk [vmem:[#allocation0 + $0x8] sm:$0xff] %vm640_vm6, %v671_v23  }
 0x106   :  { %v791_v24 = vpop.permute.xlu2 %790  }
 0x107   :  { %794 = vst.msk [vmem:[#allocation0 + $0x40] sm:$0xff] %vm771_vm7, %v791_v24   ;;  %v715_v25 = vpop.permute.xlu1 %714  }
 0x108   :  { %718 = vst.msk [vmem:[#allocation0 + $0x30] sm:$0xff] %vm640_vm6, %v715_v25   ;;  %v704_v26 = vpop.permute.xlu0 %703  }
 0x109   :  { %707 = vst.msk [vmem:[#allocation0 + $0x10] sm:$0xff] %vm640_vm6, %v704_v26  }
 0x10e   :  { %v824_v27 = vpop.permute.xlu2 %823  }
 0x10f   :  { %827 = vst.msk [vmem:[#allocation0 + $0x48] sm:$0xff] %vm771_vm7, %v824_v27   ;;  %v748_v28 = vpop.permute.xlu1 %747  }
 0x110   :  { %751 = vst.msk [vmem:[#allocation0 + $0x38] sm:$0xff] %vm640_vm6, %v748_v28   ;;  %v737_v29 = vpop.permute.xlu0 %736  }
 0x111   :  { %740 = vst.msk [vmem:[#allocation0 + $0x18] sm:$0xff] %vm640_vm6, %v737_v29  }
 0x116   :  { %v857_v30 = vpop.permute.xlu2 %856  }
 0x117   :  { %860 = vst.msk [vmem:[#allocation0 + $0x50] sm:$0xff] %vm771_vm7, %v857_v30   ;;  %v780_v31 = vpop.permute.xlu1 %779  }
 0x118   :  { %783 = vst.msk [vmem:[#allocation0 + $0x20] sm:$0xff] %vm771_vm7, %v780_v31   ;;  %v770_v32 = vpop.permute.xlu0 %769  }
 0x119   :  { %772 = vst.msk [vmem:[#allocation0] sm:$0xff] %vm771_vm7, %v770_v32  }
 0x11e   :  { %v890_v33 = vpop.permute.xlu2 %889  }
 0x11f   :  { %893 = vst.msk [vmem:[#allocation0 + $0x58] sm:$0xff] %vm771_vm7, %v890_v33   ;;  %v813_v34 = vpop.permute.xlu1 %812  }
 0x120   :  { %816 = vst.msk [vmem:[#allocation0 + $0x28] sm:$0xff] %vm771_vm7, %v813_v34   ;;  %v802_v35 = vpop.permute.xlu0 %801  }
 0x121   :  { %805 = vst.msk [vmem:[#allocation0 + $0x8] sm:$0xff] %vm771_vm7, %v802_v35  }
 0x126   :  { %v922_v36 = vpop.permute.xlu2 %921  }
 0x127   :  { %925 = vst.msk [vmem:[#allocation0 + $0x40] sm:$0xff] %vm902_vm8, %v922_v36   ;;  %v846_v37 = vpop.permute.xlu1 %845  }
 0x128   :  { %849 = vst.msk [vmem:[#allocation0 + $0x30] sm:$0xff] %vm771_vm7, %v846_v37   ;;  %v835_v38 = vpop.permute.xlu0 %834  }
 0x129   :  { %838 = vst.msk [vmem:[#allocation0 + $0x10] sm:$0xff] %vm771_vm7, %v835_v38  }
 0x12e   :  { %v955_v39 = vpop.permute.xlu2 %954  }
 0x12f   :  { %958 = vst.msk [vmem:[#allocation0 + $0x48] sm:$0xff] %vm902_vm8, %v955_v39   ;;  %v879_v40 = vpop.permute.xlu1 %878  }
 0x130   :  { %882 = vst.msk [vmem:[#allocation0 + $0x38] sm:$0xff] %vm771_vm7, %v879_v40   ;;  %v868_v41 = vpop.permute.xlu0 %867  }
 0x131   :  { %871 = vst.msk [vmem:[#allocation0 + $0x18] sm:$0xff] %vm771_vm7, %v868_v41  }
 0x136   :  { %v988_v42 = vpop.permute.xlu2 %987  }
 0x137   :  { %991 = vst.msk [vmem:[#allocation0 + $0x50] sm:$0xff] %vm902_vm8, %v988_v42   ;;  %v911_v43 = vpop.permute.xlu1 %910  }
 0x138   :  { %914 = vst.msk [vmem:[#allocation0 + $0x20] sm:$0xff] %vm902_vm8, %v911_v43   ;;  %v901_v44 = vpop.permute.xlu0 %900  }
 0x139   :  { %903 = vst.msk [vmem:[#allocation0] sm:$0xff] %vm902_vm8, %v901_v44  }
 0x13e   :  { %v1021_v45 = vpop.permute.xlu2 %1020  }
 0x13f   :  { %1024 = vst.msk [vmem:[#allocation0 + $0x58] sm:$0xff] %vm902_vm8, %v1021_v45   ;;  %v944_v46 = vpop.permute.xlu1 %943  }
 0x140   :  { %947 = vst.msk [vmem:[#allocation0 + $0x28] sm:$0xff] %vm902_vm8, %v944_v46   ;;  %v933_v47 = vpop.permute.xlu0 %932  }
 0x141   :  { %936 = vst.msk [vmem:[#allocation0 + $0x8] sm:$0xff] %vm902_vm8, %v933_v47  }
 0x147   :  { %v977_v48 = vpop.permute.xlu1 %976  }
 0x148   :  { %980 = vst.msk [vmem:[#allocation0 + $0x30] sm:$0xff] %vm902_vm8, %v977_v48   ;;  %v966_v49 = vpop.permute.xlu0 %965  }
 0x149   :  { %969 = vst.msk [vmem:[#allocation0 + $0x10] sm:$0xff] %vm902_vm8, %v966_v49  }
 0x14f   :  { %v1010_v50 = vpop.permute.xlu1 %1009  }
 0x150   :  { %1013 = vst.msk [vmem:[#allocation0 + $0x38] sm:$0xff] %vm902_vm8, %v1010_v50   ;;  %v999_v51 = vpop.permute.xlu0 %998  }
 0x151   :  { %1002 = vst.msk [vmem:[#allocation0 + $0x18] sm:$0xff] %vm902_vm8, %v999_v51  }
 0x152   :  { %1033 = dma.vmem_to_hbm [thread:$0]  %s1029_s14, 1536, %s1031_s1, [#allocation1]  }
 0x153   :  { %1259 = dma.done.wait [#allocation1], 1536  }
 0x154   :  { %1260 = vsyncadd [#allocation1], 4294965760 }
 0x155   :  { %1036 = vsyncpa [#allocation1], 1 }

</bundles_post_ra>
